<compile_context>
chip_gen: v6e
topology: v6e:2x2x1
jax: 0.10.0
libtpu: 0.0.40
codegen_flags: <defaults>
</compile_context>

<pallas_src>
import functools

import jax
import jax.numpy as jnp
import numpy as np
from jax import lax
from jax.experimental import pallas as pl
from jax.experimental.pallas import tpu as pltpu

GN_EPS = 1e-5  # PyTorch GroupNorm default eps


# ----------------------------- in-kernel helpers -----------------------------

def _group_norm_gmap(y, gmap, gmap_t, gamma, beta, denom):
    """GroupNorm over a (C, N) tile without reshapes (G > 1 case).

    gmap: (G, C) one-hot group-membership matrix, gmap_t its precomputed
    transpose; denom = (C // G) * N. Stats stay in f32.
    NOTE: one-pass E[x^2]-mean^2 variance; fine for normalized activations.
    """
    ch_sum = jnp.sum(y, axis=1, keepdims=True)        # (C, 1)
    ch_sq = jnp.sum(y * y, axis=1, keepdims=True)     # (C, 1)
    g_sum = jnp.dot(gmap, ch_sum, preferred_element_type=jnp.float32)    # (G, 1)
    g_sq = jnp.dot(gmap, ch_sq, preferred_element_type=jnp.float32)      # (G, 1)
    g_mean = g_sum / denom
    g_var = g_sq / denom - g_mean * g_mean
    mean_c = jnp.dot(gmap_t, g_mean, preferred_element_type=jnp.float32)  # (C,1)
    var_c = jnp.dot(gmap_t, g_var, preferred_element_type=jnp.float32)    # (C,1)
    return (y - mean_c) * lax.rsqrt(var_c + GN_EPS) * gamma + beta


def _group_norm_single(y, gamma, beta, denom):
    """GroupNorm with a single group: plain whole-tile statistics (f32)."""
    s1 = jnp.sum(y, axis=1, keepdims=True)             # (C, 1)
    s2 = jnp.sum(y * y, axis=1, keepdims=True)         # (C, 1)
    mean = jnp.sum(s1, axis=0, keepdims=True) / denom  # (1, 1)
    ex2 = jnp.sum(s2, axis=0, keepdims=True) / denom   # (1, 1)
    var = ex2 - mean * mean
    return (y - mean) * lax.rsqrt(var + GN_EPS) * gamma + beta


# ------------------------------ fused Pallas kernel ---------------------------

def _fused_kernel(xgn_ref, xngn_ref, ol_ref,
                  wqk_ref, wv_ref, wt_ref, pvec_ref,
                  bgmap_ref, bgmapT_ref,
                  wf_ref, fvec_ref, fgmap_ref, fgmapT_ref,
                  o_ref, fuse_ref,
                  *, blk_groups, blk_denom, fuse_denom, slope):
    """Full OverlapAttention forward for one batch element, fully in VMEM."""
    C = xgn_ref.shape[1]
    N = xgn_ref.shape[2]

    x = xgn_ref[0]                       # (C, N) f32, running activation
    x16 = x.astype(jnp.bfloat16)
    ol = ol_ref[0]                       # (1, N) f32, per-query overlap score
    ones_row = jnp.ones((1, N), jnp.bfloat16)   # hoisted: column-sum matvec lhs

    # conv_fuse slab slot 0: x_ngn (already bf16, pre-cast on host)
    fuse_ref[0:C, :] = xngn_ref[0]

    # ---- 4 OverlapAttentionBlocks (statically unrolled, weights stacked) ----
    for i in range(4):
        pv = pvec_ref[i]                 # (C, 4) = [bv, bt, gamma, beta]
        bv, bt = pv[:, 0:1], pv[:, 1:2]
        gamma, beta = pv[:, 2:3], pv[:, 3:4]

        # shared q/k weight (bias-free, bf16): qk = Wqk @ x   -> (C/4, N)
        qk = jnp.dot(wqk_ref[i], x16, preferred_element_type=jnp.float32)
        qk16 = qk.astype(jnp.bfloat16)
        # fold the per-query overlap scale into the lhs (1-vreg multiply)
        qk_l16 = (qk * ol).astype(jnp.bfloat16)

        # att[n, m] = ol[n] * sum_d qk[d, n] * qk[d, m]  (lhs-transposed matmul)
        att = lax.dot_general(qk_l16, qk16, (((0,), (0,)), ((), ())),
                              preferred_element_type=jnp.float32)     # (N, N)

        # row softmax over keys (last dim); stats in f32
        p = jnp.exp(att - jnp.max(att, axis=-1, keepdims=True))
        r_row = pl.reciprocal(jnp.sum(p, axis=-1, keepdims=True), approx=True)
        p16 = (p * r_row).astype(jnp.bfloat16)   # row-normalized attention

        # column re-normalization (torch dim=1 == query axis), folded into x_r.
        # Column sums ride the idle MXU instead of an axis-0 reduce.
        col = jnp.dot(ones_row, p16, preferred_element_type=jnp.float32)  # (1,N)
        rec_col = pl.reciprocal(1e-9 + col, approx=True)

        # value path: v_conv (with bias), then x_v @ attention, col-norm last
        xv = jnp.dot(wv_ref[i], x16, preferred_element_type=jnp.float32) + bv
        x_r = jnp.dot(xv.astype(jnp.bfloat16), p16,
                      preferred_element_type=jnp.float32) * rec_col   # (C, N)

        # residual refinement: trans_conv -> GroupNorm(C//32) -> ReLU -> skip
        t = jnp.dot(wt_ref[i], (x - x_r).astype(jnp.bfloat16),
                    preferred_element_type=jnp.float32) + bt
        if blk_groups == 1:
            t = _group_norm_single(t, gamma, beta, blk_denom)
        else:
            t = _group_norm_gmap(t, bgmap_ref[...], bgmapT_ref[...],
                                 gamma, beta, blk_denom)
        x = x + jnp.maximum(t, 0.0)

        # bf16 cast reused as next block input AND as conv_fuse slab slot i+1
        x16 = x.astype(jnp.bfloat16)
        fuse_ref[(i + 1) * C:(i + 2) * C, :] = x16

    # ---- conv_fuse: single K=5C matmul against the resident bf16 slab --------
    y = jnp.dot(wf_ref[...], fuse_ref[...],
                preferred_element_type=jnp.float32)                    # (5C, N)
    fgamma, fbeta = fvec_ref[:, 0:1], fvec_ref[:, 1:2]
    y = _group_norm_gmap(y, fgmap_ref[...], fgmapT_ref[...],
                         fgamma, fbeta, fuse_denom)
    o_ref[0] = jnp.where(y >= 0.0, y, slope * y)                       # LeakyReLU


# ------------------------------ host-side wrapper ------------------------------

def _make_group_maps(C, G):
    cpg = C // G
    gmap = (jnp.arange(G)[:, None] == (jnp.arange(C)[None, :] // cpg)
            ).astype(jnp.float32)
    return gmap, gmap.T


def _pack_params(params, C):
    """Stack per-block weights (bf16) and pack per-channel vectors (f32)."""
    blks = [params["block1"], params["block2"], params["block3"], params["block4"]]
    wqk = jnp.stack([b["wqk"] for b in blks]).astype(jnp.bfloat16)     # (4, C/4, C)
    wv = jnp.stack([b["wv"] for b in blks]).astype(jnp.bfloat16)       # (4, C, C)
    wt = jnp.stack([b["wt"] for b in blks]).astype(jnp.bfloat16)       # (4, C, C)
    pvec = jnp.stack([jnp.concatenate(
        [b["bv"], b["bt"], b["gamma"], b["beta"]], axis=1) for b in blks])  # (4,C,4)
    f = params["fuse"]
    wf = f["wf"].astype(jnp.bfloat16)                                  # (5C, 5C)
    fvec = jnp.concatenate([f["gamma"], f["beta"]], axis=1)            # (5C, 2)
    return wqk, wv, wt, pvec, wf, fvec


def overlap_attention_forward(x_gn, x_ngn, ol, params):
    B, C, N = x_gn.shape
    C5 = 5 * C
    Gb = max(C // 32, 1)
    Gf = 16

    wqk, wv, wt, pvec, wf, fvec = _pack_params(params, C)
    bgmap, bgmapT = _make_group_maps(C, Gb)
    fgmap, fgmapT = _make_group_maps(C5, Gf)

    kernel = functools.partial(
        _fused_kernel,
        blk_groups=Gb,
        blk_denom=float((C // Gb) * N),
        fuse_denom=float((C5 // Gf) * N),
        slope=0.2,
    )

    return pl.pallas_call(
        kernel,
        out_shape=jax.ShapeDtypeStruct((B, C5, N), jnp.float32),
        grid_spec=pltpu.PrefetchScalarGridSpec(
            num_scalar_prefetch=0,
            grid=(B,),
            in_specs=[
                pl.BlockSpec((1, C, N), lambda b: (b, 0, 0)),        # x_gn (f32)
                pl.BlockSpec((1, C, N), lambda b: (b, 0, 0)),        # x_ngn (bf16)
                pl.BlockSpec((1, 1, N), lambda b: (b, 0, 0)),        # ol (B,1,N) lane-dense
                pl.BlockSpec((4, C // 4, C), lambda b: (0, 0, 0)),   # wqk (shared q/k, bf16)
                pl.BlockSpec((4, C, C), lambda b: (0, 0, 0)),        # wv (bf16)
                pl.BlockSpec((4, C, C), lambda b: (0, 0, 0)),        # wt (bf16)
                pl.BlockSpec((4, C, 4), lambda b: (0, 0, 0)),        # [bv,bt,gamma,beta]
                pl.BlockSpec((Gb, C), lambda b: (0, 0)),             # block gmap
                pl.BlockSpec((C, Gb), lambda b: (0, 0)),             # block gmap^T
                pl.BlockSpec((C5, C5), lambda b: (0, 0)),            # Wf (bf16, un-split)
                pl.BlockSpec((C5, 2), lambda b: (0, 0)),             # fuse [gamma,beta]
                pl.BlockSpec((Gf, C5), lambda b: (0, 0)),            # fuse gmap
                pl.BlockSpec((C5, Gf), lambda b: (0, 0)),            # fuse gmap^T
            ],
            out_specs=pl.BlockSpec((1, C5, N), lambda b: (b, 0, 0)),
            scratch_shapes=[pltpu.VMEM((C5, N), jnp.bfloat16)],      # conv_fuse slab
        ),
        compiler_params=pltpu.CompilerParams(
            dimension_semantics=("parallel",),        # batch axis -> both TCs on v7x
            vmem_limit_bytes=48 * 1024 * 1024,        # explicit; tiny usage at these shapes
        ),
    )(x_gn, x_ngn.astype(jnp.bfloat16), ol.reshape(B, 1, N),
      wqk, wv, wt, pvec, bgmap, bgmapT, wf, fvec, fgmap, fgmapT)


# ------------------------------ parameter setup -------------------------------

def init_block_params(key, C):
    ks = jax.random.split(key, 5)
    s = 1.0 / np.sqrt(C)
    return {
        "wqk": jax.random.uniform(ks[0], (C // 4, C), jnp.float32, -s, s),
        "wv": jax.random.uniform(ks[1], (C, C), jnp.float32, -s, s),
        "bv": jax.random.uniform(ks[2], (C, 1), jnp.float32, -s, s),
        "wt": jax.random.uniform(ks[3], (C, C), jnp.float32, -s, s),
        "bt": jax.random.uniform(ks[4], (C, 1), jnp.float32, -s, s),
        "gamma": jnp.ones((C, 1), jnp.float32),
        "beta": jnp.zeros((C, 1), jnp.float32),
    }


def init_fuse_params(key, C5):
    s = 1.0 / np.sqrt(C5)
    return {
        "wf": jax.random.uniform(key, (C5, C5), jnp.float32, -s, s),
        "gamma": jnp.ones((C5, 1), jnp.float32),
        "beta": jnp.zeros((C5, 1), jnp.float32),
    }


# --------------------------- plain-JAX reference ------------------------------
# Mirrors the PyTorch semantics/ordering (exact f32 softmax, exact divides,
# f32 GroupNorm stats) with the kernel's bf16-operand MXU policy.

def _block_ref(x, ol, p):
    B, C, N = x.shape
    xb = x.astype(jnp.bfloat16)
    qk = jnp.einsum("dc,bcn->bdn", p["wqk"].astype(jnp.bfloat16), xb,
                    preferred_element_type=jnp.float32)
    qkb = qk.astype(jnp.bfloat16)
    att = jnp.einsum("bdn,bdm->bnm", qkb, qkb,
                     preferred_element_type=jnp.float32)
    att = att * ol[:, :, None]
    att = jax.nn.softmax(att, axis=-1)
    att = att / (1e-9 + att.sum(axis=1, keepdims=True))
    xv = jnp.einsum("oc,bcn->bon", p["wv"].astype(jnp.bfloat16), xb,
                    preferred_element_type=jnp.float32) + p["bv"][None]
    x_r = jnp.einsum("bcn,bnm->bcm", xv.astype(jnp.bfloat16),
                     att.astype(jnp.bfloat16),
                     preferred_element_type=jnp.float32)
    t = jnp.einsum("oc,bcn->bon", p["wt"].astype(jnp.bfloat16),
                   (x - x_r).astype(jnp.bfloat16),
                   preferred_element_type=jnp.float32) + p["bt"][None]
    G = max(C // 32, 1)
    tg = t.reshape(B, G, C // G, N)
    mean = tg.mean(axis=(2, 3), keepdims=True)
    var = tg.var(axis=(2, 3), keepdims=True)
    tn = ((tg - mean) / jnp.sqrt(var + GN_EPS)).reshape(B, C, N)
    tn = tn * p["gamma"][None] + p["beta"][None]
    return x + jnp.maximum(tn, 0.0)


def _fuse_ref(x, p, slope=0.2):
    B, C5, N = x.shape
    y = jnp.einsum("oc,bcn->bon", p["wf"].astype(jnp.bfloat16),
                   x.astype(jnp.bfloat16), preferred_element_type=jnp.float32)
    G = 16
    yg = y.reshape(B, G, C5 // G, N)
    mean = yg.mean(axis=(2, 3), keepdims=True)
    var = yg.var(axis=(2, 3), keepdims=True)
    yn = ((yg - mean) / jnp.sqrt(var + GN_EPS)).reshape(B, C5, N)
    yn = yn * p["gamma"][None] + p["beta"][None]
    return jnp.where(yn >= 0, yn, slope * yn)


# ------------------------------------ main ------------------------------------

if __name__ == "__main__":
    # dim must be a multiple of 32 (GroupNorm(dim // 32, dim)); N=128 for lane
    # alignment. Smallest consistent config: B=2, dim=32, N=128.
    B, C, N = 2, 32, 128
    key = jax.random.PRNGKey(0)
    k_x, k_xn, k_ol, k1, k2, k3, k4, kf = jax.random.split(key, 8)

    x_gn = jax.random.normal(k_x, (B, C, N), jnp.float32)
    x_ngn = jax.random.normal(k_xn, (B, C, N), jnp.float32)
    ol = jax.random.uniform(k_ol, (B, N), jnp.float32)

    params = {
        "block1": init_block_params(k1, C),
        "block2": init_block_params(k2, C),
        "block3": init_block_params(k3, C),
        "block4": init_block_params(k4, C),
        "fuse": init_fuse_params(kf, 5 * C),
    }

    out = jax.jit(overlap_attention_forward)(x_gn, x_ngn, ol, params)
    out = jax.block_until_ready(out)
    assert out.shape == (B, 5 * C, N)

    # numerical check against a plain-JAX reference with matching bf16-MXU policy
    x1 = _block_ref(x_gn, ol, params["block1"])
    x2 = _block_ref(x1, ol, params["block2"])
    x3 = _block_ref(x2, ol, params["block3"])
    x4 = _block_ref(x3, ol, params["block4"])
    ref = _fuse_ref(jnp.concatenate([x_ngn, x1, x2, x3, x4], axis=1),
                    params["fuse"])
    np.testing.assert_allclose(np.asarray(out), np.asarray(ref),
                               rtol=2e-2, atol=2e-2)

    print("KERNEL_OK")
</pallas_src>

<mosaic_0001>
module attributes {stable_mosaic.version = 11 : i64} {
  func.func @_fused_kernel(%arg0: i32, %arg1: memref<1x32x128xf32, #tpu.memory_space<vmem>>, %arg2: memref<1x32x128xbf16, #tpu.memory_space<vmem>>, %arg3: memref<1x1x128xf32, #tpu.memory_space<vmem>>, %arg4: memref<4x8x32xbf16, #tpu.memory_space<vmem>>, %arg5: memref<4x32x32xbf16, #tpu.memory_space<vmem>>, %arg6: memref<4x32x32xbf16, #tpu.memory_space<vmem>>, %arg7: memref<4x32x4xf32, #tpu.memory_space<vmem>>, %arg8: memref<1x32xf32, #tpu.memory_space<vmem>>, %arg9: memref<32x1xf32, #tpu.memory_space<vmem>>, %arg10: memref<160x160xbf16, #tpu.memory_space<vmem>>, %arg11: memref<160x2xf32, #tpu.memory_space<vmem>>, %arg12: memref<16x160xf32, #tpu.memory_space<vmem>>, %arg13: memref<160x16xf32, #tpu.memory_space<vmem>>, %arg14: memref<1x160x128xf32, #tpu.memory_space<vmem>>, %arg15: memref<160x128xbf16, #tpu.memory_space<vmem>>) attributes {dimension_semantics = [#tpu.dimension_semantics<parallel>], iteration_bounds = array<i64: 2>, scalar_prefetch = 0 : i64, scratch_operands = 1 : i64, tpu.core_type = #tpu.core_type<tc>, window_params = [{transform_indices = @transform_0, window_bounds = array<i64: 1, 32, 128>}, {transform_indices = @transform_1, window_bounds = array<i64: 1, 32, 128>}, {transform_indices = @transform_2, window_bounds = array<i64: 1, 1, 128>}, {pipeline_mode = #tpu.pipeline_mode<synchronous>, transform_indices = @transform_3, window_bounds = array<i64: 4, 8, 32>}, {pipeline_mode = #tpu.pipeline_mode<synchronous>, transform_indices = @transform_4, window_bounds = array<i64: 4, 32, 32>}, {pipeline_mode = #tpu.pipeline_mode<synchronous>, transform_indices = @transform_5, window_bounds = array<i64: 4, 32, 32>}, {pipeline_mode = #tpu.pipeline_mode<synchronous>, transform_indices = @transform_6, window_bounds = array<i64: 4, 32, 4>}, {pipeline_mode = #tpu.pipeline_mode<synchronous>, transform_indices = @transform_7, window_bounds = array<i64: 1, 32>}, {pipeline_mode = #tpu.pipeline_mode<synchronous>, transform_indices = @transform_8, window_bounds = array<i64: 32, 1>}, {pipeline_mode = #tpu.pipeline_mode<synchronous>, transform_indices = @transform_9, window_bounds = array<i64: 160, 160>}, {pipeline_mode = #tpu.pipeline_mode<synchronous>, transform_indices = @transform_10, window_bounds = array<i64: 160, 2>}, {pipeline_mode = #tpu.pipeline_mode<synchronous>, transform_indices = @transform_11, window_bounds = array<i64: 16, 160>}, {pipeline_mode = #tpu.pipeline_mode<synchronous>, transform_indices = @transform_12, window_bounds = array<i64: 160, 16>}, {transform_indices = @transform_13, window_bounds = array<i64: 1, 160, 128>}]} {
    %c0 = arith.constant 0 : index
    %c0_0 = arith.constant 0 : index
    %c0_1 = arith.constant 0 : index
    %0 = vector.load %arg1[%c0, %c0_0, %c0_1] : memref<1x32x128xf32, #tpu.memory_space<vmem>>, vector<1x32x128xf32>
    %1 = vector.shape_cast %0 : vector<1x32x128xf32> to vector<32x128xf32>
    %2 = arith.truncf %1 : vector<32x128xf32> to vector<32x128xbf16>
    %c0_2 = arith.constant 0 : index
    %c0_3 = arith.constant 0 : index
    %c0_4 = arith.constant 0 : index
    %3 = vector.load %arg3[%c0_2, %c0_3, %c0_4] : memref<1x1x128xf32, #tpu.memory_space<vmem>>, vector<1x1x128xf32>
    %4 = vector.shape_cast %3 : vector<1x1x128xf32> to vector<1x128xf32>
    %cst = arith.constant 1.000000e+00 : bf16
    %5 = vector.broadcast %cst : bf16 to vector<1x128xbf16>
    %c0_5 = arith.constant 0 : index
    %c0_6 = arith.constant 0 : index
    %c0_7 = arith.constant 0 : index
    %6 = vector.load %arg2[%c0_5, %c0_6, %c0_7] : memref<1x32x128xbf16, #tpu.memory_space<vmem>>, vector<1x32x128xbf16>
    %7 = vector.shape_cast %6 : vector<1x32x128xbf16> to vector<32x128xbf16>
    %c0_8 = arith.constant 0 : index
    %c0_9 = arith.constant 0 : index
    %8 = vector.load %arg15[%c0_8, %c0_9] : memref<160x128xbf16, #tpu.memory_space<vmem>>, vector<32x128xbf16>
    tpu.vector_store %arg15[%c0_8, %c0_9], %7 {strides = array<i32>} : memref<160x128xbf16, #tpu.memory_space<vmem>>, vector<32x128xbf16>,
    %c0_10 = arith.constant 0 : index
    %c0_11 = arith.constant 0 : index
    %c0_12 = arith.constant 0 : index
    %9 = vector.load %arg7[%c0_10, %c0_11, %c0_12] : memref<4x32x4xf32, #tpu.memory_space<vmem>>, vector<1x32x4xf32>
    %10 = vector.shape_cast %9 : vector<1x32x4xf32> to vector<32x4xf32>
    %11 = vector.extract_strided_slice %10 {offsets = [0, 0], sizes = [32, 1], strides = [1, 1]} : vector<32x4xf32> to vector<32x1xf32>
    %12 = vector.extract_strided_slice %10 {offsets = [0, 1], sizes = [32, 1], strides = [1, 1]} : vector<32x4xf32> to vector<32x1xf32>
    %13 = vector.extract_strided_slice %10 {offsets = [0, 2], sizes = [32, 1], strides = [1, 1]} : vector<32x4xf32> to vector<32x1xf32>
    %14 = vector.extract_strided_slice %10 {offsets = [0, 3], sizes = [32, 1], strides = [1, 1]} : vector<32x4xf32> to vector<32x1xf32>
    %c0_13 = arith.constant 0 : index
    %c0_14 = arith.constant 0 : index
    %c0_15 = arith.constant 0 : index
    %15 = vector.load %arg4[%c0_13, %c0_14, %c0_15] : memref<4x8x32xbf16, #tpu.memory_space<vmem>>, vector<1x8x32xbf16>
    %16 = vector.shape_cast %15 : vector<1x8x32xbf16> to vector<8x32xbf16>
    %cst_16 = arith.constant dense<0.000000e+00> : vector<8x128xf32>
    %17 = tpu.matmul %16, %2, %cst_16 {dimension_numbers = #tpu.dot_dimension_numbers<[1], [0], [0], [1], [0, 0, 1, 1], [], []>} : vector<8x32xbf16>, vector<32x128xbf16>, vector<8x128xf32> -> vector<8x128xf32>
    %18 = arith.truncf %17 : vector<8x128xf32> to vector<8x128xbf16>
    %19 = vector.broadcast %4 : vector<1x128xf32> to vector<8x128xf32>
    %20 = arith.mulf %17, %19 : vector<8x128xf32>
    %21 = arith.truncf %20 : vector<8x128xf32> to vector<8x128xbf16>
    %cst_17 = arith.constant dense<0.000000e+00> : vector<128x128xf32>
    %22 = tpu.matmul %21, %18, %cst_17 {dimension_numbers = #tpu.dot_dimension_numbers<[0], [0], [1], [1], [0, 1, 1, 1], [], []>} : vector<8x128xbf16>, vector<8x128xbf16>, vector<128x128xf32> -> vector<128x128xf32>
    %cst_18 = arith.constant dense<0xFF800000> : vector<128xf32>
    %23 = vector.multi_reduction <maximumf>, %22, %cst_18 [1] : vector<128x128xf32> to vector<128xf32>
    %24 = vector.shape_cast %23 : vector<128xf32> to vector<128x1xf32>
    %25 = vector.broadcast %24 : vector<128x1xf32> to vector<128x128xf32>
    %26 = arith.subf %22, %25 : vector<128x128xf32>
    %27 = math.exp %26 : vector<128x128xf32>
    %cst_19 = arith.constant dense<0.000000e+00> : vector<128xf32>
    %28 = vector.multi_reduction <add>, %27, %cst_19 [1] : vector<128x128xf32> to vector<128xf32>
    %29 = vector.shape_cast %28 : vector<128xf32> to vector<128x1xf32>
    %30 = tpu.reciprocal %29 {approx = true} : vector<128x1xf32> -> vector<128x1xf32>
    %31 = vector.broadcast %30 : vector<128x1xf32> to vector<128x128xf32>
    %32 = arith.mulf %27, %31 : vector<128x128xf32>
    %33 = arith.truncf %32 : vector<128x128xf32> to vector<128x128xbf16>
    %cst_20 = arith.constant dense<0.000000e+00> : vector<1x128xf32>
    %34 = tpu.matmul %5, %33, %cst_20 {dimension_numbers = #tpu.dot_dimension_numbers<[1], [0], [0], [1], [0, 0, 1, 1], [], []>} : vector<1x128xbf16>, vector<128x128xbf16>, vector<1x128xf32> -> vector<1x128xf32>
    %cst_21 = arith.constant 9.99999971E-10 : f32
    %35 = vector.broadcast %cst_21 : f32 to vector<1x128xf32>
    %36 = arith.addf %35, %34 : vector<1x128xf32>
    %37 = tpu.reciprocal %36 {approx = true} : vector<1x128xf32> -> vector<1x128xf32>
    %c0_22 = arith.constant 0 : index
    %c0_23 = arith.constant 0 : index
    %c0_24 = arith.constant 0 : index
    %38 = vector.load %arg5[%c0_22, %c0_23, %c0_24] : memref<4x32x32xbf16, #tpu.memory_space<vmem>>, vector<1x32x32xbf16>
    %39 = vector.shape_cast %38 : vector<1x32x32xbf16> to vector<32x32xbf16>
    %cst_25 = arith.constant dense<0.000000e+00> : vector<32x128xf32>
    %40 = tpu.matmul %39, %2, %cst_25 {dimension_numbers = #tpu.dot_dimension_numbers<[1], [0], [0], [1], [0, 0, 1, 1], [], []>} : vector<32x32xbf16>, vector<32x128xbf16>, vector<32x128xf32> -> vector<32x128xf32>
    %41 = vector.broadcast %11 : vector<32x1xf32> to vector<32x128xf32>
    %42 = arith.addf %40, %41 : vector<32x128xf32>
    %43 = arith.truncf %42 : vector<32x128xf32> to vector<32x128xbf16>
    %cst_26 = arith.constant dense<0.000000e+00> : vector<32x128xf32>
    %44 = tpu.matmul %43, %33, %cst_26 {dimension_numbers = #tpu.dot_dimension_numbers<[1], [0], [0], [1], [0, 0, 1, 1], [], []>} : vector<32x128xbf16>, vector<128x128xbf16>, vector<32x128xf32> -> vector<32x128xf32>
    %45 = vector.broadcast %37 : vector<1x128xf32> to vector<32x128xf32>
    %46 = arith.mulf %44, %45 : vector<32x128xf32>
    %c0_27 = arith.constant 0 : index
    %c0_28 = arith.constant 0 : index
    %c0_29 = arith.constant 0 : index
    %47 = vector.load %arg6[%c0_27, %c0_28, %c0_29] : memref<4x32x32xbf16, #tpu.memory_space<vmem>>, vector<1x32x32xbf16>
    %48 = vector.shape_cast %47 : vector<1x32x32xbf16> to vector<32x32xbf16>
    %49 = arith.subf %1, %46 : vector<32x128xf32>
    %50 = arith.truncf %49 : vector<32x128xf32> to vector<32x128xbf16>
    %cst_30 = arith.constant dense<0.000000e+00> : vector<32x128xf32>
    %51 = tpu.matmul %48, %50, %cst_30 {dimension_numbers = #tpu.dot_dimension_numbers<[1], [0], [0], [1], [0, 0, 1, 1], [], []>} : vector<32x32xbf16>, vector<32x128xbf16>, vector<32x128xf32> -> vector<32x128xf32>
    %52 = vector.broadcast %12 : vector<32x1xf32> to vector<32x128xf32>
    %53 = arith.addf %51, %52 : vector<32x128xf32>
    %cst_31 = arith.constant dense<0.000000e+00> : vector<32xf32>
    %54 = vector.multi_reduction <add>, %53, %cst_31 [1] : vector<32x128xf32> to vector<32xf32>
    %55 = vector.shape_cast %54 : vector<32xf32> to vector<32x1xf32>
    %56 = arith.mulf %53, %53 : vector<32x128xf32>
    %cst_32 = arith.constant dense<0.000000e+00> : vector<32xf32>
    %57 = vector.multi_reduction <add>, %56, %cst_32 [1] : vector<32x128xf32> to vector<32xf32>
    %58 = vector.shape_cast %57 : vector<32xf32> to vector<32x1xf32>
    %cst_33 = arith.constant dense<0.000000e+00> : vector<1xf32>
    %59 = vector.multi_reduction <add>, %55, %cst_33 [0] : vector<32x1xf32> to vector<1xf32>
    %60 = vector.shape_cast %59 : vector<1xf32> to vector<1x1xf32>
    %cst_34 = arith.constant 4.096000e+03 : f32
    %61 = vector.broadcast %cst_34 : f32 to vector<1x1xf32>
    %62 = arith.divf %60, %61 : vector<1x1xf32>
    %cst_35 = arith.constant dense<0.000000e+00> : vector<1xf32>
    %63 = vector.multi_reduction <add>, %58, %cst_35 [0] : vector<32x1xf32> to vector<1xf32>
    %64 = vector.shape_cast %63 : vector<1xf32> to vector<1x1xf32>
    %cst_36 = arith.constant 4.096000e+03 : f32
    %65 = vector.broadcast %cst_36 : f32 to vector<1x1xf32>
    %66 = arith.divf %64, %65 : vector<1x1xf32>
    %67 = arith.mulf %62, %62 : vector<1x1xf32>
    %68 = arith.subf %66, %67 : vector<1x1xf32>
    %69 = vector.broadcast %62 : vector<1x1xf32> to vector<32x128xf32>
    %70 = arith.subf %53, %69 : vector<32x128xf32>
    %cst_37 = arith.constant 9.99999974E-6 : f32
    %71 = vector.broadcast %cst_37 : f32 to vector<1x1xf32>
    %72 = arith.addf %68, %71 : vector<1x1xf32>
    %73 = math.rsqrt %72 : vector<1x1xf32>
    %74 = vector.broadcast %73 : vector<1x1xf32> to vector<32x128xf32>
    %75 = arith.mulf %70, %74 : vector<32x128xf32>
    %76 = vector.broadcast %13 : vector<32x1xf32> to vector<32x128xf32>
    %77 = arith.mulf %75, %76 : vector<32x128xf32>
    %78 = vector.broadcast %14 : vector<32x1xf32> to vector<32x128xf32>
    %79 = arith.addf %77, %78 : vector<32x128xf32>
    %cst_38 = arith.constant 0.000000e+00 : f32
    %80 = vector.broadcast %cst_38 : f32 to vector<32x128xf32>
    %81 = arith.maximumf %79, %80 : vector<32x128xf32>
    %82 = arith.addf %1, %81 : vector<32x128xf32>
    %83 = arith.truncf %82 : vector<32x128xf32> to vector<32x128xbf16>
    %c32 = arith.constant 32 : index
    %c0_39 = arith.constant 0 : index
    %84 = vector.load %arg15[%c32, %c0_39] : memref<160x128xbf16, #tpu.memory_space<vmem>>, vector<32x128xbf16>
    tpu.vector_store %arg15[%c32, %c0_39], %83 {strides = array<i32>} : memref<160x128xbf16, #tpu.memory_space<vmem>>, vector<32x128xbf16>,
    %c1 = arith.constant 1 : index
    %c0_40 = arith.constant 0 : index
    %c0_41 = arith.constant 0 : index
    %85 = vector.load %arg7[%c1, %c0_40, %c0_41] : memref<4x32x4xf32, #tpu.memory_space<vmem>>, vector<1x32x4xf32>
    %86 = vector.shape_cast %85 : vector<1x32x4xf32> to vector<32x4xf32>
    %87 = vector.extract_strided_slice %86 {offsets = [0, 0], sizes = [32, 1], strides = [1, 1]} : vector<32x4xf32> to vector<32x1xf32>
    %88 = vector.extract_strided_slice %86 {offsets = [0, 1], sizes = [32, 1], strides = [1, 1]} : vector<32x4xf32> to vector<32x1xf32>
    %89 = vector.extract_strided_slice %86 {offsets = [0, 2], sizes = [32, 1], strides = [1, 1]} : vector<32x4xf32> to vector<32x1xf32>
    %90 = vector.extract_strided_slice %86 {offsets = [0, 3], sizes = [32, 1], strides = [1, 1]} : vector<32x4xf32> to vector<32x1xf32>
    %c1_42 = arith.constant 1 : index
    %c0_43 = arith.constant 0 : index
    %c0_44 = arith.constant 0 : index
    %91 = vector.load %arg4[%c1_42, %c0_43, %c0_44] : memref<4x8x32xbf16, #tpu.memory_space<vmem>>, vector<1x8x32xbf16>
    %92 = vector.shape_cast %91 : vector<1x8x32xbf16> to vector<8x32xbf16>
    %cst_45 = arith.constant dense<0.000000e+00> : vector<8x128xf32>
    %93 = tpu.matmul %92, %83, %cst_45 {dimension_numbers = #tpu.dot_dimension_numbers<[1], [0], [0], [1], [0, 0, 1, 1], [], []>} : vector<8x32xbf16>, vector<32x128xbf16>, vector<8x128xf32> -> vector<8x128xf32>
    %94 = arith.truncf %93 : vector<8x128xf32> to vector<8x128xbf16>
    %95 = vector.broadcast %4 : vector<1x128xf32> to vector<8x128xf32>
    %96 = arith.mulf %93, %95 : vector<8x128xf32>
    %97 = arith.truncf %96 : vector<8x128xf32> to vector<8x128xbf16>
    %cst_46 = arith.constant dense<0.000000e+00> : vector<128x128xf32>
    %98 = tpu.matmul %97, %94, %cst_46 {dimension_numbers = #tpu.dot_dimension_numbers<[0], [0], [1], [1], [0, 1, 1, 1], [], []>} : vector<8x128xbf16>, vector<8x128xbf16>, vector<128x128xf32> -> vector<128x128xf32>
    %cst_47 = arith.constant dense<0xFF800000> : vector<128xf32>
    %99 = vector.multi_reduction <maximumf>, %98, %cst_47 [1] : vector<128x128xf32> to vector<128xf32>
    %100 = vector.shape_cast %99 : vector<128xf32> to vector<128x1xf32>
    %101 = vector.broadcast %100 : vector<128x1xf32> to vector<128x128xf32>
    %102 = arith.subf %98, %101 : vector<128x128xf32>
    %103 = math.exp %102 : vector<128x128xf32>
    %cst_48 = arith.constant dense<0.000000e+00> : vector<128xf32>
    %104 = vector.multi_reduction <add>, %103, %cst_48 [1] : vector<128x128xf32> to vector<128xf32>
    %105 = vector.shape_cast %104 : vector<128xf32> to vector<128x1xf32>
    %106 = tpu.reciprocal %105 {approx = true} : vector<128x1xf32> -> vector<128x1xf32>
    %107 = vector.broadcast %106 : vector<128x1xf32> to vector<128x128xf32>
    %108 = arith.mulf %103, %107 : vector<128x128xf32>
    %109 = arith.truncf %108 : vector<128x128xf32> to vector<128x128xbf16>
    %cst_49 = arith.constant dense<0.000000e+00> : vector<1x128xf32>
    %110 = tpu.matmul %5, %109, %cst_49 {dimension_numbers = #tpu.dot_dimension_numbers<[1], [0], [0], [1], [0, 0, 1, 1], [], []>} : vector<1x128xbf16>, vector<128x128xbf16>, vector<1x128xf32> -> vector<1x128xf32>
    %cst_50 = arith.constant 9.99999971E-10 : f32
    %111 = vector.broadcast %cst_50 : f32 to vector<1x128xf32>
    %112 = arith.addf %111, %110 : vector<1x128xf32>
    %113 = tpu.reciprocal %112 {approx = true} : vector<1x128xf32> -> vector<1x128xf32>
    %c1_51 = arith.constant 1 : index
    %c0_52 = arith.constant 0 : index
    %c0_53 = arith.constant 0 : index
    %114 = vector.load %arg5[%c1_51, %c0_52, %c0_53] : memref<4x32x32xbf16, #tpu.memory_space<vmem>>, vector<1x32x32xbf16>
    %115 = vector.shape_cast %114 : vector<1x32x32xbf16> to vector<32x32xbf16>
    %cst_54 = arith.constant dense<0.000000e+00> : vector<32x128xf32>
    %116 = tpu.matmul %115, %83, %cst_54 {dimension_numbers = #tpu.dot_dimension_numbers<[1], [0], [0], [1], [0, 0, 1, 1], [], []>} : vector<32x32xbf16>, vector<32x128xbf16>, vector<32x128xf32> -> vector<32x128xf32>
    %117 = vector.broadcast %87 : vector<32x1xf32> to vector<32x128xf32>
    %118 = arith.addf %116, %117 : vector<32x128xf32>
    %119 = arith.truncf %118 : vector<32x128xf32> to vector<32x128xbf16>
    %cst_55 = arith.constant dense<0.000000e+00> : vector<32x128xf32>
    %120 = tpu.matmul %119, %109, %cst_55 {dimension_numbers = #tpu.dot_dimension_numbers<[1], [0], [0], [1], [0, 0, 1, 1], [], []>} : vector<32x128xbf16>, vector<128x128xbf16>, vector<32x128xf32> -> vector<32x128xf32>
    %121 = vector.broadcast %113 : vector<1x128xf32> to vector<32x128xf32>
    %122 = arith.mulf %120, %121 : vector<32x128xf32>
    %c1_56 = arith.constant 1 : index
    %c0_57 = arith.constant 0 : index
    %c0_58 = arith.constant 0 : index
    %123 = vector.load %arg6[%c1_56, %c0_57, %c0_58] : memref<4x32x32xbf16, #tpu.memory_space<vmem>>, vector<1x32x32xbf16>
    %124 = vector.shape_cast %123 : vector<1x32x32xbf16> to vector<32x32xbf16>
    %125 = arith.subf %82, %122 : vector<32x128xf32>
    %126 = arith.truncf %125 : vector<32x128xf32> to vector<32x128xbf16>
    %cst_59 = arith.constant dense<0.000000e+00> : vector<32x128xf32>
    %127 = tpu.matmul %124, %126, %cst_59 {dimension_numbers = #tpu.dot_dimension_numbers<[1], [0], [0], [1], [0, 0, 1, 1], [], []>} : vector<32x32xbf16>, vector<32x128xbf16>, vector<32x128xf32> -> vector<32x128xf32>
    %128 = vector.broadcast %88 : vector<32x1xf32> to vector<32x128xf32>
    %129 = arith.addf %127, %128 : vector<32x128xf32>
    %cst_60 = arith.constant dense<0.000000e+00> : vector<32xf32>
    %130 = vector.multi_reduction <add>, %129, %cst_60 [1] : vector<32x128xf32> to vector<32xf32>
    %131 = vector.shape_cast %130 : vector<32xf32> to vector<32x1xf32>
    %132 = arith.mulf %129, %129 : vector<32x128xf32>
    %cst_61 = arith.constant dense<0.000000e+00> : vector<32xf32>
    %133 = vector.multi_reduction <add>, %132, %cst_61 [1] : vector<32x128xf32> to vector<32xf32>
    %134 = vector.shape_cast %133 : vector<32xf32> to vector<32x1xf32>
    %cst_62 = arith.constant dense<0.000000e+00> : vector<1xf32>
    %135 = vector.multi_reduction <add>, %131, %cst_62 [0] : vector<32x1xf32> to vector<1xf32>
    %136 = vector.shape_cast %135 : vector<1xf32> to vector<1x1xf32>
    %cst_63 = arith.constant 4.096000e+03 : f32
    %137 = vector.broadcast %cst_63 : f32 to vector<1x1xf32>
    %138 = arith.divf %136, %137 : vector<1x1xf32>
    %cst_64 = arith.constant dense<0.000000e+00> : vector<1xf32>
    %139 = vector.multi_reduction <add>, %134, %cst_64 [0] : vector<32x1xf32> to vector<1xf32>
    %140 = vector.shape_cast %139 : vector<1xf32> to vector<1x1xf32>
    %cst_65 = arith.constant 4.096000e+03 : f32
    %141 = vector.broadcast %cst_65 : f32 to vector<1x1xf32>
    %142 = arith.divf %140, %141 : vector<1x1xf32>
    %143 = arith.mulf %138, %138 : vector<1x1xf32>
    %144 = arith.subf %142, %143 : vector<1x1xf32>
    %145 = vector.broadcast %138 : vector<1x1xf32> to vector<32x128xf32>
    %146 = arith.subf %129, %145 : vector<32x128xf32>
    %cst_66 = arith.constant 9.99999974E-6 : f32
    %147 = vector.broadcast %cst_66 : f32 to vector<1x1xf32>
    %148 = arith.addf %144, %147 : vector<1x1xf32>
    %149 = math.rsqrt %148 : vector<1x1xf32>
    %150 = vector.broadcast %149 : vector<1x1xf32> to vector<32x128xf32>
    %151 = arith.mulf %146, %150 : vector<32x128xf32>
    %152 = vector.broadcast %89 : vector<32x1xf32> to vector<32x128xf32>
    %153 = arith.mulf %151, %152 : vector<32x128xf32>
    %154 = vector.broadcast %90 : vector<32x1xf32> to vector<32x128xf32>
    %155 = arith.addf %153, %154 : vector<32x128xf32>
    %cst_67 = arith.constant 0.000000e+00 : f32
    %156 = vector.broadcast %cst_67 : f32 to vector<32x128xf32>
    %157 = arith.maximumf %155, %156 : vector<32x128xf32>
    %158 = arith.addf %82, %157 : vector<32x128xf32>
    %159 = arith.truncf %158 : vector<32x128xf32> to vector<32x128xbf16>
    %c64 = arith.constant 64 : index
    %c0_68 = arith.constant 0 : index
    %160 = vector.load %arg15[%c64, %c0_68] : memref<160x128xbf16, #tpu.memory_space<vmem>>, vector<32x128xbf16>
    tpu.vector_store %arg15[%c64, %c0_68], %159 {strides = array<i32>} : memref<160x128xbf16, #tpu.memory_space<vmem>>, vector<32x128xbf16>,
    %c2 = arith.constant 2 : index
    %c0_69 = arith.constant 0 : index
    %c0_70 = arith.constant 0 : index
    %161 = vector.load %arg7[%c2, %c0_69, %c0_70] : memref<4x32x4xf32, #tpu.memory_space<vmem>>, vector<1x32x4xf32>
    %162 = vector.shape_cast %161 : vector<1x32x4xf32> to vector<32x4xf32>
    %163 = vector.extract_strided_slice %162 {offsets = [0, 0], sizes = [32, 1], strides = [1, 1]} : vector<32x4xf32> to vector<32x1xf32>
    %164 = vector.extract_strided_slice %162 {offsets = [0, 1], sizes = [32, 1], strides = [1, 1]} : vector<32x4xf32> to vector<32x1xf32>
    %165 = vector.extract_strided_slice %162 {offsets = [0, 2], sizes = [32, 1], strides = [1, 1]} : vector<32x4xf32> to vector<32x1xf32>
    %166 = vector.extract_strided_slice %162 {offsets = [0, 3], sizes = [32, 1], strides = [1, 1]} : vector<32x4xf32> to vector<32x1xf32>
    %c2_71 = arith.constant 2 : index
    %c0_72 = arith.constant 0 : index
    %c0_73 = arith.constant 0 : index
    %167 = vector.load %arg4[%c2_71, %c0_72, %c0_73] : memref<4x8x32xbf16, #tpu.memory_space<vmem>>, vector<1x8x32xbf16>
    %168 = vector.shape_cast %167 : vector<1x8x32xbf16> to vector<8x32xbf16>
    %cst_74 = arith.constant dense<0.000000e+00> : vector<8x128xf32>
    %169 = tpu.matmul %168, %159, %cst_74 {dimension_numbers = #tpu.dot_dimension_numbers<[1], [0], [0], [1], [0, 0, 1, 1], [], []>} : vector<8x32xbf16>, vector<32x128xbf16>, vector<8x128xf32> -> vector<8x128xf32>
    %170 = arith.truncf %169 : vector<8x128xf32> to vector<8x128xbf16>
    %171 = vector.broadcast %4 : vector<1x128xf32> to vector<8x128xf32>
    %172 = arith.mulf %169, %171 : vector<8x128xf32>
    %173 = arith.truncf %172 : vector<8x128xf32> to vector<8x128xbf16>
    %cst_75 = arith.constant dense<0.000000e+00> : vector<128x128xf32>
    %174 = tpu.matmul %173, %170, %cst_75 {dimension_numbers = #tpu.dot_dimension_numbers<[0], [0], [1], [1], [0, 1, 1, 1], [], []>} : vector<8x128xbf16>, vector<8x128xbf16>, vector<128x128xf32> -> vector<128x128xf32>
    %cst_76 = arith.constant dense<0xFF800000> : vector<128xf32>
    %175 = vector.multi_reduction <maximumf>, %174, %cst_76 [1] : vector<128x128xf32> to vector<128xf32>
    %176 = vector.shape_cast %175 : vector<128xf32> to vector<128x1xf32>
    %177 = vector.broadcast %176 : vector<128x1xf32> to vector<128x128xf32>
    %178 = arith.subf %174, %177 : vector<128x128xf32>
    %179 = math.exp %178 : vector<128x128xf32>
    %cst_77 = arith.constant dense<0.000000e+00> : vector<128xf32>
    %180 = vector.multi_reduction <add>, %179, %cst_77 [1] : vector<128x128xf32> to vector<128xf32>
    %181 = vector.shape_cast %180 : vector<128xf32> to vector<128x1xf32>
    %182 = tpu.reciprocal %181 {approx = true} : vector<128x1xf32> -> vector<128x1xf32>
    %183 = vector.broadcast %182 : vector<128x1xf32> to vector<128x128xf32>
    %184 = arith.mulf %179, %183 : vector<128x128xf32>
    %185 = arith.truncf %184 : vector<128x128xf32> to vector<128x128xbf16>
    %cst_78 = arith.constant dense<0.000000e+00> : vector<1x128xf32>
    %186 = tpu.matmul %5, %185, %cst_78 {dimension_numbers = #tpu.dot_dimension_numbers<[1], [0], [0], [1], [0, 0, 1, 1], [], []>} : vector<1x128xbf16>, vector<128x128xbf16>, vector<1x128xf32> -> vector<1x128xf32>
    %cst_79 = arith.constant 9.99999971E-10 : f32
    %187 = vector.broadcast %cst_79 : f32 to vector<1x128xf32>
    %188 = arith.addf %187, %186 : vector<1x128xf32>
    %189 = tpu.reciprocal %188 {approx = true} : vector<1x128xf32> -> vector<1x128xf32>
    %c2_80 = arith.constant 2 : index
    %c0_81 = arith.constant 0 : index
    %c0_82 = arith.constant 0 : index
    %190 = vector.load %arg5[%c2_80, %c0_81, %c0_82] : memref<4x32x32xbf16, #tpu.memory_space<vmem>>, vector<1x32x32xbf16>
    %191 = vector.shape_cast %190 : vector<1x32x32xbf16> to vector<32x32xbf16>
    %cst_83 = arith.constant dense<0.000000e+00> : vector<32x128xf32>
    %192 = tpu.matmul %191, %159, %cst_83 {dimension_numbers = #tpu.dot_dimension_numbers<[1], [0], [0], [1], [0, 0, 1, 1], [], []>} : vector<32x32xbf16>, vector<32x128xbf16>, vector<32x128xf32> -> vector<32x128xf32>
    %193 = vector.broadcast %163 : vector<32x1xf32> to vector<32x128xf32>
    %194 = arith.addf %192, %193 : vector<32x128xf32>
    %195 = arith.truncf %194 : vector<32x128xf32> to vector<32x128xbf16>
    %cst_84 = arith.constant dense<0.000000e+00> : vector<32x128xf32>
    %196 = tpu.matmul %195, %185, %cst_84 {dimension_numbers = #tpu.dot_dimension_numbers<[1], [0], [0], [1], [0, 0, 1, 1], [], []>} : vector<32x128xbf16>, vector<128x128xbf16>, vector<32x128xf32> -> vector<32x128xf32>
    %197 = vector.broadcast %189 : vector<1x128xf32> to vector<32x128xf32>
    %198 = arith.mulf %196, %197 : vector<32x128xf32>
    %c2_85 = arith.constant 2 : index
    %c0_86 = arith.constant 0 : index
    %c0_87 = arith.constant 0 : index
    %199 = vector.load %arg6[%c2_85, %c0_86, %c0_87] : memref<4x32x32xbf16, #tpu.memory_space<vmem>>, vector<1x32x32xbf16>
    %200 = vector.shape_cast %199 : vector<1x32x32xbf16> to vector<32x32xbf16>
    %201 = arith.subf %158, %198 : vector<32x128xf32>
    %202 = arith.truncf %201 : vector<32x128xf32> to vector<32x128xbf16>
    %cst_88 = arith.constant dense<0.000000e+00> : vector<32x128xf32>
    %203 = tpu.matmul %200, %202, %cst_88 {dimension_numbers = #tpu.dot_dimension_numbers<[1], [0], [0], [1], [0, 0, 1, 1], [], []>} : vector<32x32xbf16>, vector<32x128xbf16>, vector<32x128xf32> -> vector<32x128xf32>
    %204 = vector.broadcast %164 : vector<32x1xf32> to vector<32x128xf32>
    %205 = arith.addf %203, %204 : vector<32x128xf32>
    %cst_89 = arith.constant dense<0.000000e+00> : vector<32xf32>
    %206 = vector.multi_reduction <add>, %205, %cst_89 [1] : vector<32x128xf32> to vector<32xf32>
    %207 = vector.shape_cast %206 : vector<32xf32> to vector<32x1xf32>
    %208 = arith.mulf %205, %205 : vector<32x128xf32>
    %cst_90 = arith.constant dense<0.000000e+00> : vector<32xf32>
    %209 = vector.multi_reduction <add>, %208, %cst_90 [1] : vector<32x128xf32> to vector<32xf32>
    %210 = vector.shape_cast %209 : vector<32xf32> to vector<32x1xf32>
    %cst_91 = arith.constant dense<0.000000e+00> : vector<1xf32>
    %211 = vector.multi_reduction <add>, %207, %cst_91 [0] : vector<32x1xf32> to vector<1xf32>
    %212 = vector.shape_cast %211 : vector<1xf32> to vector<1x1xf32>
    %cst_92 = arith.constant 4.096000e+03 : f32
    %213 = vector.broadcast %cst_92 : f32 to vector<1x1xf32>
    %214 = arith.divf %212, %213 : vector<1x1xf32>
    %cst_93 = arith.constant dense<0.000000e+00> : vector<1xf32>
    %215 = vector.multi_reduction <add>, %210, %cst_93 [0] : vector<32x1xf32> to vector<1xf32>
    %216 = vector.shape_cast %215 : vector<1xf32> to vector<1x1xf32>
    %cst_94 = arith.constant 4.096000e+03 : f32
    %217 = vector.broadcast %cst_94 : f32 to vector<1x1xf32>
    %218 = arith.divf %216, %217 : vector<1x1xf32>
    %219 = arith.mulf %214, %214 : vector<1x1xf32>
    %220 = arith.subf %218, %219 : vector<1x1xf32>
    %221 = vector.broadcast %214 : vector<1x1xf32> to vector<32x128xf32>
    %222 = arith.subf %205, %221 : vector<32x128xf32>
    %cst_95 = arith.constant 9.99999974E-6 : f32
    %223 = vector.broadcast %cst_95 : f32 to vector<1x1xf32>
    %224 = arith.addf %220, %223 : vector<1x1xf32>
    %225 = math.rsqrt %224 : vector<1x1xf32>
    %226 = vector.broadcast %225 : vector<1x1xf32> to vector<32x128xf32>
    %227 = arith.mulf %222, %226 : vector<32x128xf32>
    %228 = vector.broadcast %165 : vector<32x1xf32> to vector<32x128xf32>
    %229 = arith.mulf %227, %228 : vector<32x128xf32>
    %230 = vector.broadcast %166 : vector<32x1xf32> to vector<32x128xf32>
    %231 = arith.addf %229, %230 : vector<32x128xf32>
    %cst_96 = arith.constant 0.000000e+00 : f32
    %232 = vector.broadcast %cst_96 : f32 to vector<32x128xf32>
    %233 = arith.maximumf %231, %232 : vector<32x128xf32>
    %234 = arith.addf %158, %233 : vector<32x128xf32>
    %235 = arith.truncf %234 : vector<32x128xf32> to vector<32x128xbf16>
    %c96 = arith.constant 96 : index
    %c0_97 = arith.constant 0 : index
    %236 = vector.load %arg15[%c96, %c0_97] : memref<160x128xbf16, #tpu.memory_space<vmem>>, vector<32x128xbf16>
    tpu.vector_store %arg15[%c96, %c0_97], %235 {strides = array<i32>} : memref<160x128xbf16, #tpu.memory_space<vmem>>, vector<32x128xbf16>,
    %c3 = arith.constant 3 : index
    %c0_98 = arith.constant 0 : index
    %c0_99 = arith.constant 0 : index
    %237 = vector.load %arg7[%c3, %c0_98, %c0_99] : memref<4x32x4xf32, #tpu.memory_space<vmem>>, vector<1x32x4xf32>
    %238 = vector.shape_cast %237 : vector<1x32x4xf32> to vector<32x4xf32>
    %239 = vector.extract_strided_slice %238 {offsets = [0, 0], sizes = [32, 1], strides = [1, 1]} : vector<32x4xf32> to vector<32x1xf32>
    %240 = vector.extract_strided_slice %238 {offsets = [0, 1], sizes = [32, 1], strides = [1, 1]} : vector<32x4xf32> to vector<32x1xf32>
    %241 = vector.extract_strided_slice %238 {offsets = [0, 2], sizes = [32, 1], strides = [1, 1]} : vector<32x4xf32> to vector<32x1xf32>
    %242 = vector.extract_strided_slice %238 {offsets = [0, 3], sizes = [32, 1], strides = [1, 1]} : vector<32x4xf32> to vector<32x1xf32>
    %c3_100 = arith.constant 3 : index
    %c0_101 = arith.constant 0 : index
    %c0_102 = arith.constant 0 : index
    %243 = vector.load %arg4[%c3_100, %c0_101, %c0_102] : memref<4x8x32xbf16, #tpu.memory_space<vmem>>, vector<1x8x32xbf16>
    %244 = vector.shape_cast %243 : vector<1x8x32xbf16> to vector<8x32xbf16>
    %cst_103 = arith.constant dense<0.000000e+00> : vector<8x128xf32>
    %245 = tpu.matmul %244, %235, %cst_103 {dimension_numbers = #tpu.dot_dimension_numbers<[1], [0], [0], [1], [0, 0, 1, 1], [], []>} : vector<8x32xbf16>, vector<32x128xbf16>, vector<8x128xf32> -> vector<8x128xf32>
    %246 = arith.truncf %245 : vector<8x128xf32> to vector<8x128xbf16>
    %247 = vector.broadcast %4 : vector<1x128xf32> to vector<8x128xf32>
    %248 = arith.mulf %245, %247 : vector<8x128xf32>
    %249 = arith.truncf %248 : vector<8x128xf32> to vector<8x128xbf16>
    %cst_104 = arith.constant dense<0.000000e+00> : vector<128x128xf32>
    %250 = tpu.matmul %249, %246, %cst_104 {dimension_numbers = #tpu.dot_dimension_numbers<[0], [0], [1], [1], [0, 1, 1, 1], [], []>} : vector<8x128xbf16>, vector<8x128xbf16>, vector<128x128xf32> -> vector<128x128xf32>
    %cst_105 = arith.constant dense<0xFF800000> : vector<128xf32>
    %251 = vector.multi_reduction <maximumf>, %250, %cst_105 [1] : vector<128x128xf32> to vector<128xf32>
    %252 = vector.shape_cast %251 : vector<128xf32> to vector<128x1xf32>
    %253 = vector.broadcast %252 : vector<128x1xf32> to vector<128x128xf32>
    %254 = arith.subf %250, %253 : vector<128x128xf32>
    %255 = math.exp %254 : vector<128x128xf32>
    %cst_106 = arith.constant dense<0.000000e+00> : vector<128xf32>
    %256 = vector.multi_reduction <add>, %255, %cst_106 [1] : vector<128x128xf32> to vector<128xf32>
    %257 = vector.shape_cast %256 : vector<128xf32> to vector<128x1xf32>
    %258 = tpu.reciprocal %257 {approx = true} : vector<128x1xf32> -> vector<128x1xf32>
    %259 = vector.broadcast %258 : vector<128x1xf32> to vector<128x128xf32>
    %260 = arith.mulf %255, %259 : vector<128x128xf32>
    %261 = arith.truncf %260 : vector<128x128xf32> to vector<128x128xbf16>
    %cst_107 = arith.constant dense<0.000000e+00> : vector<1x128xf32>
    %262 = tpu.matmul %5, %261, %cst_107 {dimension_numbers = #tpu.dot_dimension_numbers<[1], [0], [0], [1], [0, 0, 1, 1], [], []>} : vector<1x128xbf16>, vector<128x128xbf16>, vector<1x128xf32> -> vector<1x128xf32>
    %cst_108 = arith.constant 9.99999971E-10 : f32
    %263 = vector.broadcast %cst_108 : f32 to vector<1x128xf32>
    %264 = arith.addf %263, %262 : vector<1x128xf32>
    %265 = tpu.reciprocal %264 {approx = true} : vector<1x128xf32> -> vector<1x128xf32>
    %c3_109 = arith.constant 3 : index
    %c0_110 = arith.constant 0 : index
    %c0_111 = arith.constant 0 : index
    %266 = vector.load %arg5[%c3_109, %c0_110, %c0_111] : memref<4x32x32xbf16, #tpu.memory_space<vmem>>, vector<1x32x32xbf16>
    %267 = vector.shape_cast %266 : vector<1x32x32xbf16> to vector<32x32xbf16>
    %cst_112 = arith.constant dense<0.000000e+00> : vector<32x128xf32>
    %268 = tpu.matmul %267, %235, %cst_112 {dimension_numbers = #tpu.dot_dimension_numbers<[1], [0], [0], [1], [0, 0, 1, 1], [], []>} : vector<32x32xbf16>, vector<32x128xbf16>, vector<32x128xf32> -> vector<32x128xf32>
    %269 = vector.broadcast %239 : vector<32x1xf32> to vector<32x128xf32>
    %270 = arith.addf %268, %269 : vector<32x128xf32>
    %271 = arith.truncf %270 : vector<32x128xf32> to vector<32x128xbf16>
    %cst_113 = arith.constant dense<0.000000e+00> : vector<32x128xf32>
    %272 = tpu.matmul %271, %261, %cst_113 {dimension_numbers = #tpu.dot_dimension_numbers<[1], [0], [0], [1], [0, 0, 1, 1], [], []>} : vector<32x128xbf16>, vector<128x128xbf16>, vector<32x128xf32> -> vector<32x128xf32>
    %273 = vector.broadcast %265 : vector<1x128xf32> to vector<32x128xf32>
    %274 = arith.mulf %272, %273 : vector<32x128xf32>
    %c3_114 = arith.constant 3 : index
    %c0_115 = arith.constant 0 : index
    %c0_116 = arith.constant 0 : index
    %275 = vector.load %arg6[%c3_114, %c0_115, %c0_116] : memref<4x32x32xbf16, #tpu.memory_space<vmem>>, vector<1x32x32xbf16>
    %276 = vector.shape_cast %275 : vector<1x32x32xbf16> to vector<32x32xbf16>
    %277 = arith.subf %234, %274 : vector<32x128xf32>
    %278 = arith.truncf %277 : vector<32x128xf32> to vector<32x128xbf16>
    %cst_117 = arith.constant dense<0.000000e+00> : vector<32x128xf32>
    %279 = tpu.matmul %276, %278, %cst_117 {dimension_numbers = #tpu.dot_dimension_numbers<[1], [0], [0], [1], [0, 0, 1, 1], [], []>} : vector<32x32xbf16>, vector<32x128xbf16>, vector<32x128xf32> -> vector<32x128xf32>
    %280 = vector.broadcast %240 : vector<32x1xf32> to vector<32x128xf32>
    %281 = arith.addf %279, %280 : vector<32x128xf32>
    %cst_118 = arith.constant dense<0.000000e+00> : vector<32xf32>
    %282 = vector.multi_reduction <add>, %281, %cst_118 [1] : vector<32x128xf32> to vector<32xf32>
    %283 = vector.shape_cast %282 : vector<32xf32> to vector<32x1xf32>
    %284 = arith.mulf %281, %281 : vector<32x128xf32>
    %cst_119 = arith.constant dense<0.000000e+00> : vector<32xf32>
    %285 = vector.multi_reduction <add>, %284, %cst_119 [1] : vector<32x128xf32> to vector<32xf32>
    %286 = vector.shape_cast %285 : vector<32xf32> to vector<32x1xf32>
    %cst_120 = arith.constant dense<0.000000e+00> : vector<1xf32>
    %287 = vector.multi_reduction <add>, %283, %cst_120 [0] : vector<32x1xf32> to vector<1xf32>
    %288 = vector.shape_cast %287 : vector<1xf32> to vector<1x1xf32>
    %cst_121 = arith.constant 4.096000e+03 : f32
    %289 = vector.broadcast %cst_121 : f32 to vector<1x1xf32>
    %290 = arith.divf %288, %289 : vector<1x1xf32>
    %cst_122 = arith.constant dense<0.000000e+00> : vector<1xf32>
    %291 = vector.multi_reduction <add>, %286, %cst_122 [0] : vector<32x1xf32> to vector<1xf32>
    %292 = vector.shape_cast %291 : vector<1xf32> to vector<1x1xf32>
    %cst_123 = arith.constant 4.096000e+03 : f32
    %293 = vector.broadcast %cst_123 : f32 to vector<1x1xf32>
    %294 = arith.divf %292, %293 : vector<1x1xf32>
    %295 = arith.mulf %290, %290 : vector<1x1xf32>
    %296 = arith.subf %294, %295 : vector<1x1xf32>
    %297 = vector.broadcast %290 : vector<1x1xf32> to vector<32x128xf32>
    %298 = arith.subf %281, %297 : vector<32x128xf32>
    %cst_124 = arith.constant 9.99999974E-6 : f32
    %299 = vector.broadcast %cst_124 : f32 to vector<1x1xf32>
    %300 = arith.addf %296, %299 : vector<1x1xf32>
    %301 = math.rsqrt %300 : vector<1x1xf32>
    %302 = vector.broadcast %301 : vector<1x1xf32> to vector<32x128xf32>
    %303 = arith.mulf %298, %302 : vector<32x128xf32>
    %304 = vector.broadcast %241 : vector<32x1xf32> to vector<32x128xf32>
    %305 = arith.mulf %303, %304 : vector<32x128xf32>
    %306 = vector.broadcast %242 : vector<32x1xf32> to vector<32x128xf32>
    %307 = arith.addf %305, %306 : vector<32x128xf32>
    %cst_125 = arith.constant 0.000000e+00 : f32
    %308 = vector.broadcast %cst_125 : f32 to vector<32x128xf32>
    %309 = arith.maximumf %307, %308 : vector<32x128xf32>
    %310 = arith.addf %234, %309 : vector<32x128xf32>
    %311 = arith.truncf %310 : vector<32x128xf32> to vector<32x128xbf16>
    %c128 = arith.constant 128 : index
    %c0_126 = arith.constant 0 : index
    %312 = vector.load %arg15[%c128, %c0_126] : memref<160x128xbf16, #tpu.memory_space<vmem>>, vector<32x128xbf16>
    tpu.vector_store %arg15[%c128, %c0_126], %311 {strides = array<i32>} : memref<160x128xbf16, #tpu.memory_space<vmem>>, vector<32x128xbf16>,
    %c0_127 = arith.constant 0 : index
    %c0_128 = arith.constant 0 : index
    %313 = vector.load %arg10[%c0_127, %c0_128] : memref<160x160xbf16, #tpu.memory_space<vmem>>, vector<160x160xbf16>
    %c0_129 = arith.constant 0 : index
    %c0_130 = arith.constant 0 : index
    %314 = vector.load %arg15[%c0_129, %c0_130] : memref<160x128xbf16, #tpu.memory_space<vmem>>, vector<160x128xbf16>
    %cst_131 = arith.constant dense<0.000000e+00> : vector<160x128xf32>
    %315 = tpu.matmul %313, %314, %cst_131 {dimension_numbers = #tpu.dot_dimension_numbers<[1], [0], [0], [1], [0, 0, 1, 1], [], []>} : vector<160x160xbf16>, vector<160x128xbf16>, vector<160x128xf32> -> vector<160x128xf32>
    %c0_132 = arith.constant 0 : index
    %c0_133 = arith.constant 0 : index
    %316 = vector.load %arg11[%c0_132, %c0_133] : memref<160x2xf32, #tpu.memory_space<vmem>>, vector<160x1xf32>
    %c0_134 = arith.constant 0 : index
    %c1_135 = arith.constant 1 : index
    %317 = vector.load %arg11[%c0_134, %c1_135] : memref<160x2xf32, #tpu.memory_space<vmem>>, vector<160x1xf32>
    %c0_136 = arith.constant 0 : index
    %c0_137 = arith.constant 0 : index
    %318 = vector.load %arg12[%c0_136, %c0_137] : memref<16x160xf32, #tpu.memory_space<vmem>>, vector<16x160xf32>
    %c0_138 = arith.constant 0 : index
    %c0_139 = arith.constant 0 : index
    %319 = vector.load %arg13[%c0_138, %c0_139] : memref<160x16xf32, #tpu.memory_space<vmem>>, vector<160x16xf32>
    %cst_140 = arith.constant dense<0.000000e+00> : vector<160xf32>
    %320 = vector.multi_reduction <add>, %315, %cst_140 [1] : vector<160x128xf32> to vector<160xf32>
    %321 = vector.shape_cast %320 : vector<160xf32> to vector<160x1xf32>
    %322 = arith.mulf %315, %315 : vector<160x128xf32>
    %cst_141 = arith.constant dense<0.000000e+00> : vector<160xf32>
    %323 = vector.multi_reduction <add>, %322, %cst_141 [1] : vector<160x128xf32> to vector<160xf32>
    %324 = vector.shape_cast %323 : vector<160xf32> to vector<160x1xf32>
    %cst_142 = arith.constant dense<0.000000e+00> : vector<16x1xf32>
    %325 = tpu.matmul %318, %321, %cst_142 {dimension_numbers = #tpu.dot_dimension_numbers<[1], [0], [0], [1], [0, 0, 1, 1], [], []>} : vector<16x160xf32>, vector<160x1xf32>, vector<16x1xf32> -> vector<16x1xf32>
    %cst_143 = arith.constant dense<0.000000e+00> : vector<16x1xf32>
    %326 = tpu.matmul %318, %324, %cst_143 {dimension_numbers = #tpu.dot_dimension_numbers<[1], [0], [0], [1], [0, 0, 1, 1], [], []>} : vector<16x160xf32>, vector<160x1xf32>, vector<16x1xf32> -> vector<16x1xf32>
    %cst_144 = arith.constant 1.280000e+03 : f32
    %327 = vector.broadcast %cst_144 : f32 to vector<16x1xf32>
    %328 = arith.divf %325, %327 : vector<16x1xf32>
    %cst_145 = arith.constant 1.280000e+03 : f32
    %329 = vector.broadcast %cst_145 : f32 to vector<16x1xf32>
    %330 = arith.divf %326, %329 : vector<16x1xf32>
    %331 = arith.mulf %328, %328 : vector<16x1xf32>
    %332 = arith.subf %330, %331 : vector<16x1xf32>
    %cst_146 = arith.constant dense<0.000000e+00> : vector<160x1xf32>
    %333 = tpu.matmul %319, %328, %cst_146 {dimension_numbers = #tpu.dot_dimension_numbers<[1], [0], [0], [1], [0, 0, 1, 1], [], []>} : vector<160x16xf32>, vector<16x1xf32>, vector<160x1xf32> -> vector<160x1xf32>
    %cst_147 = arith.constant dense<0.000000e+00> : vector<160x1xf32>
    %334 = tpu.matmul %319, %332, %cst_147 {dimension_numbers = #tpu.dot_dimension_numbers<[1], [0], [0], [1], [0, 0, 1, 1], [], []>} : vector<160x16xf32>, vector<16x1xf32>, vector<160x1xf32> -> vector<160x1xf32>
    %335 = vector.broadcast %333 : vector<160x1xf32> to vector<160x128xf32>
    %336 = arith.subf %315, %335 : vector<160x128xf32>
    %cst_148 = arith.constant 9.99999974E-6 : f32
    %337 = vector.broadcast %cst_148 : f32 to vector<160x1xf32>
    %338 = arith.addf %334, %337 : vector<160x1xf32>
    %339 = math.rsqrt %338 : vector<160x1xf32>
    %340 = vector.broadcast %339 : vector<160x1xf32> to vector<160x128xf32>
    %341 = arith.mulf %336, %340 : vector<160x128xf32>
    %342 = vector.broadcast %316 : vector<160x1xf32> to vector<160x128xf32>
    %343 = arith.mulf %341, %342 : vector<160x128xf32>
    %344 = vector.broadcast %317 : vector<160x1xf32> to vector<160x128xf32>
    %345 = arith.addf %343, %344 : vector<160x128xf32>
    %cst_149 = arith.constant 0.000000e+00 : f32
    %346 = vector.broadcast %cst_149 : f32 to vector<160x128xf32>
    %347 = arith.cmpf oge, %345, %346 : vector<160x128xf32>
    %cst_150 = arith.constant 2.000000e-01 : f32
    %348 = vector.broadcast %cst_150 : f32 to vector<160x128xf32>
    %349 = arith.mulf %348, %345 : vector<160x128xf32>
    %350 = arith.select %347, %345, %349 : vector<160x128xi1>, vector<160x128xf32>
    %c0_151 = arith.constant 0 : index
    %c0_152 = arith.constant 0 : index
    %c0_153 = arith.constant 0 : index
    %351 = vector.load %arg14[%c0_151, %c0_152, %c0_153] : memref<1x160x128xf32, #tpu.memory_space<vmem>>, vector<1x160x128xf32>
    %352 = vector.shape_cast %351 : vector<1x160x128xf32> to vector<160x128xf32>
    %353 = vector.shape_cast %350 : vector<160x128xf32> to vector<1x160x128xf32>
    tpu.vector_store %arg14[%c0_151, %c0_152, %c0_153], %353 {strides = array<i32>} : memref<1x160x128xf32, #tpu.memory_space<vmem>>, vector<1x160x128xf32>,
    return
  }
  func.func @transform_0(%arg0: i32) -> (i32, i32, i32) {
    %c0_i32 = arith.constant 0 : i32
    %c0_i32_0 = arith.constant 0 : i32
    %c0_i32_1 = arith.constant 0 : i32
    return %arg0, %c0_i32, %c0_i32_0 : i32, i32, i32
  }
  func.func @transform_1(%arg0: i32) -> (i32, i32, i32) {
    %c0_i32 = arith.constant 0 : i32
    %c0_i32_0 = arith.constant 0 : i32
    %c0_i32_1 = arith.constant 0 : i32
    return %arg0, %c0_i32, %c0_i32_0 : i32, i32, i32
  }
  func.func @transform_2(%arg0: i32) -> (i32, i32, i32) {
    %c0_i32 = arith.constant 0 : i32
    %c0_i32_0 = arith.constant 0 : i32
    %c0_i32_1 = arith.constant 0 : i32
    return %arg0, %c0_i32, %c0_i32_0 : i32, i32, i32
  }
  func.func @transform_3(%arg0: i32) -> (i32, i32, i32) {
    %c0_i32 = arith.constant 0 : i32
    %c0_i32_0 = arith.constant 0 : i32
    %c0_i32_1 = arith.constant 0 : i32
    %c0_i32_2 = arith.constant 0 : i32
    return %c0_i32, %c0_i32_0, %c0_i32_1 : i32, i32, i32
  }
  func.func @transform_4(%arg0: i32) -> (i32, i32, i32) {
    %c0_i32 = arith.constant 0 : i32
    %c0_i32_0 = arith.constant 0 : i32
    %c0_i32_1 = arith.constant 0 : i32
    %c0_i32_2 = arith.constant 0 : i32
    return %c0_i32, %c0_i32_0, %c0_i32_1 : i32, i32, i32
  }
  func.func @transform_5(%arg0: i32) -> (i32, i32, i32) {
    %c0_i32 = arith.constant 0 : i32
    %c0_i32_0 = arith.constant 0 : i32
    %c0_i32_1 = arith.constant 0 : i32
    %c0_i32_2 = arith.constant 0 : i32
    return %c0_i32, %c0_i32_0, %c0_i32_1 : i32, i32, i32
  }
  func.func @transform_6(%arg0: i32) -> (i32, i32, i32) {
    %c0_i32 = arith.constant 0 : i32
    %c0_i32_0 = arith.constant 0 : i32
    %c0_i32_1 = arith.constant 0 : i32
    %c0_i32_2 = arith.constant 0 : i32
    return %c0_i32, %c0_i32_0, %c0_i32_1 : i32, i32, i32
  }
  func.func @transform_7(%arg0: i32) -> (i32, i32) {
    %c0_i32 = arith.constant 0 : i32
    %c0_i32_0 = arith.constant 0 : i32
    %c0_i32_1 = arith.constant 0 : i32
    return %c0_i32, %c0_i32_0 : i32, i32
  }
  func.func @transform_8(%arg0: i32) -> (i32, i32) {
    %c0_i32 = arith.constant 0 : i32
    %c0_i32_0 = arith.constant 0 : i32
    %c0_i32_1 = arith.constant 0 : i32
    return %c0_i32, %c0_i32_0 : i32, i32
  }
  func.func @transform_9(%arg0: i32) -> (i32, i32) {
    %c0_i32 = arith.constant 0 : i32
    %c0_i32_0 = arith.constant 0 : i32
    %c0_i32_1 = arith.constant 0 : i32
    return %c0_i32, %c0_i32_0 : i32, i32
  }
  func.func @transform_10(%arg0: i32) -> (i32, i32) {
    %c0_i32 = arith.constant 0 : i32
    %c0_i32_0 = arith.constant 0 : i32
    %c0_i32_1 = arith.constant 0 : i32
    return %c0_i32, %c0_i32_0 : i32, i32
  }
  func.func @transform_11(%arg0: i32) -> (i32, i32) {
    %c0_i32 = arith.constant 0 : i32
    %c0_i32_0 = arith.constant 0 : i32
    %c0_i32_1 = arith.constant 0 : i32
    return %c0_i32, %c0_i32_0 : i32, i32
  }
  func.func @transform_12(%arg0: i32) -> (i32, i32) {
    %c0_i32 = arith.constant 0 : i32
    %c0_i32_0 = arith.constant 0 : i32
    %c0_i32_1 = arith.constant 0 : i32
    return %c0_i32, %c0_i32_0 : i32, i32
  }
  func.func @transform_13(%arg0: i32) -> (i32, i32, i32) {
    %c0_i32 = arith.constant 0 : i32
    %c0_i32_0 = arith.constant 0 : i32
    %c0_i32_1 = arith.constant 0 : i32
    return %arg0, %c0_i32, %c0_i32_0 : i32, i32, i32
  }
}

</mosaic_0001>

<bundles_post_ra>
// kernel: overlap_attention_forward.1
= control target key start
LH: loop header
LB: loop body
LE: loop exit
PB: predicated region body
PF: predicated region fallthrough
CT: control target
= control target key end

     0   :  { %s8399_s0 = inlined_call_operand.vmem [shape: f32[2,32,128], index: 0, kind: input, shape index: {}]   ;;  %s8400_s1 = inlined_call_operand.vmem [shape: bf16[2,32,128], index: 1, kind: input, shape index: {}]   ;;  %s8401_s2 = inlined_call_operand.vmem [shape: f32[2,1,128], index: 2, kind: input, shape index: {}]   ;;  %s8402_s3 = inlined_call_operand.vmem [shape: bf16[4,8,32], index: 3, kind: input, shape index: {}]   ;;  %s8403_s4 = inlined_call_operand.vmem [shape: bf16[4,32,32], index: 4, kind: input, shape index: {}]   ;;  %s8404_s5 = inlined_call_operand.vmem [shape: bf16[4,32,32], index: 5, kind: input, shape index: {}]   ;;  %s8405_s6 = inlined_call_operand.vmem [shape: f32[4,32,4], index: 6, kind: input, shape index: {}]   ;;  %s8406_s7 = inlined_call_operand.vmem [shape: f32[1,32], index: 7, kind: input, shape index: {}]   ;;  %s8407_s8 = inlined_call_operand.vmem [shape: f32[32,1], index: 8, kind: input, shape index: {}]   ;;  %s8408_s9 = inlined_call_operand.vmem [shape: bf16[160,160], index: 9, kind: input, shape index: {}]   ;;  %s8409_s10 = inlined_call_operand.vmem [shape: f32[160,2], index: 10, kind: input, shape index: {}]   ;;  %s8410_s11 = inlined_call_operand.vmem [shape: f32[16,160], index: 11, kind: input, shape index: {}]   ;;  %s8411_s12 = inlined_call_operand.vmem [shape: f32[160,16], index: 12, kind: input, shape index: {}]   ;;  %s8412_s13 = inlined_call_operand.hbm [shape: f32[2,160,128], index: 13, kind: output, shape index: {}]  }
   0x1   :  { %8419 = sst [smem:[#allocation33_spill]] %s8399_s0 }
   0x2   :  { %18 = vsyncpa [#allocation4], 0 }
   0x3   :  { %20 = vsyncpa [#allocation4 + $0x1], 0  ;;  %s6659_s7 = smov 0   ;;  %s6661_s8 = smov 0  }
   0x4   :  { %s6663_s25 = smov 0   ;;  %s6665_s26 = smov 0  }
   0x5 LB: > { %s6680_s27 = sadd.s32 4294967295, %s6577_s26   ;;  %s5174_s28 = sadd.s32 4294967294, %s6577_s26   ;;  %s6577_s26 = sphi %s6665_s26, %s8480_s26   ;;  %s6573_s25 = sphi %s6663_s25, %s8479_s25   ;;  %s6569_s8 = sphi %s6661_s8, %s8478_s8   ;;  %s6565_s7 = sphi %s6659_s7, %s8477_s7  }
   0x6   : > { %s6684_s29 = sadd.s32 1, %s6577_s26   ;;  %s321_s30 = sadd.s32 1, %s6573_s25 }
   0x7   : > { %s318_s14 = ssub.s32 %s6577_s26, %s6684_s29  ;;  %p331_p0 = scmp.ne.s32.totalorder %s6573_s25, %s6569_s8 }
   0x8   : > { %p319_p1 = scmp.eq.s32.totalorder %s318_s14, 0  ;;  %p332_p2 = scmp.eq.s32.totalorder %s6680_s27, 1 }
   0x9   : > { %p337_p3 = scmp.ne.s32.totalorder %s6569_s8, %s6565_s7  ;;  %p338_p4 = scmp.eq.s32.totalorder %s5174_s28, 1 }
   0xa   : > { %s6695_s15 = scalar_select %p319_p1, %s6573_s25, %s321_s30  }
   0xb   : > { %p6697_p5 = por %p332_p2, %p331_p0  ;;  %p6701_p6 = por %p338_p4, %p337_p3 }
   0xc   : > { %p5177_p7 = scmp.ge.s32.totalorder %s6577_s26, 1  ;;  %p408_p8 = scmp.lt.s32.totalorder %s6577_s26, 3 }
   0xe   : > { %p409_p9 = pnand %p5177_p7, %p408_p8 }
  0x10   : > { %412 = sbr.rel (%p409_p9) target bundleno = 7269 (0x1c65), region = 72 }
  0x15   : > { %p460_p10 = scmp.lt.s32.totalorder %s6680_s27, 1  ;;  %v6579_v0 = vmov 0.0   ;;  %vm6580_vm0 = vmmov 0   ;;  %s8422_s0 = sld [smem:[#allocation33_spill]]  ;;  %vm495_vm1 = vcmask 261120   ;;  %vm589_vm2 = vcmask 1043456  }
  0x16   : > { %5659 = vmatprep.subr.bf16.mxu0 %v6579_v0  ;;  %5663 = vmatprep.mubr.msk.bf16.mxu0 %vm6580_vm0, %v6579_v0  ;;  %v494_v9 = vld [vmem:[%s8402_s3] sm:$0xf]  ;;  %vm564_vm3 = vcmask 64512   ;;  %v6149_v44 = vld [vmem:[%s8403_s4 + $0x8] sm:$0xff]   ;;  %v6581_v45 = vmov 0   ;;  %vm4126_vm4 = vcmask 130048  }
  0x17   : > { %s461_s18 = scalar_select %p460_p10, %s6680_s27, 1  ;;  %v6148_v43 = vld [vmem:[%s8403_s4] sm:$0xff]   ;;  %6109 = vset.pattern.permute.xlu1 %v6581_v45 }
  0x19   : > { %s5393_s19 = sshll.u32 %s461_s18, 5  ;;  %s5394_s20 = sshll.u32 %s461_s18, 4 }
  0x1a   : > { %s469_s30 = scalar_lea.vmem %s8400_s1, %s5394_s20  ;;  %s6738_s22 = scalar_lea.vmem %s8401_s2, %s461_s18 }
  0x1b   : > { %s464_s23 = scalar_lea.vmem %s8422_s0, %s5393_s19  ;;  %v482_v3 = vld [vmem:[%s469_s30] sm:$0xff]   ;;  %v484_v5 = vld [vmem:[%s469_s30 + $0x8] sm:$0xff]   ;;  %s6060_s30 = smul.u32 2560, %s6680_s27 }
  0x1c   : > { %v6718_v1 = vld [vmem:[%s464_s23 + $0x10] sm:$0xff]  ;;  %v6720_v2 = vld [vmem:[%s464_s23 + $0x18] sm:$0xff]  ;;  %486 = vst [vmem:[#allocation2] sm:$0xff] %v482_v3   ;;  %v6724_v6 = vld [vmem:[%s464_s23] sm:$0xff]  ;;  %s6586_s18 = smov [#allocation3]  }
  0x1d   : > { %v480_v4 = vpack.c.bf16 %v6720_v2, %v6718_v1  ;;  %v6726_v7 = vld [vmem:[%s464_s23 + $0x8] sm:$0xff]  ;;  %488 = vst [vmem:[#allocation2 + $0x8] sm:$0xff] %v484_v5   ;;  %v6741_v10 = vld [vmem:[%s6738_s22] ss:$0 sm:$0xff]  ;;  %s457_s23 = sand.u32 1, %s6569_s8   ;;  %s8351_s21 = scalar_lea.hbm %s8412_s13, %s6060_s30 }
  0x1e   : > { %v479_v8 = vpack.c.bf16 %v6726_v7, %v6724_v6  ;;  %s6059_s24 = smul.u32 160, %s457_s23  ;;  %s8359_s27 = scalar_lea.sflag [#allocation4], %s457_s23 }
  0x1f   : > { %5660 = vmatpush3.bf16.msra.mxu0 %v480_v4 }
  0x20   : > { %5661 = vmatprep.subr.bf16.mxu0 %v6579_v0  ;;  %s8268_s28 = scalar_lea.vmem [#allocation3], %s6059_s24  ;;  %s6521_s24 = sshll.u32 %s6586_s18, 4  ;;  %s6522_s24 = int_to_ptr.vmem [resolvable:$false] %s6521_s24 }
  0x21   : > { %s5091_s14 = sshll.u32 %s8268_s28, 4  ;;  %s6523_s30 = scalar_lea.vmem %s6522_s24, 5120  ;;  %s8353_s14 = int_to_ptr.vmem [resolvable:$true] %s5091_s14 }
  0x22   : > { %p6524_p0 = scmp.lt.s32.totalorder %s8353_s14, %s6522_s24 }
  0x23   : > { %5662 = vmatpush3.bf16.msra.mxu0 %v479_v8 }
  0x24   : > { %5705 = vmatprep.subr.bf16.mxu0 %v480_v4 }
  0x26   : > { %5664 = vmatmul.mubr.msk.bf16.vlgmr.msra.gmra.mxu0 %vm495_vm1, %v494_v9 }
  0x27   : > { %5706 = vmatpush3.bf16.msra.mxu0 %v480_v4  ;;  %5709 = vmatprep.mubr.msk.bf16.mxu0 %vm495_vm1, %v6148_v43 }
  0x28   : > { %5707 = vmatprep.subr.bf16.mxu0 %v479_v8 }
  0x2b   : > { %5708 = vmatpush3.bf16.msra.mxu0 %v479_v8 }
  0x2e   : > { %5710 = vmatmul.mubr.msk.bf16.vlgmr.msra.gmra.mxu0 %vm495_vm1, %v6149_v44 }
  0xe6   : > { %v533_v11 = vpop.f32.mrf.mxu0 }
  0xe7   : > { %v539_v12 = vpack.c.bf16 %v533_v11, %v533_v11  ;;  %v546_v13 = vmul.f32 %v6741_v10, %v533_v11 }
  0xe8   : > { %v5665_v14 = vpop.f32.mrf.mxu0 }
  0xe9   : > { %6055 = vmatprep.subr.msk.bf16.mxu1 %vm589_vm2, %v539_v12  ;;  %v591_v15 = vsel %vm589_vm2, %v539_v12, 0  ;;  %v547_v16 = vpack.c.bf16 %v546_v13, %v546_v13 }
  0xea   : > { %v536_v17 = vpop.f32.mrf.mxu0  ;;  %5668 = vmatpush3.bf16.msra.mxu1 %v591_v15 }
  0xeb   : > { %548 = vxpose.xlu0.c.b16.start.end [1/1] (short) %v547_v16, 128  ;;  %5685 = vmatprep.subr.bf16.mxu1 %v6579_v0 }
  0xec   : > { %v5666_v18 = vpop.f32.mrf.mxu0 }
  0xf4   : > { %6110 = vset.pattern.permute.xlu0 %v6581_v45 }
 0x14d   : > { %v556_v19 = vpop.trf.xlu0 }
 0x14e   : > { %5669 = vmatprep.mubr.msk.bf16.mxu1 %vm564_vm3, %v556_v19 }
 0x151   : > { %v557_v20 = vpop.trf.xlu0 }
 0x152   : > { %5670 = vmatmul.mubr.msk.bf16.vlgmr.msra.gmra.mxu1 %vm564_vm3, %v557_v20 }
 0x155   : > { %v558_v21 = vpop.trf.xlu0 }
 0x156   : > { %5673 = vmatprep.mubr.msk.bf16.mxu1 %vm564_vm3, %v558_v21 }
 0x159   : > { %v559_v22 = vpop.trf.xlu0 }
 0x15a   : > { %5674 = vmatmul.mubr.msk.bf16.gmra.mxu1 %vm564_vm3, %v559_v22 }
 0x15d   : > { %v560_v23 = vpop.trf.xlu0 }
 0x15e   : > { %5677 = vmatprep.mubr.msk.bf16.mxu1 %vm564_vm3, %v560_v23 }
 0x161   : > { %v561_v24 = vpop.trf.xlu0 }
 0x162   : > { %5678 = vmatmul.mubr.msk.bf16.gmra.mxu1 %vm564_vm3, %v561_v24 }
 0x165   : > { %v562_v25 = vpop.trf.xlu0 }
 0x166   : > { %5681 = vmatprep.mubr.msk.bf16.mxu1 %vm564_vm3, %v562_v25 }
 0x169   : > { %v563_v26 = vpop.trf.xlu0 }
 0x16a   : > { %5682 = vmatmul.mubr.msk.bf16.gmra.mxu1 %vm564_vm3, %v563_v26 }
 0x16b   : > { %5701 = vmatprep.mubr.msk.bf16.mxu1 %vm6580_vm0, %v6579_v0 }
 0x212   : > { %v6757_v27 = vpop.f32.mrf.mxu1 }
 0x214   : > { %v6759_v28 = vpop.f32.mrf.mxu1 }
 0x216   : > { %v6761_v29 = vpop.f32.mrf.mxu1 }
 0x218   : > { %v6763_v30 = vpop.f32.mrf.mxu1 }
 0x21a   : > { %v6765_v31 = vpop.f32.mrf.mxu1 }
 0x21c   : > { %v6767_v32 = vpop.f32.mrf.mxu1 }
 0x21e   : > { %v6769_v33 = vpop.f32.mrf.mxu1 }
 0x220   : > { %v6771_v34 = vpop.f32.mrf.mxu1 }
 0x222   : > { %v5679_v35 = vpop.f32.mrf.mxu1 }
 0x223   : > { %710 = vmax.xlane.f32.xlu1 %v5679_v35 }
 0x224   : > { %v659_v36 = vpop.f32.mrf.mxu1 }
 0x226   : > { %v5680_v37 = vpop.f32.mrf.mxu1 }
 0x227   : > { %712 = vmax.xlane.f32.xlu1 %v5680_v37 }
 0x228   : > { %v6773_v38 = vpop.f32.mrf.mxu1 }
 0x22a   : > { %v5683_v39 = vpop.f32.mrf.mxu1 }
 0x22b   : > { %706 = vmax.xlane.f32.xlu1 %v659_v36  ;;  %718 = vmax.xlane.f32.xlu0 %v5683_v39 }
 0x22c   : > { %v675_v40 = vpop.f32.mrf.mxu1 }
 0x22e   : > { %v5684_v41 = vpop.f32.mrf.mxu1 }
 0x22f   : > { %708 = vmax.xlane.f32.xlu1 %v6773_v38  ;;  %696 = vmax.xlane.f32.xlu0 %v6761_v29 }
 0x230   : > { %v678_v42 = vpop.f32.mrf.mxu1 }
 0x233   : > { %692 = vmax.xlane.f32.xlu0 %v6763_v30  ;;  %714 = vmax.xlane.f32.xlu1 %v675_v40 }
 0x237   : > { %720 = vmax.xlane.f32.xlu1 %v5684_v41 }
 0x23b   : > { %716 = vmax.xlane.f32.xlu1 %v678_v42 }
 0x23f   : > { %702 = vmax.xlane.f32.xlu1 %v6765_v31 }
 0x243   : > { %704 = vmax.xlane.f32.xlu1 %v6769_v33 }
 0x247   : > { %698 = vmax.xlane.f32.xlu1 %v6767_v32 }
 0x24b   : > { %700 = vmax.xlane.f32.xlu1 %v6771_v34 }
 0x24f   : > { %694 = vmax.xlane.f32.xlu1 %v6757_v27 }
 0x253   : > { %690 = vmax.xlane.f32.xlu1 %v6759_v28 }
 0x2ac   : > { %v711_v46 = vpop.xlane.xlu1 %710 }
 0x2ad   : > { %v732_v47 = vsub.f32 %v5679_v35, %v711_v46 }
 0x2af   : > { %v758_v48 = vmul.f32 1.442695, %v732_v47 }
 0x2b0   : > { %v713_v49 = vpop.xlane.xlu1 %712 }
 0x2b1   : > { %6204 = vpow2.f32 %v758_v48  ;;  %v733_v3 = vsub.f32 %v5680_v37, %v713_v49 }
 0x2b3   : > { %v760_v11 = vmul.f32 1.442695, %v733_v3 }
 0x2b4   : > { %v707_v50 = vpop.xlane.xlu1 %706  ;;  %v719_v51 = vpop.xlane.xlu0 %718 }
 0x2b5   : > { %v736_v52 = vsub.f32 %v5683_v39, %v719_v51  ;;  %v730_v58 = vsub.f32 %v659_v36, %v707_v50 }
 0x2b7   : > { %v766_v53 = vmul.f32 1.442695, %v736_v52  ;;  %v754_v62 = vmul.f32 1.442695, %v730_v58 }
 0x2b8   : > { %v709_v54 = vpop.xlane.xlu1 %708  ;;  %v697_v20 = vpop.xlane.xlu0 %696 }
 0x2b9   : > { %6206 = vpow2.f32 %v766_v53  ;;  %v731_v13 = vsub.f32 %v6773_v38, %v709_v54  ;;  %v6854_v53 = vld [vmem:[%s8405_s6] sm:$0xff]  ;;  %v6860_v54 = vld [vmem:[%s8405_s6 + $0x10] sm:$0xff] }
 0x2bb   : > { %v756_v17 = vmul.f32 1.442695, %v731_v13 }
 0x2bc   : > { %v715_v55 = vpop.xlane.xlu1 %714  ;;  %v693_v35 = vpop.xlane.xlu0 %692 }
 0x2bd   : > { %v734_v56 = vsub.f32 %v675_v40, %v715_v55  ;;  %v723_v39 = vsub.f32 %v6763_v30, %v693_v35  ;;  %v6865_v55 = vld [vmem:[%s8405_s6 + $0x8] sm:$0xff] }
 0x2be   : > { %v6794_v57 = vpop.eup %6204 }
 0x2bf   : > { %v762_v59 = vmul.f32 1.442695, %v734_v56  ;;  %790 = vadd.xlane.f32.xlu1 %v6794_v57  ;;  %v6872_v56 = vld [vmem:[%s8405_s6 + $0x18] sm:$0xff] }
 0x2c0   : > { %v721_v60 = vpop.xlane.xlu1 %720 }
 0x2c1   : > { %v737_v61 = vsub.f32 %v5684_v41, %v721_v60  ;;  %6208 = vpow2.f32 %v762_v59 }
 0x2c3   : > { %v768_v63 = vmul.f32 1.442695, %v737_v61 }
 0x2c4   : > { %v717_v4 = vpop.xlane.xlu1 %716 }
 0x2c5   : > { %6210 = vpow2.f32 %v768_v63  ;;  %v735_v5 = vsub.f32 %v678_v42, %v717_v4 }
 0x2c6   : > { %6212 = vpow2.f32 %v754_v62  ;;  %v6797_v8 = vpop.eup %6206 }
 0x2c7   : > { %v764_v9 = vmul.f32 1.442695, %v735_v5  ;;  %798 = vadd.xlane.f32.xlu1 %v6797_v8 }
 0x2c8   : > { %v703_v12 = vpop.xlane.xlu1 %702 }
 0x2c9   : > { %6214 = vpow2.f32 %v764_v9  ;;  %v728_v14 = vsub.f32 %v6765_v31, %v703_v12  ;;  %v725_v31 = vsub.f32 %v6761_v29, %v697_v20 }
 0x2ca   : > { %6216 = vpow2.f32 %v760_v11 }
 0x2cb   : > { %v750_v15 = vmul.f32 1.442695, %v728_v14  ;;  %v744_v38 = vmul.f32 1.442695, %v725_v31 }
 0x2cc   : > { %v705_v16 = vpop.xlane.xlu1 %704 }
 0x2cd   : > { %6218 = vpow2.f32 %v750_v15  ;;  %v729_v18 = vsub.f32 %v6769_v33, %v705_v16 }
 0x2ce   : > { %v6803_v19 = vpop.eup %6208  ;;  %6220 = vpow2.f32 %v756_v17 }
 0x2cf   : > { %v752_v21 = vmul.f32 1.442695, %v729_v18  ;;  %794 = vadd.xlane.f32.xlu1 %v6803_v19 }
 0x2d0   : > { %v699_v22 = vpop.xlane.xlu1 %698 }
 0x2d1   : > { %v726_v23 = vsub.f32 %v6767_v32, %v699_v22  ;;  %6222 = vpow2.f32 %v752_v21 }
 0x2d2   : > { %v6807_v24 = vpop.eup %6210 }
 0x2d3   : > { %v6809_v25 = vpop.eup %6212  ;;  %v746_v26 = vmul.f32 1.442695, %v726_v23  ;;  %800 = vadd.xlane.f32.xlu0 %v6807_v24 }
 0x2d4   : > { %786 = vadd.xlane.f32.xlu1 %v6809_v25  ;;  %v701_v33 = vpop.xlane.xlu1 %700 }
 0x2d5   : > { %6224 = vpow2.f32 %v746_v26  ;;  %v727_v36 = vsub.f32 %v6771_v34, %v701_v33  ;;  %v740_v34 = vmul.f32 1.442695, %v723_v39  ;;  %v6880_v26 = vpop.f32.mrf.mxu0 }
 0x2d6   : > { %v6815_v37 = vpop.eup %6214 }
 0x2d7   : > { %v748_v32 = vmul.f32 1.442695, %v727_v36  ;;  %796 = vadd.xlane.f32.xlu0 %v6815_v37  ;;  %v6819_v41 = vpop.eup %6216 }
 0x2d8   : > { %v695_v40 = vpop.xlane.xlu1 %694 }
 0x2d9   : > { %6226 = vpow2.f32 %v748_v32  ;;  %v724_v29 = vsub.f32 %v6757_v27, %v695_v40 }
 0x2da   : > { %v6822_v42 = vpop.eup %6218  ;;  %6228 = vpow2.f32 %v744_v38  ;;  %v957_v38 = vpop.f32.mrf.mxu0 }
 0x2db   : > { %v742_v43 = vmul.f32 1.442695, %v724_v29  ;;  %792 = vadd.xlane.f32.xlu0 %v6819_v41  ;;  %782 = vadd.xlane.f32.xlu1 %v6822_v42  ;;  %v6827_v30 = vpop.eup %6220 }
 0x2dc   : > { %v691_v44 = vpop.xlane.xlu1 %690 }
 0x2dd   : > { %6230 = vpow2.f32 %v742_v43  ;;  %v722_v46 = vsub.f32 %v6759_v28, %v691_v44  ;;  %v5712_v44 = vpop.f32.mrf.mxu0 }
 0x2de   : > { %6232 = vpow2.f32 %v740_v34  ;;  %v6830_v27 = vpop.eup %6222 }
 0x2df   : > { %v738_v47 = vmul.f32 1.442695, %v722_v46  ;;  %788 = vadd.xlane.f32.xlu0 %v6827_v30 }
 0x2e1   : > { %6234 = vpow2.f32 %v738_v47 }
 0x2e2   : > { %v6832_v48 = vpop.eup %6224 }
 0x2e3   : > { %784 = vadd.xlane.f32.xlu0 %v6830_v27  ;;  %778 = vadd.xlane.f32.xlu1 %v6832_v48 }
 0x2e6   : > { %v6836_v49 = vpop.eup %6226 }
 0x2e7   : > { %780 = vadd.xlane.f32.xlu0 %v6836_v49  ;;  %v6839_v28 = vpop.eup %6228 }
 0x2ea   : > { %v6841_v50 = vpop.eup %6230 }
 0x2eb   : > { %776 = vadd.xlane.f32.xlu0 %v6839_v28  ;;  %774 = vadd.xlane.f32.xlu1 %v6841_v50  ;;  %v6845_v51 = vpop.eup %6232 }
 0x2ee   : > { %v6847_v52 = vpop.eup %6234 }
 0x2ef   : > { %772 = vadd.xlane.f32.xlu0 %v6845_v51  ;;  %770 = vadd.xlane.f32.xlu1 %v6847_v52 }
 0x300   : > { %889 = vperm.xlu1 %6109, %v6854_v53  }
 0x304   : > { %899 = vperm.xlu1 %6109, %v6860_v54  }
 0x305   : > { %894 = vperm.xlu0 %6110, %v6865_v55  }
 0x308   : > { %904 = vperm.xlu1 %6109, %v6872_v56  }
 0x348   : > { %v791_v58 = vpop.xlane.xlu1 %790 }
 0x350   : > { %v799_v59 = vpop.xlane.xlu1 %798 }
 0x351   : > { %6236 = vrcp.f32 %v799_v59 }
 0x358   : > { %v795_v60 = vpop.xlane.xlu1 %794 }
 0x35c   : > { %v801_v61 = vpop.xlane.xlu0 %800 }
 0x35d   : > { %6238 = vrcp.f32 %v801_v61  ;;  %v787_v63 = vpop.xlane.xlu1 %786 }
 0x35e   : > { %6240 = vrcp.f32 %v795_v60  ;;  %v6237_v4 = vpop.eup %6236  ;;  %v960_v60 = vpop.f32.mrf.mxu0 }
 0x35f   : > { %v832_v12 = vmul.f32 %v6237_v4, %v6797_v8 }
 0x360   : > { %v797_v62 = vpop.xlane.xlu0 %796 }
 0x361   : > { %6242 = vrcp.f32 %v797_v62 }
 0x362   : > { %6244 = vrcp.f32 %v791_v58 }
 0x364   : > { %v793_v3 = vpop.xlane.xlu0 %792  ;;  %v783_v5 = vpop.xlane.xlu1 %782 }
 0x365   : > { %6246 = vrcp.f32 %v793_v3 }
 0x366   : > { %6248 = vrcp.f32 %v787_v63 }
 0x368   : > { %v789_v9 = vpop.xlane.xlu0 %788 }
 0x369   : > { %6250 = vrcp.f32 %v789_v9 }
 0x36a   : > { %v6239_v11 = vpop.eup %6238  ;;  %6252 = vrcp.f32 %v783_v5 }
 0x36b   : > { %v833_v13 = vmul.f32 %v6239_v11, %v6807_v24  ;;  %v6241_v14 = vpop.eup %6240 }
 0x36c   : > { %v785_v15 = vpop.xlane.xlu0 %784  ;;  %v779_v16 = vpop.xlane.xlu1 %778  ;;  %v830_v20 = vmul.f32 %v6241_v14, %v6803_v19 }
 0x36d   : > { %6254 = vrcp.f32 %v785_v15  ;;  %v841_v17 = vpack.c.bf16 %v833_v13, %v832_v12 }
 0x36e   : > { %v6243_v18 = vpop.eup %6242  ;;  %6256 = vrcp.f32 %v779_v16 }
 0x36f   : > { %5686 = vmatpush3.bf16.msra.mxu1 %v841_v17  ;;  %5713 = vmatprep.subr.bf16.mxu0 %v841_v17  ;;  %v831_v21 = vmul.f32 %v6243_v18, %v6815_v37  ;;  %v6245_v22 = vpop.eup %6244 }
 0x370   : > { %v781_v23 = vpop.xlane.xlu0 %780  ;;  %5714 = vmatpush3.bf16.msra.mxu0 %v841_v17  ;;  %5687 = vmatprep.subr.bf16.mxu1 %v6579_v0  ;;  %v828_v31 = vmul.f32 %v6245_v22, %v6794_v57 }
 0x371   : > { %6258 = vrcp.f32 %v781_v23  ;;  %v840_v8 = vpack.c.bf16 %v831_v21, %v830_v20 }
 0x372   : > { %v6247_v24 = vpop.eup %6246 }
 0x373   : > { %5688 = vmatpush3.bf16.msra.mxu1 %v840_v8  ;;  %5715 = vmatprep.subr.bf16.mxu0 %v840_v8  ;;  %v829_v33 = vmul.f32 %v6247_v24, %v6819_v41  ;;  %v6249_v35 = vpop.eup %6248 }
 0x374   : > { %v777_v19 = vpop.xlane.xlu0 %776  ;;  %5716 = vmatpush3.bf16.msra.mxu0 %v840_v8  ;;  %v775_v36 = vpop.xlane.xlu1 %774  ;;  %5689 = vmatprep.subr.bf16.mxu1 %v6579_v0  ;;  %v826_v39 = vmul.f32 %v6249_v35, %v6809_v25 }
 0x375   : > { %6260 = vrcp.f32 %v777_v19  ;;  %v839_v37 = vpack.c.bf16 %v829_v33, %v828_v31 }
 0x376   : > { %v6251_v32 = vpop.eup %6250  ;;  %6262 = vrcp.f32 %v775_v36 }
 0x377   : > { %5690 = vmatpush3.bf16.msra.mxu1 %v839_v37  ;;  %5717 = vmatprep.subr.bf16.mxu0 %v839_v37  ;;  %v827_v40 = vmul.f32 %v6251_v32, %v6827_v30  ;;  %v6253_v57 = vpop.eup %6252 }
 0x378   : > { %v773_v29 = vpop.xlane.xlu0 %772  ;;  %5718 = vmatpush3.bf16.msra.mxu0 %v839_v37  ;;  %v771_v41 = vpop.xlane.xlu1 %770  ;;  %5691 = vmatprep.subr.bf16.mxu1 %v6579_v0  ;;  %v824_v46 = vmul.f32 %v6253_v57, %v6822_v42 }
 0x379   : > { %6264 = vrcp.f32 %v773_v29  ;;  %v838_v43 = vpack.c.bf16 %v827_v40, %v826_v39 }
 0x37a   : > { %v6255_v34 = vpop.eup %6254  ;;  %6266 = vrcp.f32 %v771_v41 }
 0x37b   : > { %5692 = vmatpush3.bf16.msra.mxu1 %v838_v43  ;;  %5719 = vmatprep.subr.bf16.mxu0 %v838_v43  ;;  %v825_v47 = vmul.f32 %v6255_v34, %v6830_v27  ;;  %v6257_v25 = vpop.eup %6256 }
 0x37c   : > { %5720 = vmatpush3.bf16.msra.mxu0 %v838_v43  ;;  %5693 = vmatprep.subr.bf16.mxu1 %v6579_v0  ;;  %v890_v30 = vpop.permute.xlu1 %889  ;;  %v822_v61 = vmul.f32 %v6257_v25, %v6832_v48 }
 0x37d   : > { %v837_v58 = vpack.c.bf16 %v825_v47, %v824_v46  ;;  %v958_v63 = vadd.f32 %v957_v38, %v890_v30  ;;  %v6151_v30 = vld [vmem:[%s8404_s5 + $0x8] sm:$0xff]  }
 0x37e   : > { %v6259_v59 = vpop.eup %6258 }
 0x37f   : > { %5694 = vmatpush3.bf16.msra.mxu1 %v837_v58  ;;  %5721 = vmatprep.subr.bf16.mxu0 %v837_v58  ;;  %v823_v62 = vmul.f32 %v6259_v59, %v6836_v49 }
 0x380   : > { %5722 = vmatpush3.bf16.msra.mxu0 %v837_v58  ;;  %5695 = vmatprep.subr.bf16.mxu1 %v6579_v0  ;;  %v900_v42 = vpop.permute.xlu1 %899  ;;  %v895_v27 = vpop.permute.xlu0 %894  ;;  %v6584_v58 = vmov 2  }
 0x381   : > { %v836_v3 = vpack.c.bf16 %v823_v62, %v822_v61  ;;  %v961_v4 = vadd.f32 %v960_v60, %v895_v27  ;;  %v966_v17 = vadd.f32 %v6880_v26, %v900_v42  ;;  %v1023_v26 = vlaneseq  ;;  %6112 = vset.pattern.permute.xlu0 %v6584_v58 }
 0x382   : > { %v6261_v5 = vpop.eup %6260 }
 0x383   : > { %v6263_v9 = vpop.eup %6262  ;;  %5696 = vmatpush3.bf16.msra.mxu1 %v836_v3  ;;  %5723 = vmatprep.subr.bf16.mxu0 %v836_v3  ;;  %v821_v11 = vmul.f32 %v6261_v5, %v6839_v28  ;;  %v972_v12 = vpack.c.bf16 %v961_v4, %v958_v63  ;;  %v1024_v35 = vshrl.u32 %v1023_v26, 7 }
 0x384   : > { %5724 = vmatpush3.bf16.msra.mxu0 %v836_v3  ;;  %5697 = vmatprep.subr.bf16.mxu1 %v6579_v0  ;;  %v820_v48 = vmul.f32 %v6263_v9, %v6841_v50  ;;  %v905_v49 = vpop.permute.xlu1 %904  ;;  %v6582_v50 = vmov 1065369472  }
 0x385   : > { %5729 = vmatprep.mubr.bf16.mxu0 %v972_v12  ;;  %v969_v18 = vadd.f32 %v5712_v44, %v905_v49  ;;  %v6914_v36 = vsub.s32 0, %v1024_v35 }
 0x386   : > { %v6265_v13 = vpop.eup %6264  ;;  %v835_v14 = vpack.c.bf16 %v821_v11, %v820_v48 }
 0x387   : > { %v6267_v15 = vpop.eup %6266  ;;  %v819_v16 = vmul.f32 %v6265_v13, %v6845_v51  ;;  %v973_v21 = vpack.c.bf16 %v969_v18, %v966_v17  ;;  %v6150_v51 = vld [vmem:[%s8404_s5] sm:$0xff]  }
 0x388   : > { %5698 = vmatpush3.bf16.msra.mxu1 %v835_v14  ;;  %5725 = vmatprep.subr.bf16.mxu0 %v835_v14  ;;  %v818_v28 = vmul.f32 %v6267_v15, %v6847_v52  ;;  %v6583_v52 = vmov 1  }
 0x389   : > { %5726 = vmatpush3.bf16.msra.mxu0 %v835_v14  ;;  %5699 = vmatprep.subr.bf16.mxu1 %v6579_v0  ;;  %v6585_v14 = vmov 3  }
 0x38a   : > { %v834_v20 = vpack.c.bf16 %v819_v16, %v818_v28  ;;  %6111 = vset.pattern.permute.xlu1 %v6583_v52 }
 0x38b   : > { %1042 = vperm.xlu1 %6111, %v6854_v53  }
 0x38c   : > { %5700 = vmatpush3.bf16.msra.mxu1 %v834_v20  ;;  %5727 = vmatprep.subr.bf16.mxu0 %v834_v20 }
 0x38d   : > { %5728 = vmatpush3.bf16.msra.mxu0 %v834_v20  ;;  %5741 = vmatprep.subr.bf16.mxu1 %v6579_v0 }
 0x38f   : > { %5702 = vmatmul.mubr.bf16.vlgmr.msra.gmra.mxu1 %v6582_v50  ;;  %1046 = vperm.xlu1 %6111, %v6865_v55  }
 0x390   : > { %5730 = vmatmul.mubr.bf16.vlgmr.msra.gmra.mxu0 %v973_v21  ;;  %5745 = vmatprep.mubr.msk.bf16.mxu1 %vm6580_vm0, %v6579_v0 }
 0x391   : > { %5737 = vmatprep.mubr.msk.bf16.mxu0 %vm495_vm1, %v6150_v51 }
 0x393   : > { %1050 = vperm.xlu1 %6111, %v6860_v54  }
 0x397   : > { %1054 = vperm.xlu1 %6111, %v6872_v56  }
 0x39b   : > { %6113 = vset.pattern.permute.xlu1 %v6584_v58 }
 0x406   : > { %v1043_v59 = vpop.permute.xlu1 %1042 }
 0x40a   : > { %v1047_v60 = vpop.permute.xlu1 %1046 }
 0x40e   : > { %v1051_v61 = vpop.permute.xlu1 %1050 }
 0x412   : > { %v1055_v11 = vpop.permute.xlu1 %1054 }
 0x44f   : > { %v876_v22 = vpop.f32.mrf.mxu1 }
 0x450   : > { %v877_v23 = vadd.f32 1e-09, %v876_v22  ;;  %v5731_v31 = vpop.f32.mrf.mxu0 }
 0x451   : > { %v5703_v8 = vpop.f32.mrf.mxu1 }
 0x452   : > { %6268 = vrcp.f32 %v877_v23  ;;  %v1008_v19 = vpop.f32.mrf.mxu0 }
 0x453   : > { %v879_v24 = vpop.f32.mrf.mxu1 }
 0x454   : > { %v5732_v37 = vpop.f32.mrf.mxu0 }
 0x455   : > { %v5704_v33 = vpop.f32.mrf.mxu1 }
 0x456   : > { %v1011_v39 = vpop.f32.mrf.mxu0 }
 0x45f   : > { %v6269_v32 = vpop.eup %6268 }
 0x460   : > { %v1026_v38 = vrot.slane %v6269_v32, %v6914_v36 }
 0x462   : > { %v1029_v40 = vmul.f32 %v5731_v31, %v1026_v38  ;;  %v1027_v57 = vmul.f32 %v1026_v38, %v1008_v19  ;;  %v1030_v29 = vmul.f32 %v5732_v37, %v1026_v38  ;;  %v1028_v41 = vmul.f32 %v1026_v38, %v1011_v39 }
 0x464   : > { %v1037_v43 = vsub.f32 %v6718_v1, %v1029_v40  ;;  %v1035_v34 = vsub.f32 %v6724_v6, %v1027_v57  ;;  %v1038_v44 = vsub.f32 %v6720_v2, %v1030_v29  ;;  %v1036_v46 = vsub.f32 %v6726_v7, %v1028_v41 }
 0x466   : > { %v1040_v47 = vpack.c.bf16 %v1038_v44, %v1037_v43  ;;  %v1039_v25 = vpack.c.bf16 %v1036_v46, %v1035_v34 }
 0x468   : > { %5733 = vmatprep.subr.bf16.mxu0 %v1040_v47 }
 0x469   : > { %5734 = vmatpush3.bf16.msra.mxu0 %v1040_v47 }
 0x46a   : > { %5735 = vmatprep.subr.bf16.mxu0 %v1039_v25 }
 0x46d   : > { %5736 = vmatpush3.bf16.msra.mxu0 %v1039_v25 }
 0x470   : > { %5738 = vmatmul.mubr.msk.bf16.vlgmr.msra.gmra.mxu0 %vm495_vm1, %v6151_v30 }
 0x530   : > { %v5739_v62 = vpop.f32.mrf.mxu0 }
 0x531   : > { %v6927_v63 = vadd.f32 %v5739_v62, %v1051_v61 }
 0x532   : > { %v1107_v42 = vpop.f32.mrf.mxu0 }
 0x533   : > { %v6929_v27 = vadd.f32 %v1107_v42, %v1043_v59  ;;  %1126 = vadd.xlane.f32.xlu0 %v6927_v63  ;;  %v1132_v49 = vmul.f32 %v6927_v63, %v6927_v63 }
 0x534   : > { %v5740_v3 = vpop.f32.mrf.mxu0 }
 0x535   : > { %1122 = vadd.xlane.f32.xlu1 %v6929_v27  ;;  %v1130_v9 = vmul.f32 %v6929_v27, %v6929_v27  ;;  %v6938_v12 = vadd.f32 %v5740_v3, %v1055_v11 }
 0x536   : > { %v1110_v4 = vpop.f32.mrf.mxu0 }
 0x537   : > { %v6933_v5 = vadd.f32 %v1110_v4, %v1047_v60  ;;  %v1133_v13 = vmul.f32 %v6938_v12, %v6938_v12 }
 0x539   : > { %1124 = vadd.xlane.f32.xlu0 %v6933_v5  ;;  %1134 = vadd.xlane.f32.xlu1 %v1130_v9  ;;  %v1131_v48 = vmul.f32 %v6933_v5, %v6933_v5 }
 0x53d   : > { %1136 = vadd.xlane.f32.xlu0 %v1131_v48  ;;  %1128 = vadd.xlane.f32.xlu1 %v6938_v12 }
 0x541   : > { %1138 = vadd.xlane.f32.xlu0 %v1132_v49  ;;  %1140 = vadd.xlane.f32.xlu1 %v1133_v13 }
 0x552   : > { %1188 = vperm.xlu1 %6113, %v6872_v56  }
 0x556   : > { %6114 = vset.pattern.permute.xlu1 %v6585_v14 }
 0x557   : > { %1204 = vperm.xlu1 %6114, %v6860_v54   ;;  %1184 = vperm.xlu0 %6112, %v6860_v54  }
 0x55b   : > { %1208 = vperm.xlu1 %6114, %v6872_v56   ;;  %6117 = vset.pattern.permute.xlu0 %v6581_v45 }
 0x55f   : > { %6115 = vset.pattern.permute.xlu1 %v6584_v58 }
 0x560   : > { %1176 = vperm.xlu1 %6115, %v6854_v53  }
 0x564   : > { %1180 = vperm.xlu1 %6115, %v6865_v55  }
 0x568   : > { %6116 = vset.pattern.permute.xlu1 %v6585_v14 }
 0x569   : > { %1196 = vperm.xlu1 %6116, %v6854_v53  }
 0x56d   : > { %1200 = vperm.xlu1 %6116, %v6865_v55  }
 0x5bc   : > { %v1127_v15 = vpop.xlane.xlu0 %1126 }
 0x5be   : > { %v1123_v16 = vpop.xlane.xlu1 %1122 }
 0x5c2   : > { %v1125_v17 = vpop.xlane.xlu0 %1124  ;;  %v1135_v54 = vpop.xlane.xlu1 %1134 }
 0x5c3   : > { %v1142_v18 = vadd.f32 %v1125_v17, %v1123_v16 }
 0x5c5   : > { %v1143_v56 = vadd.f32 %v1142_v18, %v1127_v15 }
 0x5c6   : > { %v1137_v28 = vpop.xlane.xlu0 %1136  ;;  %v1129_v20 = vpop.xlane.xlu1 %1128 }
 0x5c7   : > { %v1144_v21 = vadd.f32 %v1143_v56, %v1129_v20  ;;  %v1153_v51 = vadd.f32 %v1137_v28, %v1135_v54 }
 0x5c9   : > { %v1145_v22 = vrot.slane %v1144_v21, 4 }
 0x5ca   : > { %v1139_v23 = vpop.xlane.xlu0 %1138  ;;  %v1141_v8 = vpop.xlane.xlu1 %1140 }
 0x5cb   : > { %v1146_v24 = vadd.f32 %v1145_v22, %v1144_v21  ;;  %v1154_v26 = vadd.f32 %v1153_v51, %v1139_v23 }
 0x5cd   : > { %v1147_v31 = vrot.slane %v1146_v24, 2  ;;  %v1155_v33 = vadd.f32 %v1154_v26, %v1141_v8 }
 0x5ce   : > { %v1189_v53 = vpop.permute.xlu1 %1188 }
 0x5cf   : > { %v1148_v35 = vadd.f32 %v1147_v31, %v1146_v24  ;;  %v1156_v55 = vrot.slane %v1155_v33, 4 }
 0x5d1   : > { %v1149_v19 = vrot.slane %v1148_v35, 1  ;;  %v1157_v37 = vadd.f32 %v1156_v55, %v1155_v33 }
 0x5d2   : > { %v1205_v32 = vpop.permute.xlu1 %1204  ;;  %v1185_v4 = vpop.permute.xlu0 %1184 }
 0x5d3   : > { %v1150_v38 = vadd.f32 %v1149_v19, %v1148_v35  ;;  %v1158_v39 = vrot.slane %v1157_v37, 2 }
 0x5d5   : > { %v1159_v40 = vadd.f32 %v1158_v39, %v1157_v37  ;;  %v1152_v57 = vmul.f32 0.00024414063, %v1150_v38 }
 0x5d6   : > { %v1209_v41 = vpop.permute.xlu1 %1208 }
 0x5d7   : > { %v1160_v29 = vrot.slane %v1159_v40, 1  ;;  %v1163_v34 = vmul.f32 %v1152_v57, %v1152_v57  ;;  %v1168_v60 = vsub.f32 %v6938_v12, %v1152_v57  ;;  %v1165_v61 = vsub.f32 %v6929_v27, %v1152_v57 }
 0x5d8   : > { %v1166_v62 = vsub.f32 %v6933_v5, %v1152_v57  ;;  %v1167_v42 = vsub.f32 %v6927_v63, %v1152_v57 }
 0x5d9   : > { %v1161_v43 = vadd.f32 %v1160_v29, %v1159_v40 }
 0x5db   : > { %v1162_v44 = vmul.f32 0.00024414063, %v1161_v43  ;;  %v1177_v47 = vpop.permute.xlu1 %1176 }
 0x5dd   : > { %v1164_v46 = vsub.f32 %v1162_v44, %v1163_v34 }
 0x5df   : > { %v1169_v25 = vadd.f32 1e-05, %v1164_v46  ;;  %v1181_v30 = vpop.permute.xlu1 %1180 }
 0x5e1   : > { %6270 = vrsqrt.f32 %v1169_v25 }
 0x5e4   : > { %v1197_v59 = vpop.permute.xlu1 %1196 }
 0x5e8   : > { %v1201_v13 = vpop.permute.xlu1 %1200 }
 0x5ee   : > { %v6271_v3 = vpop.eup %6270 }
 0x5ef   : > { %v1174_v9 = vmul.f32 %v6271_v3, %v1168_v60  ;;  %v1171_v11 = vmul.f32 %v6271_v3, %v1165_v61  ;;  %v1172_v48 = vmul.f32 %v6271_v3, %v1166_v62  ;;  %v1173_v49 = vmul.f32 %v6271_v3, %v1167_v42 }
 0x5f1   : > { %v1194_v15 = vmul.f32 %v1189_v53, %v1174_v9  ;;  %v1191_v16 = vmul.f32 %v1177_v47, %v1171_v11  ;;  %v1192_v17 = vmul.f32 %v1181_v30, %v1172_v48  ;;  %v1193_v54 = vmul.f32 %v1185_v4, %v1173_v49  ;;  %v6152_v4 = vld [vmem:[%s8403_s4 + $0x10] sm:$0xff]   ;;  %v6153_v9 = vld [vmem:[%s8403_s4 + $0x18] sm:$0xff]  }
 0x5f3   : > { %v1214_v18 = vadd.f32 %v1209_v41, %v1194_v15  ;;  %v1211_v56 = vadd.f32 %v1197_v59, %v1191_v16  ;;  %v1213_v12 = vadd.f32 %v1205_v32, %v1193_v54  ;;  %v1212_v28 = vadd.f32 %v1201_v13, %v1192_v17 }
 0x5f5   : > { %v1218_v27 = vmax.f32 %v1214_v18, 0.0  ;;  %v1215_v20 = vmax.f32 %v1211_v56, 0.0  ;;  %v1217_v5 = vmax.f32 %v1213_v12, 0.0  ;;  %v1216_v21 = vmax.f32 %v1212_v28, 0.0 }
 0x5f7   : > { %v6964_v63 = vadd.f32 %v1218_v27, %v6720_v2  ;;  %v6967_v51 = vadd.f32 %v1215_v20, %v6724_v6  ;;  %v6970_v22 = vadd.f32 %v1217_v5, %v6718_v1  ;;  %v6973_v23 = vadd.f32 %v1216_v21, %v6726_v7  ;;  %v5208_v1 = vld [vmem:[%s8402_s3 + $0x4] sm:$0xf] }
 0x5f9   : > { %v1224_v8 = vpack.c.bf16 %v6964_v63, %v6970_v22  ;;  %v1223_v24 = vpack.c.bf16 %v6973_v23, %v6967_v51 }
 0x5fb   : > { %5452 = vst [vmem:[#allocation2 + $0x18] sm:$0xff] %v1224_v8   ;;  %5742 = vmatpush3.bf16.msra.mxu1 %v1224_v8  ;;  %5451 = vst [vmem:[#allocation2 + $0x10] sm:$0xff] %v1223_v24  }
 0x5fc   : > { %5743 = vmatprep.subr.bf16.mxu1 %v6579_v0 }
 0x5ff   : > { %5744 = vmatpush3.bf16.msra.mxu1 %v1223_v24 }
 0x600   : > { %5767 = vmatprep.subr.bf16.mxu1 %v6579_v0 }
 0x602   : > { %5746 = vmatmul.mubr.msk.bf16.vlgmr.msra.gmra.mxu1 %vm495_vm1, %v5208_v1 }
 0x603   : > { %5783 = vmatprep.mubr.msk.bf16.mxu1 %vm6580_vm0, %v6579_v0 }
 0x6c2   : > { %v1287_v2 = vpop.f32.mrf.mxu1 }
 0x6c3   : > { %v1293_v6 = vpack.c.bf16 %v1287_v2, %v1287_v2  ;;  %v1294_v7 = vmul.f32 %v6741_v10, %v1287_v2 }
 0x6c4   : > { %v5747_v26 = vpop.f32.mrf.mxu1 }
 0x6c5   : > { %v1295_v31 = vpack.c.bf16 %v1294_v7, %v1294_v7  ;;  %6056 = vmatprep.subr.msk.bf16.mxu0 %vm589_vm2, %v1293_v6  ;;  %v1337_v33 = vsel %vm589_vm2, %v1293_v6, 0 }
 0x6c6   : > { %v1290_v53 = vpop.f32.mrf.mxu1  ;;  %5750 = vmatpush3.bf16.msra.mxu0 %v1337_v33 }
 0x6c7   : > { %1296 = vxpose.xlu1.c.b16.start.end [1/1] (short) %v1295_v31, 128  ;;  %5787 = vmatprep.subr.bf16.mxu0 %v1224_v8 }
 0x6c8   : > { %v5748_v35 = vpop.f32.mrf.mxu1 }
 0x6cb   : > { %6118 = vset.pattern.permute.xlu1 %v6581_v45 }
 0x729   : > { %v1304_v55 = vpop.trf.xlu1 }
 0x72a   : > { %5751 = vmatprep.mubr.msk.bf16.mxu0 %vm564_vm3, %v1304_v55 }
 0x72d   : > { %v1305_v19 = vpop.trf.xlu1 }
 0x72e   : > { %5752 = vmatmul.mubr.msk.bf16.vlgmr.msra.gmra.mxu0 %vm564_vm3, %v1305_v19 }
 0x72f   : > { %5788 = vmatpush3.bf16.msra.mxu0 %v1224_v8 }
 0x730   : > { %5789 = vmatprep.subr.bf16.mxu0 %v1223_v24 }
 0x731   : > { %v1306_v10 = vpop.trf.xlu1 }
 0x732   : > { %5755 = vmatprep.mubr.msk.bf16.mxu0 %vm564_vm3, %v1306_v10 }
 0x733   : > { %5790 = vmatpush3.bf16.msra.mxu0 %v1223_v24 }
 0x735   : > { %v1307_v37 = vpop.trf.xlu1 }
 0x736   : > { %5756 = vmatmul.mubr.msk.bf16.gmra.mxu0 %vm564_vm3, %v1307_v37 }
 0x739   : > { %v1308_v32 = vpop.trf.xlu1 }
 0x73a   : > { %5759 = vmatprep.mubr.msk.bf16.mxu0 %vm564_vm3, %v1308_v32 }
 0x73d   : > { %v1309_v38 = vpop.trf.xlu1 }
 0x73e   : > { %5760 = vmatmul.mubr.msk.bf16.gmra.mxu0 %vm564_vm3, %v1309_v38 }
 0x741   : > { %v1310_v39 = vpop.trf.xlu1 }
 0x742   : > { %5763 = vmatprep.mubr.msk.bf16.mxu0 %vm564_vm3, %v1310_v39 }
 0x745   : > { %v1311_v40 = vpop.trf.xlu1 }
 0x746   : > { %5764 = vmatmul.mubr.msk.bf16.gmra.mxu0 %vm564_vm3, %v1311_v40 }
 0x747   : > { %5791 = vmatprep.mubr.msk.bf16.mxu0 %vm495_vm1, %v6152_v4 }
 0x74e   : > { %5792 = vmatmul.mubr.msk.bf16.vlgmr.msra.gmra.mxu0 %vm495_vm1, %v6153_v9 }
 0x7ee   : > { %v6999_v57 = vpop.f32.mrf.mxu0 }
 0x7f0   : > { %v7001_v29 = vpop.f32.mrf.mxu0 }
 0x7f2   : > { %v7003_v41 = vpop.f32.mrf.mxu0 }
 0x7f4   : > { %v7005_v43 = vpop.f32.mrf.mxu0 }
 0x7f6   : > { %v7007_v34 = vpop.f32.mrf.mxu0 }
 0x7f8   : > { %v7009_v44 = vpop.f32.mrf.mxu0 }
 0x7fa   : > { %v7011_v46 = vpop.f32.mrf.mxu0 }
 0x7fc   : > { %v7013_v47 = vpop.f32.mrf.mxu0 }
 0x7fe   : > { %v5761_v25 = vpop.f32.mrf.mxu0 }
 0x800   : > { %v1405_v30 = vpop.f32.mrf.mxu0 }
 0x802   : > { %v5762_v59 = vpop.f32.mrf.mxu0 }
 0x804   : > { %v7015_v60 = vpop.f32.mrf.mxu0 }
 0x806   : > { %v5765_v61 = vpop.f32.mrf.mxu0 }
 0x807   : > { %1464 = vmax.xlane.f32.xlu0 %v5765_v61 }
 0x808   : > { %v1421_v62 = vpop.f32.mrf.mxu0 }
 0x809   : > { %1460 = vmax.xlane.f32.xlu1 %v1421_v62 }
 0x80a   : > { %v5766_v42 = vpop.f32.mrf.mxu0 }
 0x80b   : > { %1456 = vmax.xlane.f32.xlu0 %v5761_v25 }
 0x80c   : > { %v1424_v3 = vpop.f32.mrf.mxu0 }
 0x80d   : > { %1442 = vmax.xlane.f32.xlu1 %v7003_v41 }
 0x80f   : > { %1458 = vmax.xlane.f32.xlu0 %v5762_v59 }
 0x811   : > { %1438 = vmax.xlane.f32.xlu1 %v7005_v43 }
 0x813   : > { %1452 = vmax.xlane.f32.xlu0 %v1405_v30 }
 0x817   : > { %1454 = vmax.xlane.f32.xlu0 %v7015_v60 }
 0x81b   : > { %1466 = vmax.xlane.f32.xlu0 %v5766_v42 }
 0x81f   : > { %1462 = vmax.xlane.f32.xlu0 %v1424_v3 }
 0x823   : > { %1448 = vmax.xlane.f32.xlu0 %v7007_v34 }
 0x827   : > { %1450 = vmax.xlane.f32.xlu0 %v7011_v46 }
 0x82b   : > { %1444 = vmax.xlane.f32.xlu0 %v7009_v44 }
 0x82f   : > { %1446 = vmax.xlane.f32.xlu0 %v7013_v47 }
 0x833   : > { %1440 = vmax.xlane.f32.xlu0 %v6999_v57 }
 0x837   : > { %1436 = vmax.xlane.f32.xlu0 %v7001_v29 }
 0x890   : > { %v1465_v11 = vpop.xlane.xlu0 %1464 }
 0x891   : > { %v1482_v48 = vsub.f32 %v5765_v61, %v1465_v11 }
 0x892   : > { %v1461_v49 = vpop.xlane.xlu1 %1460 }
 0x893   : > { %v1512_v13 = vmul.f32 1.442695, %v1482_v48  ;;  %v1480_v15 = vsub.f32 %v1421_v62, %v1461_v49 }
 0x894   : > { %v1457_v16 = vpop.xlane.xlu0 %1456 }
 0x895   : > { %6272 = vpow2.f32 %v1512_v13  ;;  %v1508_v17 = vmul.f32 1.442695, %v1480_v15  ;;  %v1478_v54 = vsub.f32 %v5761_v25, %v1457_v16 }
 0x896   : > { %v1443_v39 = vpop.xlane.xlu1 %1442 }
 0x897   : > { %6274 = vpow2.f32 %v1508_v17  ;;  %v1504_v56 = vmul.f32 1.442695, %v1478_v54 }
 0x898   : > { %v1459_v18 = vpop.xlane.xlu0 %1458 }
 0x899   : > { %6276 = vpow2.f32 %v1504_v56  ;;  %v1479_v2 = vsub.f32 %v5762_v59, %v1459_v18 }
 0x89a   : > { %v1439_v62 = vpop.xlane.xlu1 %1438 }
 0x89b   : > { %v1506_v33 = vmul.f32 1.442695, %v1479_v2 }
 0x89c   : > { %v1453_v12 = vpop.xlane.xlu0 %1452 }
 0x89d   : > { %v1476_v28 = vsub.f32 %v1405_v30, %v1453_v12 }
 0x89f   : > { %v1500_v27 = vmul.f32 1.442695, %v1476_v28  ;;  %v7094_v28 = vld [vmem:[%s8405_s6 + $0x28] sm:$0xff] }
 0x8a0   : > { %v1455_v20 = vpop.xlane.xlu0 %1454 }
 0x8a1   : > { %6278 = vpow2.f32 %v1500_v27  ;;  %v1477_v35 = vsub.f32 %v7015_v60, %v1455_v20  ;;  %v1471_v60 = vsub.f32 %v7003_v41, %v1443_v39  ;;  %v7100_v27 = vld [vmem:[%s8405_s6 + $0x30] sm:$0xff]  ;;  %v7105_v20 = vld [vmem:[%s8405_s6 + $0x20] sm:$0xff] }
 0x8a2   : > { %v7034_v5 = vpop.eup %6272 }
 0x8a3   : > { %1544 = vadd.xlane.f32.xlu0 %v7034_v5  ;;  %v1502_v32 = vmul.f32 1.442695, %v1477_v35  ;;  %v1490_v4 = vmul.f32 1.442695, %v1471_v60 }
 0x8a4   : > { %v1467_v21 = vpop.xlane.xlu0 %1466  ;;  %v7037_v24 = vpop.eup %6274 }
 0x8a5   : > { %v1483_v8 = vsub.f32 %v5766_v42, %v1467_v21  ;;  %v7111_v21 = vld [vmem:[%s8405_s6 + $0x38] sm:$0xff] }
 0x8a6   : > { %v7040_v26 = vpop.eup %6276 }
 0x8a7   : > { %v1514_v1 = vmul.f32 1.442695, %v1483_v8  ;;  %1540 = vadd.xlane.f32.xlu0 %v7037_v24 }
 0x8a8   : > { %v1463_v6 = vpop.xlane.xlu0 %1462 }
 0x8a9   : > { %6280 = vpow2.f32 %v1514_v1  ;;  %v1481_v7 = vsub.f32 %v1424_v3, %v1463_v6 }
 0x8ab   : > { %v1510_v31 = vmul.f32 1.442695, %v1481_v7  ;;  %1536 = vadd.xlane.f32.xlu0 %v7040_v26 }
 0x8ac   : > { %v1449_v53 = vpop.xlane.xlu0 %1448 }
 0x8ad   : > { %6282 = vpow2.f32 %v1510_v31  ;;  %v1474_v55 = vsub.f32 %v7007_v34, %v1449_v53 }
 0x8ae   : > { %v7045_v19 = vpop.eup %6278  ;;  %6284 = vpow2.f32 %v1506_v33 }
 0x8af   : > { %v1496_v10 = vmul.f32 1.442695, %v1474_v55  ;;  %1532 = vadd.xlane.f32.xlu0 %v7045_v19 }
 0x8b0   : > { %v1451_v37 = vpop.xlane.xlu0 %1450 }
 0x8b1   : > { %6286 = vpow2.f32 %v1496_v10  ;;  %v1475_v38 = vsub.f32 %v7011_v46, %v1451_v37 }
 0x8b2   : > { %6288 = vpow2.f32 %v1502_v32 }
 0x8b3   : > { %v1498_v40 = vmul.f32 1.442695, %v1475_v38 }
 0x8b4   : > { %v1445_v25 = vpop.xlane.xlu0 %1444 }
 0x8b5   : > { %v1472_v30 = vsub.f32 %v7009_v44, %v1445_v25  ;;  %6290 = vpow2.f32 %v1498_v40  ;;  %v1469_v44 = vsub.f32 %v7005_v43, %v1439_v62 }
 0x8b6   : > { %v7050_v59 = vpop.eup %6280 }
 0x8b7   : > { %v1492_v34 = vmul.f32 1.442695, %v1472_v30  ;;  %1546 = vadd.xlane.f32.xlu1 %v7050_v59 }
 0x8b8   : > { %v1447_v61 = vpop.xlane.xlu0 %1446 }
 0x8b9   : > { %6292 = vpow2.f32 %v1492_v34  ;;  %v1473_v42 = vsub.f32 %v7013_v47, %v1447_v61  ;;  %v1486_v47 = vmul.f32 1.442695, %v1469_v44 }
 0x8ba   : > { %v7055_v46 = vpop.eup %6282 }
 0x8bb   : > { %v1494_v3 = vmul.f32 1.442695, %v1473_v42  ;;  %1542 = vadd.xlane.f32.xlu1 %v7055_v46  ;;  %v7059_v11 = vpop.eup %6284 }
 0x8bc   : > { %v1441_v9 = vpop.xlane.xlu0 %1440 }
 0x8bd   : > { %6294 = vpow2.f32 %v1494_v3  ;;  %v1470_v41 = vsub.f32 %v6999_v57, %v1441_v9 }
 0x8be   : > { %v7062_v48 = vpop.eup %6286  ;;  %6296 = vpow2.f32 %v1490_v4 }
 0x8bf   : > { %v1488_v49 = vmul.f32 1.442695, %v1470_v41  ;;  %1538 = vadd.xlane.f32.xlu1 %v7059_v11  ;;  %1528 = vadd.xlane.f32.xlu0 %v7062_v48  ;;  %v7067_v43 = vpop.eup %6288 }
 0x8c0   : > { %v1437_v13 = vpop.xlane.xlu0 %1436 }
 0x8c1   : > { %6298 = vpow2.f32 %v1488_v49  ;;  %v1468_v15 = vsub.f32 %v7001_v29, %v1437_v13 }
 0x8c2   : > { %6300 = vpow2.f32 %v1486_v47  ;;  %v7070_v57 = vpop.eup %6290 }
 0x8c3   : > { %v1484_v16 = vmul.f32 1.442695, %v1468_v15  ;;  %1534 = vadd.xlane.f32.xlu1 %v7067_v43 }
 0x8c5   : > { %6302 = vpow2.f32 %v1484_v16 }
 0x8c6   : > { %v7072_v17 = vpop.eup %6292 }
 0x8c7   : > { %1530 = vadd.xlane.f32.xlu1 %v7070_v57  ;;  %1524 = vadd.xlane.f32.xlu0 %v7072_v17 }
 0x8ca   : > { %v7076_v54 = vpop.eup %6294 }
 0x8cb   : > { %1526 = vadd.xlane.f32.xlu1 %v7076_v54  ;;  %v7079_v29 = vpop.eup %6296 }
 0x8ce   : > { %v7081_v18 = vpop.eup %6298 }
 0x8cf   : > { %1522 = vadd.xlane.f32.xlu1 %v7079_v29  ;;  %1520 = vadd.xlane.f32.xlu0 %v7081_v18  ;;  %v7085_v56 = vpop.eup %6300 }
 0x8d2   : > { %v7087_v12 = vpop.eup %6302 }
 0x8d3   : > { %1518 = vadd.xlane.f32.xlu1 %v7085_v56  ;;  %1516 = vadd.xlane.f32.xlu0 %v7087_v12 }
 0x8e4   : > { %1641 = vperm.xlu1 %6118, %v7094_v28  }
 0x8e8   : > { %1646 = vperm.xlu1 %6118, %v7100_v27  }
 0x8e9   : > { %1636 = vperm.xlu0 %6117, %v7105_v20  }
 0x8ec   : > { %1651 = vperm.xlu1 %6118, %v7111_v21  }
 0x8ed   : > { %6121 = vset.pattern.permute.xlu0 %v6584_v58 }
 0x8f0   : > { %6119 = vset.pattern.permute.xlu1 %v6583_v52 }
 0x8f1   : > { %1790 = vperm.xlu1 %6119, %v7105_v20  }
 0x8f5   : > { %1794 = vperm.xlu1 %6119, %v7094_v28  }
 0x8f9   : > { %1798 = vperm.xlu1 %6119, %v7100_v27  }
 0x8fd   : > { %1802 = vperm.xlu1 %6119, %v7111_v21  }
 0x901   : > { %6120 = vset.pattern.permute.xlu1 %v6584_v58 }
 0x92c   : > { %v1545_v8 = vpop.xlane.xlu0 %1544 }
 0x92d   : > { %6304 = vrcp.f32 %v1545_v8 }
 0x930   : > { %v1541_v1 = vpop.xlane.xlu0 %1540 }
 0x934   : > { %v1537_v6 = vpop.xlane.xlu0 %1536 }
 0x938   : > { %v1533_v31 = vpop.xlane.xlu0 %1532 }
 0x93a   : > { %v6305_v53 = vpop.eup %6304 }
 0x93b   : > { %v1578_v37 = vmul.f32 %v6305_v53, %v7034_v5 }
 0x940   : > { %v1547_v2 = vpop.xlane.xlu1 %1546 }
 0x941   : > { %6306 = vrcp.f32 %v1547_v2 }
 0x942   : > { %6308 = vrcp.f32 %v1541_v1 }
 0x944   : > { %v1543_v7 = vpop.xlane.xlu1 %1542 }
 0x945   : > { %6310 = vrcp.f32 %v1543_v7 }
 0x946   : > { %6312 = vrcp.f32 %v1537_v6 }
 0x948   : > { %v1539_v33 = vpop.xlane.xlu1 %1538  ;;  %v1529_v35 = vpop.xlane.xlu0 %1528 }
 0x949   : > { %6314 = vrcp.f32 %v1539_v33 }
 0x94a   : > { %6316 = vrcp.f32 %v1533_v31 }
 0x94c   : > { %v1535_v55 = vpop.xlane.xlu1 %1534 }
 0x94d   : > { %6318 = vrcp.f32 %v1535_v55 }
 0x94e   : > { %v6307_v10 = vpop.eup %6306  ;;  %6320 = vrcp.f32 %v1529_v35 }
 0x94f   : > { %v1579_v32 = vmul.f32 %v6307_v10, %v7050_v59  ;;  %v6309_v38 = vpop.eup %6308 }
 0x950   : > { %v1531_v39 = vpop.xlane.xlu1 %1530  ;;  %v1525_v40 = vpop.xlane.xlu0 %1524  ;;  %v1576_v34 = vmul.f32 %v6309_v38, %v7037_v24 }
 0x951   : > { %6322 = vrcp.f32 %v1531_v39  ;;  %v7124_v25 = vpack.c.bf16 %v1579_v32, %v1578_v37 }
 0x952   : > { %v6311_v30 = vpop.eup %6310  ;;  %6324 = vrcp.f32 %v1525_v40 }
 0x953   : > { %5768 = vmatpush3.bf16.msra.mxu1 %v7124_v25  ;;  %v1577_v60 = vmul.f32 %v6311_v30, %v7055_v46  ;;  %v6313_v61 = vpop.eup %6312 }
 0x954   : > { %v1527_v62 = vpop.xlane.xlu1 %1526  ;;  %5769 = vmatprep.subr.bf16.mxu1 %v6579_v0  ;;  %v1574_v42 = vmul.f32 %v6313_v61, %v7040_v26 }
 0x955   : > { %6326 = vrcp.f32 %v1527_v62  ;;  %v7130_v5 = vpack.c.bf16 %v1577_v60, %v1576_v34  ;;  %v6154_v62 = vld [vmem:[%s8404_s5 + $0x10] sm:$0xff]  }
 0x956   : > { %v6315_v59 = vpop.eup %6314  ;;  %5819 = vmatprep.mubr.msk.bf16.mxu0 %vm495_vm1, %v6154_v62 }
 0x957   : > { %5770 = vmatpush3.bf16.msra.mxu1 %v7130_v5  ;;  %v1575_v3 = vmul.f32 %v6315_v59, %v7059_v11  ;;  %v6317_v4 = vpop.eup %6316  ;;  %v5793_v11 = vpop.f32.mrf.mxu0 }
 0x958   : > { %v1523_v44 = vpop.xlane.xlu1 %1522  ;;  %v1521_v9 = vpop.xlane.xlu0 %1520  ;;  %5771 = vmatprep.subr.bf16.mxu1 %v6579_v0  ;;  %v1572_v41 = vmul.f32 %v6317_v4, %v7045_v19 }
 0x959   : > { %6328 = vrcp.f32 %v1523_v44  ;;  %v1585_v24 = vpack.c.bf16 %v1575_v3, %v1574_v42 }
 0x95a   : > { %v6319_v46 = vpop.eup %6318  ;;  %6330 = vrcp.f32 %v1521_v9 }
 0x95b   : > { %5772 = vmatpush3.bf16.msra.mxu1 %v1585_v24  ;;  %v1573_v49 = vmul.f32 %v6319_v46, %v7067_v43  ;;  %v6321_v47 = vpop.eup %6320  ;;  %v1704_v43 = vpop.f32.mrf.mxu0 }
 0x95c   : > { %v1519_v13 = vpop.xlane.xlu1 %1518  ;;  %v1517_v15 = vpop.xlane.xlu0 %1516  ;;  %5773 = vmatprep.subr.bf16.mxu1 %v6579_v0  ;;  %v1570_v8 = vmul.f32 %v6321_v47, %v7062_v48 }
 0x95d   : > { %6332 = vrcp.f32 %v1519_v13  ;;  %v1584_v26 = vpack.c.bf16 %v1573_v49, %v1572_v41  ;;  %v5794_v53 = vpop.f32.mrf.mxu0 }
 0x95e   : > { %v6323_v16 = vpop.eup %6322  ;;  %6334 = vrcp.f32 %v1517_v15 }
 0x95f   : > { %5774 = vmatpush3.bf16.msra.mxu1 %v1584_v26  ;;  %v1571_v1 = vmul.f32 %v6323_v16, %v7070_v57  ;;  %v6325_v2 = vpop.eup %6324  ;;  %v1707_v37 = vpop.f32.mrf.mxu0 }
 0x960   : > { %5775 = vmatprep.subr.bf16.mxu1 %v6579_v0  ;;  %v1568_v7 = vmul.f32 %v6325_v2, %v7072_v17  ;;  %v1642_v39 = vpop.permute.xlu1 %1641 }
 0x961   : > { %v1583_v19 = vpack.c.bf16 %v1571_v1, %v1570_v8  ;;  %v1708_v34 = vadd.f32 %v1707_v37, %v1642_v39 }
 0x962   : > { %v6327_v6 = vpop.eup %6326 }
 0x963   : > { %5776 = vmatpush3.bf16.msra.mxu1 %v1583_v19  ;;  %v1569_v31 = vmul.f32 %v6327_v6, %v7076_v54 }
 0x964   : > { %5777 = vmatprep.subr.bf16.mxu1 %v6579_v0  ;;  %v1637_v10 = vpop.permute.xlu0 %1636 }
 0x965   : > { %v1582_v33 = vpack.c.bf16 %v1569_v31, %v1568_v7  ;;  %v1705_v30 = vadd.f32 %v1704_v43, %v1637_v10  ;;  %v6155_v43 = vld [vmem:[%s8404_s5 + $0x18] sm:$0xff]  }
 0x966   : > { %v6329_v35 = vpop.eup %6328 }
 0x967   : > { %v6331_v55 = vpop.eup %6330  ;;  %5778 = vmatpush3.bf16.msra.mxu1 %v1582_v33  ;;  %v1567_v48 = vmul.f32 %v6329_v35, %v7079_v29  ;;  %v1719_v60 = vpack.c.bf16 %v1708_v34, %v1705_v30 }
 0x968   : > { %5779 = vmatprep.subr.bf16.mxu1 %v6579_v0  ;;  %v1566_v57 = vmul.f32 %v6331_v55, %v7081_v18  ;;  %v1647_v18 = vpop.permute.xlu1 %1646 }
 0x96a   : > { %v6333_v32 = vpop.eup %6332  ;;  %v1581_v38 = vpack.c.bf16 %v1567_v48, %v1566_v57 }
 0x96b   : > { %v6335_v17 = vpop.eup %6334  ;;  %v1565_v54 = vmul.f32 %v6333_v32, %v7085_v56 }
 0x96c   : > { %5780 = vmatpush3.bf16.msra.mxu1 %v1581_v38  ;;  %v1564_v40 = vmul.f32 %v6335_v17, %v7087_v12  ;;  %v1652_v56 = vpop.permute.xlu1 %1651  ;;  %v1713_v12 = vadd.f32 %v5793_v11, %v1647_v18 }
 0x96d   : > { %5781 = vmatprep.subr.bf16.mxu1 %v6579_v0  ;;  %v1716_v61 = vadd.f32 %v5794_v53, %v1652_v56 }
 0x96e   : > { %v1580_v29 = vpack.c.bf16 %v1565_v54, %v1564_v40 }
 0x970   : > { %5782 = vmatpush3.bf16.msra.mxu1 %v1580_v29  ;;  %v1791_v6 = vpop.permute.xlu1 %1790 }
 0x971   : > { %5795 = vmatprep.subr.bf16.mxu1 %v7124_v25 }
 0x973   : > { %5784 = vmatmul.mubr.bf16.vlgmr.msra.gmra.mxu1 %v6582_v50 }
 0x974   : > { %5796 = vmatpush3.bf16.msra.mxu1 %v7124_v25  ;;  %5811 = vmatprep.mubr.bf16.mxu1 %v1719_v60  ;;  %v1720_v25 = vpack.c.bf16 %v1716_v61, %v1713_v12  ;;  %v1795_v7 = vpop.permute.xlu1 %1794 }
 0x975   : > { %5797 = vmatprep.subr.bf16.mxu1 %v7130_v5 }
 0x978   : > { %5798 = vmatpush3.bf16.msra.mxu1 %v7130_v5  ;;  %v1799_v31 = vpop.permute.xlu1 %1798 }
 0x979   : > { %5799 = vmatprep.subr.bf16.mxu1 %v1585_v24 }
 0x97c   : > { %5800 = vmatpush3.bf16.msra.mxu1 %v1585_v24 }
 0x97d   : > { %5801 = vmatprep.subr.bf16.mxu1 %v1584_v26 }
 0x980   : > { %5802 = vmatpush3.bf16.msra.mxu1 %v1584_v26 }
 0x981   : > { %5803 = vmatprep.subr.bf16.mxu1 %v1583_v19 }
 0x984   : > { %5804 = vmatpush3.bf16.msra.mxu1 %v1583_v19 }
 0x985   : > { %5805 = vmatprep.subr.bf16.mxu1 %v1582_v33 }
 0x988   : > { %5806 = vmatpush3.bf16.msra.mxu1 %v1582_v33 }
 0x989   : > { %5807 = vmatprep.subr.bf16.mxu1 %v1581_v38 }
 0x98c   : > { %5808 = vmatpush3.bf16.msra.mxu1 %v1581_v38  ;;  %v1803_v38 = vpop.permute.xlu1 %1802 }
 0x98d   : > { %5809 = vmatprep.subr.bf16.mxu1 %v1580_v29 }
 0x990   : > { %5810 = vmatpush3.bf16.msra.mxu1 %v1580_v29 }
 0x993   : > { %5812 = vmatmul.mubr.bf16.vlgmr.msra.gmra.mxu1 %v1720_v25 }
 0xa33   : > { %v1622_v5 = vpop.f32.mrf.mxu1 }
 0xa34   : > { %v1623_v4 = vadd.f32 1e-09, %v1622_v5 }
 0xa35   : > { %v5785_v59 = vpop.f32.mrf.mxu1 }
 0xa36   : > { %6336 = vrcp.f32 %v1623_v4 }
 0xa37   : > { %v1625_v42 = vpop.f32.mrf.mxu1 }
 0xa39   : > { %v5786_v3 = vpop.f32.mrf.mxu1 }
 0xa43   : > { %v6337_v44 = vpop.eup %6336 }
 0xa44   : > { %v1773_v24 = vrot.slane %v6337_v44, %v6914_v36 }
 0xa53   : > { %v5813_v9 = vpop.f32.mrf.mxu1 }
 0xa54   : > { %v1776_v41 = vmul.f32 %v5813_v9, %v1773_v24 }
 0xa55   : > { %v1755_v46 = vpop.f32.mrf.mxu1 }
 0xa56   : > { %v1774_v47 = vmul.f32 %v1773_v24, %v1755_v46  ;;  %v1785_v26 = vsub.f32 %v6970_v22, %v1776_v41 }
 0xa57   : > { %v5814_v49 = vpop.f32.mrf.mxu1 }
 0xa58   : > { %v1777_v13 = vmul.f32 %v5814_v49, %v1773_v24  ;;  %v1783_v8 = vsub.f32 %v6967_v51, %v1774_v47 }
 0xa59   : > { %v1758_v15 = vpop.f32.mrf.mxu1 }
 0xa5a   : > { %v1786_v11 = vsub.f32 %v6964_v63, %v1777_v13  ;;  %v1775_v16 = vmul.f32 %v1773_v24, %v1758_v15 }
 0xa5c   : > { %v1784_v1 = vsub.f32 %v6973_v23, %v1775_v16  ;;  %v1788_v2 = vpack.c.bf16 %v1786_v11, %v1785_v26 }
 0xa5e   : > { %5815 = vmatprep.subr.bf16.mxu0 %v1788_v2  ;;  %v1787_v19 = vpack.c.bf16 %v1784_v1, %v1783_v8 }
 0xa5f   : > { %5816 = vmatpush3.bf16.msra.mxu0 %v1788_v2 }
 0xa60   : > { %5817 = vmatprep.subr.bf16.mxu0 %v1787_v19 }
 0xa63   : > { %5818 = vmatpush3.bf16.msra.mxu0 %v1787_v19 }
 0xa64   : > { %5823 = vmatprep.subr.bf16.mxu0 %v6579_v0 }
 0xa66   : > { %5820 = vmatmul.mubr.msk.bf16.vlgmr.msra.gmra.mxu0 %vm495_vm1, %v6155_v43 }
 0xa67   : > { %5827 = vmatprep.mubr.msk.bf16.mxu0 %vm6580_vm0, %v6579_v0 }
 0xb26   : > { %v5821_v33 = vpop.f32.mrf.mxu0 }
 0xb27   : > { %v7172_v53 = vadd.f32 %v5821_v33, %v1799_v31 }
 0xb28   : > { %v1855_v35 = vpop.f32.mrf.mxu0 }
 0xb29   : > { %1874 = vadd.xlane.f32.xlu0 %v7172_v53  ;;  %v1880_v55 = vmul.f32 %v7172_v53, %v7172_v53  ;;  %v7177_v57 = vadd.f32 %v1855_v35, %v1791_v6 }
 0xb2a   : > { %v5822_v48 = vpop.f32.mrf.mxu0 }
 0xb2b   : > { %1886 = vadd.xlane.f32.xlu1 %v1880_v55  ;;  %v1878_v32 = vmul.f32 %v7177_v57, %v7177_v57  ;;  %v7185_v17 = vadd.f32 %v5822_v48, %v1803_v38 }
 0xb2c   : > { %v1858_v10 = vpop.f32.mrf.mxu0 }
 0xb2d   : > { %v7179_v37 = vadd.f32 %v1858_v10, %v1795_v7  ;;  %1870 = vadd.xlane.f32.xlu0 %v7177_v57  ;;  %v1881_v54 = vmul.f32 %v7185_v17, %v7185_v17 }
 0xb2f   : > { %1872 = vadd.xlane.f32.xlu1 %v7179_v37  ;;  %v1879_v39 = vmul.f32 %v7179_v37, %v7179_v37 }
 0xb31   : > { %1882 = vadd.xlane.f32.xlu0 %v1878_v32 }
 0xb35   : > { %1876 = vadd.xlane.f32.xlu0 %v7185_v17 }
 0xb39   : > { %1888 = vadd.xlane.f32.xlu0 %v1881_v54 }
 0xb40   : > { %1931 = vperm.xlu1 %6120, %v7100_v27  }
 0xb44   : > { %6122 = vset.pattern.permute.xlu1 %v6585_v14 }
 0xb4f   : > { %1935 = vperm.xlu0 %6121, %v7111_v21  }
 0xb53   : > { %6126 = vset.pattern.permute.xlu0 %v6581_v45 }
 0xb64   : > { %1884 = vadd.xlane.f32.xlu1 %v1879_v39 }
 0xb75   : > { %1951 = vperm.xlu1 %6122, %v7100_v27  }
 0xb79   : > { %1955 = vperm.xlu1 %6122, %v7111_v21  }
 0xb7d   : > { %6123 = vset.pattern.permute.xlu1 %v6584_v58 }
 0xb7e   : > { %1923 = vperm.xlu1 %6123, %v7105_v20  }
 0xb82   : > { %1927 = vperm.xlu1 %6123, %v7094_v28  }
 0xb86   : > { %6124 = vset.pattern.permute.xlu1 %v6585_v14 }
 0xb87   : > { %1943 = vperm.xlu1 %6124, %v7105_v20  }
 0xb8b   : > { %1947 = vperm.xlu1 %6124, %v7094_v28  }
 0xbb2   : > { %v1875_v40 = vpop.xlane.xlu0 %1874 }
 0xbb4   : > { %v1887_v30 = vpop.xlane.xlu1 %1886 }
 0xbb6   : > { %v1871_v34 = vpop.xlane.xlu0 %1870 }
 0xbb8   : > { %v1873_v29 = vpop.xlane.xlu1 %1872 }
 0xbb9   : > { %v1890_v27 = vadd.f32 %v1873_v29, %v1871_v34 }
 0xbba   : > { %v1883_v60 = vpop.xlane.xlu0 %1882 }
 0xbbb   : > { %v1891_v21 = vadd.f32 %v1890_v27, %v1875_v40 }
 0xbbc   : > { %v1932_v25 = vpop.permute.xlu1 %1931 }
 0xbbe   : > { %v1877_v18 = vpop.xlane.xlu0 %1876 }
 0xbbf   : > { %v1892_v56 = vadd.f32 %v1891_v21, %v1877_v18 }
 0xbc1   : > { %v1893_v12 = vrot.slane %v1892_v56, 4 }
 0xbc2   : > { %v1889_v20 = vpop.xlane.xlu0 %1888 }
 0xbc3   : > { %v1894_v61 = vadd.f32 %v1893_v12, %v1892_v56 }
 0xbc5   : > { %v1895_v62 = vrot.slane %v1894_v61, 2 }
 0xbc7   : > { %v1896_v42 = vadd.f32 %v1895_v62, %v1894_v61 }
 0xbc9   : > { %v1897_v28 = vrot.slane %v1896_v42, 1 }
 0xbca   : > { %v1936_v55 = vpop.permute.xlu0 %1935 }
 0xbcb   : > { %v1898_v46 = vadd.f32 %v1897_v28, %v1896_v42 }
 0xbcd   : > { %v1899_v47 = vmul.f32 0.00024414063, %v1898_v46 }
 0xbcf   : > { %v1910_v16 = vmul.f32 %v1899_v47, %v1899_v47  ;;  %v1914_v6 = vsub.f32 %v7172_v53, %v1899_v47  ;;  %v1912_v7 = vsub.f32 %v7177_v57, %v1899_v47  ;;  %v1913_v31 = vsub.f32 %v7179_v37, %v1899_v47 }
 0xbd0   : > { %v1915_v33 = vsub.f32 %v7185_v17, %v1899_v47 }
 0xbed   : > { %v1885_v5 = vpop.xlane.xlu1 %1884 }
 0xbee   : > { %v1900_v59 = vadd.f32 %v1885_v5, %v1883_v60 }
 0xbf0   : > { %v1901_v3 = vadd.f32 %v1900_v59, %v1887_v30 }
 0xbf1   : > { %v1952_v24 = vpop.permute.xlu1 %1951 }
 0xbf2   : > { %v1902_v4 = vadd.f32 %v1901_v3, %v1889_v20 }
 0xbf4   : > { %v1903_v44 = vrot.slane %v1902_v4, 4 }
 0xbf5   : > { %v1956_v15 = vpop.permute.xlu1 %1955 }
 0xbf6   : > { %v1904_v9 = vadd.f32 %v1903_v44, %v1902_v4 }
 0xbf8   : > { %v1905_v41 = vrot.slane %v1904_v9, 2 }
 0xbf9   : > { %v1924_v1 = vpop.permute.xlu1 %1923 }
 0xbfa   : > { %v1906_v49 = vadd.f32 %v1905_v41, %v1904_v9 }
 0xbfc   : > { %v1907_v13 = vrot.slane %v1906_v49, 1 }
 0xbfd   : > { %v1928_v19 = vpop.permute.xlu1 %1927 }
 0xbfe   : > { %v1908_v26 = vadd.f32 %v1907_v13, %v1906_v49 }
 0xc00   : > { %v1909_v11 = vmul.f32 0.00024414063, %v1908_v26 }
 0xc02   : > { %v1911_v8 = vsub.f32 %v1909_v11, %v1910_v16  ;;  %v1944_v43 = vpop.permute.xlu1 %1943 }
 0xc04   : > { %v1916_v2 = vadd.f32 1e-05, %v1911_v8 }
 0xc06   : > { %6338 = vrsqrt.f32 %v1916_v2  ;;  %v1948_v54 = vpop.permute.xlu1 %1947 }
 0xc13   : > { %v6339_v35 = vpop.eup %6338 }
 0xc14   : > { %v1920_v48 = vmul.f32 %v6339_v35, %v1914_v6  ;;  %v1918_v10 = vmul.f32 %v6339_v35, %v1912_v7  ;;  %v1919_v32 = vmul.f32 %v6339_v35, %v1913_v31  ;;  %v1921_v38 = vmul.f32 %v6339_v35, %v1915_v33 }
 0xc16   : > { %v1940_v39 = vmul.f32 %v1932_v25, %v1920_v48  ;;  %v1938_v40 = vmul.f32 %v1924_v1, %v1918_v10  ;;  %v1939_v30 = vmul.f32 %v1928_v19, %v1919_v32  ;;  %v1941_v34 = vmul.f32 %v1936_v55, %v1921_v38  ;;  %v6156_v48 = vld [vmem:[%s8403_s4 + $0x20] sm:$0xff]   ;;  %v6157_v10 = vld [vmem:[%s8403_s4 + $0x28] sm:$0xff]  }
 0xc17   : > { %5873 = vmatprep.mubr.msk.bf16.mxu1 %vm495_vm1, %v6156_v48 }
 0xc18   : > { %v1960_v29 = vadd.f32 %v1952_v24, %v1940_v39  ;;  %v1958_v60 = vadd.f32 %v1944_v43, %v1938_v40  ;;  %v1961_v53 = vadd.f32 %v1956_v15, %v1941_v34  ;;  %v1959_v27 = vadd.f32 %v1948_v54, %v1939_v30 }
 0xc1a   : > { %v1964_v57 = vmax.f32 %v1960_v29, 0.0  ;;  %v1962_v18 = vmax.f32 %v1958_v60, 0.0  ;;  %v1965_v37 = vmax.f32 %v1961_v53, 0.0  ;;  %v1963_v21 = vmax.f32 %v1959_v27, 0.0 }
 0xc1c   : > { %v7209_v17 = vadd.f32 %v1964_v57, %v6970_v22  ;;  %v7212_v56 = vadd.f32 %v1962_v18, %v6967_v51  ;;  %v7215_v12 = vadd.f32 %v1965_v37, %v6964_v63  ;;  %v7218_v61 = vadd.f32 %v1963_v21, %v6973_v23  ;;  %v5242_v63 = vld [vmem:[%s8402_s3 + $0x8] sm:$0xf]  ;;  %v7230_v23 = vld [vmem:[%s6738_s22] ss:$0 sm:$0xff]  ;;  %s6517_s22 = scalar_lea.vmem %s8353_s14, 2560 }
 0xc1d   : > { %p6518_p11 = scmp.ne.s32.totalorder %s8353_s14, %s6517_s22  ;;  %p6525_p1 = scmp.lt.s32.totalorder %s6523_s30, %s6517_s22 }
 0xc1e   : > { %v1971_v25 = vpack.c.bf16 %v7215_v12, %v7209_v17  ;;  %v1970_v62 = vpack.c.bf16 %v7218_v61, %v7212_v56 }
 0xc1f   : > { %p6519_p12 = pnand %p6518_p11, %p6697_p5  ;;  %p6526_p2 = por %p6525_p1, %p6524_p0 }
 0xc20   : > { %5454 = vst [vmem:[#allocation2 + $0x28] sm:$0xff] %v1971_v25   ;;  %5824 = vmatpush3.bf16.msra.mxu0 %v1971_v25  ;;  %5869 = vmatprep.subr.bf16.mxu1 %v1971_v25  ;;  %5453 = vst [vmem:[#allocation2 + $0x20] sm:$0xff] %v1970_v62  }
 0xc21   : > { %5870 = vmatpush3.bf16.msra.mxu1 %v1971_v25  ;;  %5825 = vmatprep.subr.bf16.mxu0 %v6579_v0  ;;  %p6520_p13 = pneg %p6519_p12 }
 0xc22   : > { %5871 = vmatprep.subr.bf16.mxu1 %v1970_v62 }
 0xc23   : > { %p6527_p3 = pnand %p6526_p2, %p6520_p13 }
 0xc24   : > { %5826 = vmatpush3.bf16.msra.mxu0 %v1970_v62 }
 0xc25   : > { %5872 = vmatpush3.bf16.msra.mxu1 %v1970_v62 }
 0xc27   : > { %5828 = vmatmul.mubr.msk.bf16.vlgmr.msra.gmra.mxu0 %vm495_vm1, %v5242_v63 }
 0xc28   : > { %5874 = vmatmul.mubr.msk.bf16.vlgmr.msra.gmra.mxu1 %vm495_vm1, %v6157_v10 }
 0xce7   : > { %v2034_v51 = vpop.f32.mrf.mxu0 }
 0xce8   : > { %v2040_v22 = vpack.c.bf16 %v2034_v51, %v2034_v51  ;;  %v2041_v5 = vmul.f32 %v7230_v23, %v2034_v51 }
 0xce9   : > { %v5829_v59 = vpop.f32.mrf.mxu0 }
 0xcea   : > { %v2042_v42 = vpack.c.bf16 %v2041_v5, %v2041_v5  ;;  %6057 = vmatprep.subr.msk.bf16.mxu0 %vm589_vm2, %v2040_v22  ;;  %v2084_v3 = vsel %vm589_vm2, %v2040_v22, 0 }
 0xceb   : > { %v2037_v20 = vpop.f32.mrf.mxu0  ;;  %5832 = vmatpush3.bf16.msra.mxu0 %v2084_v3 }
 0xcec   : > { %2043 = vxpose.xlu1.c.b16.start.end [1/1] (short) %v2042_v42, 128  ;;  %5849 = vmatprep.subr.bf16.mxu0 %v6579_v0 }
 0xced   : > { %v5830_v4 = vpop.f32.mrf.mxu0 }
 0xcf0   : > { %6125 = vset.pattern.permute.xlu1 %v6581_v45 }
 0xd4e   : > { %v2051_v28 = vpop.trf.xlu1 }
 0xd4f   : > { %5833 = vmatprep.mubr.msk.bf16.mxu0 %vm564_vm3, %v2051_v28 }
 0xd52   : > { %v2052_v44 = vpop.trf.xlu1 }
 0xd53   : > { %5834 = vmatmul.mubr.msk.bf16.vlgmr.msra.gmra.mxu0 %vm564_vm3, %v2052_v44 }
 0xd56   : > { %v2053_v9 = vpop.trf.xlu1 }
 0xd57   : > { %5837 = vmatprep.mubr.msk.bf16.mxu0 %vm564_vm3, %v2053_v9 }
 0xd5a   : > { %v2054_v24 = vpop.trf.xlu1 }
 0xd5b   : > { %5838 = vmatmul.mubr.msk.bf16.gmra.mxu0 %vm564_vm3, %v2054_v24 }
 0xd5e   : > { %v2055_v46 = vpop.trf.xlu1 }
 0xd5f   : > { %5841 = vmatprep.mubr.msk.bf16.mxu0 %vm564_vm3, %v2055_v46 }
 0xd62   : > { %v2056_v41 = vpop.trf.xlu1 }
 0xd63   : > { %5842 = vmatmul.mubr.msk.bf16.gmra.mxu0 %vm564_vm3, %v2056_v41 }
 0xd66   : > { %v2057_v49 = vpop.trf.xlu1 }
 0xd67   : > { %5845 = vmatprep.mubr.msk.bf16.mxu0 %vm564_vm3, %v2057_v49 }
 0xd6a   : > { %v2058_v47 = vpop.trf.xlu1 }
 0xd6b   : > { %5846 = vmatmul.mubr.msk.bf16.gmra.mxu0 %vm564_vm3, %v2058_v47 }
 0xd6c   : > { %5865 = vmatprep.mubr.msk.bf16.mxu0 %vm6580_vm0, %v6579_v0 }
 0xe13   : > { %v7247_v13 = vpop.f32.mrf.mxu0 }
 0xe15   : > { %v7249_v15 = vpop.f32.mrf.mxu0 }
 0xe17   : > { %v7251_v26 = vpop.f32.mrf.mxu0 }
 0xe19   : > { %v7253_v11 = vpop.f32.mrf.mxu0 }
 0xe1b   : > { %v7255_v16 = vpop.f32.mrf.mxu0 }
 0xe1d   : > { %v7257_v8 = vpop.f32.mrf.mxu0 }
 0xe1f   : > { %v7259_v1 = vpop.f32.mrf.mxu0 }
 0xe21   : > { %v7261_v2 = vpop.f32.mrf.mxu0 }
 0xe23   : > { %v5843_v19 = vpop.f32.mrf.mxu0 }
 0xe25   : > { %v2152_v43 = vpop.f32.mrf.mxu0 }
 0xe27   : > { %v5844_v6 = vpop.f32.mrf.mxu0 }
 0xe29   : > { %v7263_v7 = vpop.f32.mrf.mxu0 }
 0xe2b   : > { %v5847_v31 = vpop.f32.mrf.mxu0 }
 0xe2c   : > { %2211 = vmax.xlane.f32.xlu0 %v5847_v31 }
 0xe2d   : > { %v2168_v33 = vpop.f32.mrf.mxu0 }
 0xe2f   : > { %v5848_v35 = vpop.f32.mrf.mxu0 }
 0xe30   : > { %2207 = vmax.xlane.f32.xlu0 %v2168_v33  ;;  %2213 = vmax.xlane.f32.xlu1 %v5848_v35 }
 0xe31   : > { %v2171_v55 = vpop.f32.mrf.mxu0 }
 0xe34   : > { %2203 = vmax.xlane.f32.xlu0 %v5843_v19  ;;  %2187 = vmax.xlane.f32.xlu1 %v7247_v13 }
 0xe38   : > { %2205 = vmax.xlane.f32.xlu0 %v5844_v6  ;;  %2183 = vmax.xlane.f32.xlu1 %v7249_v15 }
 0xe3c   : > { %2199 = vmax.xlane.f32.xlu0 %v2152_v43 }
 0xe40   : > { %2201 = vmax.xlane.f32.xlu0 %v7263_v7 }
 0xe44   : > { %2209 = vmax.xlane.f32.xlu0 %v2171_v55 }
 0xe48   : > { %2195 = vmax.xlane.f32.xlu0 %v7255_v16 }
 0xe4c   : > { %2197 = vmax.xlane.f32.xlu0 %v7259_v1 }
 0xe50   : > { %2191 = vmax.xlane.f32.xlu0 %v7257_v8 }
 0xe54   : > { %2193 = vmax.xlane.f32.xlu0 %v7261_v2 }
 0xe58   : > { %2189 = vmax.xlane.f32.xlu0 %v7251_v26 }
 0xe5c   : > { %2185 = vmax.xlane.f32.xlu0 %v7253_v11 }
 0xeb5   : > { %v2212_v32 = vpop.xlane.xlu0 %2211 }
 0xeb6   : > { %v2229_v34 = vsub.f32 %v5847_v31, %v2212_v32 }
 0xeb8   : > { %v2259_v27 = vmul.f32 1.442695, %v2229_v34 }
 0xeb9   : > { %v2208_v38 = vpop.xlane.xlu0 %2207  ;;  %v2214_v54 = vpop.xlane.xlu1 %2213 }
 0xeba   : > { %v2230_v39 = vsub.f32 %v5848_v35, %v2214_v54  ;;  %v2227_v57 = vsub.f32 %v2168_v33, %v2208_v38 }
 0xebc   : > { %v2261_v40 = vmul.f32 1.442695, %v2230_v39  ;;  %v2255_v37 = vmul.f32 1.442695, %v2227_v57 }
 0xebd   : > { %v2204_v30 = vpop.xlane.xlu0 %2203  ;;  %v2188_v9 = vpop.xlane.xlu1 %2187 }
 0xebe   : > { %v2225_v29 = vsub.f32 %v5843_v19, %v2204_v30  ;;  %6340 = vpow2.f32 %v2261_v40  ;;  %v2217_v19 = vsub.f32 %v7247_v13, %v2188_v9 }
 0xec0   : > { %v2251_v60 = vmul.f32 1.442695, %v2225_v29  ;;  %v2235_v35 = vmul.f32 1.442695, %v2217_v19 }
 0xec1   : > { %v2206_v53 = vpop.xlane.xlu0 %2205 }
 0xec2   : > { %6342 = vpow2.f32 %v2251_v60  ;;  %v2226_v51 = vsub.f32 %v5844_v6, %v2206_v53  ;;  %v2184_v6 = vpop.xlane.xlu1 %2183 }
 0xec3   : > { %6344 = vpow2.f32 %v2259_v27 }
 0xec4   : > { %6346 = vpow2.f32 %v2255_v37  ;;  %v2253_v3 = vmul.f32 1.442695, %v2226_v51  ;;  %v7348_v37 = vld [vmem:[%s8405_s6 + $0x50] sm:$0xff] }
 0xec5   : > { %v2200_v18 = vpop.xlane.xlu0 %2199 }
 0xec6   : > { %v2223_v21 = vsub.f32 %v2152_v43, %v2200_v18  ;;  %v7342_v18 = vld [vmem:[%s8405_s6 + $0x40] sm:$0xff] }
 0xec8   : > { %v2247_v62 = vmul.f32 1.442695, %v2223_v21  ;;  %v7354_v21 = vld [vmem:[%s8405_s6 + $0x58] sm:$0xff] }
 0xec9   : > { %v2202_v25 = vpop.xlane.xlu0 %2201 }
 0xeca   : > { %6348 = vpow2.f32 %v2247_v62  ;;  %v2224_v4 = vsub.f32 %v7263_v7, %v2202_v25  ;;  %v7359_v25 = vld [vmem:[%s8405_s6 + $0x48] sm:$0xff] }
 0xecb   : > { %v7282_v63 = vpop.eup %6340 }
 0xecc   : > { %2293 = vadd.xlane.f32.xlu0 %v7282_v63  ;;  %v2249_v41 = vmul.f32 1.442695, %v2224_v4 }
 0xecd   : > { %v2210_v22 = vpop.xlane.xlu0 %2209 }
 0xece   : > { %v2228_v5 = vsub.f32 %v2171_v55, %v2210_v22 }
 0xecf   : > { %v7285_v59 = vpop.eup %6342 }
 0xed0   : > { %v2257_v42 = vmul.f32 1.442695, %v2228_v5  ;;  %2283 = vadd.xlane.f32.xlu1 %v7285_v59  ;;  %v7290_v44 = vpop.eup %6344 }
 0xed1   : > { %v2196_v20 = vpop.xlane.xlu0 %2195  ;;  %v7294_v47 = vpop.eup %6346 }
 0xed2   : > { %6350 = vpow2.f32 %v2257_v42  ;;  %v2221_v28 = vsub.f32 %v7255_v16, %v2196_v20 }
 0xed3   : > { %6352 = vpow2.f32 %v2253_v3 }
 0xed4   : > { %v2243_v24 = vmul.f32 1.442695, %v2221_v28  ;;  %2291 = vadd.xlane.f32.xlu1 %v7290_v44 }
 0xed5   : > { %v2198_v46 = vpop.xlane.xlu0 %2197 }
 0xed6   : > { %6354 = vpow2.f32 %v2243_v24  ;;  %v2222_v49 = vsub.f32 %v7259_v1, %v2198_v46  ;;  %v2215_v1 = vsub.f32 %v7249_v15, %v2184_v6 }
 0xed7   : > { %6356 = vpow2.f32 %v2249_v41  ;;  %v7299_v31 = vpop.eup %6348 }
 0xed8   : > { %2287 = vadd.xlane.f32.xlu1 %v7294_v47  ;;  %v2245_v43 = vmul.f32 1.442695, %v2222_v49 }
 0xed9   : > { %v2192_v16 = vpop.xlane.xlu0 %2191 }
 0xeda   : > { %v2219_v7 = vsub.f32 %v7257_v8, %v2192_v16  ;;  %6358 = vpow2.f32 %v2245_v43  ;;  %v2231_v8 = vmul.f32 1.442695, %v2215_v1 }
 0xedc   : > { %v2239_v33 = vmul.f32 1.442695, %v2219_v7  ;;  %2279 = vadd.xlane.f32.xlu1 %v7299_v31 }
 0xedd   : > { %v2194_v55 = vpop.xlane.xlu0 %2193 }
 0xede   : > { %6360 = vpow2.f32 %v2239_v33  ;;  %v2220_v48 = vsub.f32 %v7261_v2, %v2194_v55  ;;  %v7375_v55 = vpop.f32.mrf.mxu1 }
 0xedf   : > { %v7304_v13 = vpop.eup %6350  ;;  %6362 = vpow2.f32 %v2235_v35 }
 0xee0   : > { %v2241_v10 = vmul.f32 1.442695, %v2220_v48  ;;  %2289 = vadd.xlane.f32.xlu0 %v7304_v13  ;;  %v7307_v38 = vpop.eup %6352 }
 0xee1   : > { %v2190_v32 = vpop.xlane.xlu0 %2189 }
 0xee2   : > { %6364 = vpow2.f32 %v2241_v10  ;;  %v2218_v54 = vsub.f32 %v7251_v26, %v2190_v32 }
 0xee3   : > { %v7310_v39 = vpop.eup %6354  ;;  %6366 = vpow2.f32 %v2231_v8 }
 0xee4   : > { %v2237_v15 = vmul.f32 1.442695, %v2218_v54  ;;  %2285 = vadd.xlane.f32.xlu0 %v7307_v38  ;;  %2275 = vadd.xlane.f32.xlu1 %v7310_v39  ;;  %v7315_v30 = vpop.eup %6356 }
 0xee5   : > { %v2186_v2 = vpop.xlane.xlu0 %2185 }
 0xee6   : > { %6368 = vpow2.f32 %v2237_v15  ;;  %v2216_v40 = vsub.f32 %v7253_v11, %v2186_v2  ;;  %v2451_v2 = vpop.f32.mrf.mxu1 }
 0xee7   : > { %v7318_v29 = vpop.eup %6358 }
 0xee8   : > { %v2233_v34 = vmul.f32 1.442695, %v2216_v40  ;;  %2281 = vadd.xlane.f32.xlu0 %v7315_v30 }
 0xeea   : > { %6370 = vpow2.f32 %v2233_v34 }
 0xeeb   : > { %v7320_v26 = vpop.eup %6360 }
 0xeec   : > { %2277 = vadd.xlane.f32.xlu0 %v7318_v29  ;;  %2271 = vadd.xlane.f32.xlu1 %v7320_v26  ;;  %v7324_v60 = vpop.eup %6362 }
 0xeef   : > { %v7326_v53 = vpop.eup %6364 }
 0xef0   : > { %2267 = vadd.xlane.f32.xlu1 %v7324_v60  ;;  %2273 = vadd.xlane.f32.xlu0 %v7326_v53  ;;  %v7330_v11 = vpop.eup %6366 }
 0xef3   : > { %v7332_v27 = vpop.eup %6368 }
 0xef4   : > { %2263 = vadd.xlane.f32.xlu1 %v7330_v11  ;;  %2269 = vadd.xlane.f32.xlu0 %v7332_v27 }
 0xef7   : > { %v7336_v57 = vpop.eup %6370 }
 0xef8   : > { %2265 = vadd.xlane.f32.xlu0 %v7336_v57 }
 0xf05   : > { %2383 = vperm.xlu1 %6125, %v7342_v18  }
 0xf09   : > { %2393 = vperm.xlu1 %6125, %v7348_v37  }
 0xf0d   : > { %2398 = vperm.xlu1 %6125, %v7354_v21  }
 0xf0e   : > { %2388 = vperm.xlu0 %6126, %v7359_v25  }
 0xf11   : > { %6127 = vset.pattern.permute.xlu1 %v6583_v52 }
 0xf12   : > { %2537 = vperm.xlu1 %6127, %v7342_v18   ;;  %6128 = vset.pattern.permute.xlu0 %v6584_v58 }
 0xf16   : > { %2541 = vperm.xlu1 %6127, %v7359_v25  }
 0xf1a   : > { %2545 = vperm.xlu1 %6127, %v7348_v37  }
 0xf1e   : > { %2549 = vperm.xlu1 %6127, %v7354_v21  }
 0xf22   : > { %6129 = vset.pattern.permute.xlu1 %v6584_v58 }
 0xf55   : > { %v2294_v62 = vpop.xlane.xlu0 %2293 }
 0xf56   : > { %6372 = vrcp.f32 %v2294_v62 }
 0xf59   : > { %v2284_v51 = vpop.xlane.xlu1 %2283 }
 0xf5d   : > { %v2292_v22 = vpop.xlane.xlu1 %2291 }
 0xf5e   : > { %6374 = vrcp.f32 %v2292_v22 }
 0xf61   : > { %v2288_v5 = vpop.xlane.xlu1 %2287 }
 0xf62   : > { %6376 = vrcp.f32 %v2288_v5 }
 0xf63   : > { %v6373_v42 = vpop.eup %6372 }
 0xf64   : > { %v2326_v28 = vmul.f32 %v6373_v42, %v7282_v63 }
 0xf65   : > { %v2280_v9 = vpop.xlane.xlu1 %2279 }
 0xf69   : > { %v2290_v3 = vpop.xlane.xlu0 %2289 }
 0xf6a   : > { %6378 = vrcp.f32 %v2290_v3 }
 0xf6b   : > { %v6375_v20 = vpop.eup %6374  ;;  %6380 = vrcp.f32 %v2284_v51 }
 0xf6c   : > { %v2325_v4 = vmul.f32 %v6375_v20, %v7290_v44 }
 0xf6d   : > { %v2286_v24 = vpop.xlane.xlu0 %2285  ;;  %v2276_v41 = vpop.xlane.xlu1 %2275 }
 0xf6e   : > { %v2334_v46 = vpack.c.bf16 %v2326_v28, %v2325_v4  ;;  %6382 = vrcp.f32 %v2286_v24 }
 0xf6f   : > { %6384 = vrcp.f32 %v2280_v9  ;;  %v6377_v19 = vpop.eup %6376 }
 0xf70   : > { %5850 = vmatpush3.bf16.msra.mxu0 %v2334_v46  ;;  %5877 = vmatprep.subr.bf16.mxu1 %v2334_v46  ;;  %v2323_v63 = vmul.f32 %v6377_v19, %v7294_v47 }
 0xf71   : > { %5878 = vmatpush3.bf16.msra.mxu1 %v2334_v46  ;;  %v2282_v49 = vpop.xlane.xlu0 %2281  ;;  %5851 = vmatprep.subr.bf16.mxu0 %v6579_v0 }
 0xf72   : > { %6386 = vrcp.f32 %v2282_v49 }
 0xf73   : > { %6388 = vrcp.f32 %v2276_v41 }
 0xf75   : > { %v2272_v43 = vpop.xlane.xlu1 %2271  ;;  %v2278_v44 = vpop.xlane.xlu0 %2277 }
 0xf76   : > { %6390 = vrcp.f32 %v2278_v44 }
 0xf77   : > { %v6379_v16 = vpop.eup %6378  ;;  %6392 = vrcp.f32 %v2272_v43 }
 0xf78   : > { %v2324_v6 = vmul.f32 %v6379_v16, %v7304_v13  ;;  %v6381_v35 = vpop.eup %6380 }
 0xf79   : > { %v2268_v7 = vpop.xlane.xlu1 %2267  ;;  %v2274_v33 = vpop.xlane.xlu0 %2273  ;;  %v2321_v47 = vmul.f32 %v6381_v35, %v7285_v59 }
 0xf7a   : > { %v2333_v1 = vpack.c.bf16 %v2324_v6, %v2323_v63  ;;  %6394 = vrcp.f32 %v2274_v33 }
 0xf7b   : > { %v6383_v48 = vpop.eup %6382  ;;  %6396 = vrcp.f32 %v2268_v7 }
 0xf7c   : > { %5852 = vmatpush3.bf16.msra.mxu0 %v2333_v1  ;;  %5879 = vmatprep.subr.bf16.mxu1 %v2333_v1  ;;  %v6385_v10 = vpop.eup %6384  ;;  %v2322_v13 = vmul.f32 %v6383_v48, %v7307_v38  ;;  %v5876_v38 = vpop.f32.mrf.mxu1 }
 0xf7d   : > { %v2264_v8 = vpop.xlane.xlu1 %2263  ;;  %5880 = vmatpush3.bf16.msra.mxu1 %v2333_v1  ;;  %v2270_v32 = vpop.xlane.xlu0 %2269  ;;  %5853 = vmatprep.subr.bf16.mxu0 %v6579_v0  ;;  %v2319_v40 = vmul.f32 %v6385_v10, %v7299_v31 }
 0xf7e   : > { %6398 = vrcp.f32 %v2270_v32  ;;  %v2332_v15 = vpack.c.bf16 %v2322_v13, %v2321_v47  ;;  %v2454_v20 = vpop.f32.mrf.mxu1 }
 0xf7f   : > { %v6387_v54 = vpop.eup %6386  ;;  %6400 = vrcp.f32 %v2264_v8 }
 0xf80   : > { %v2320_v34 = vmul.f32 %v6387_v54, %v7315_v30  ;;  %5854 = vmatpush3.bf16.msra.mxu0 %v2332_v15  ;;  %5881 = vmatprep.subr.bf16.mxu1 %v2332_v15  ;;  %v6389_v51 = vpop.eup %6388 }
 0xf81   : > { %v2266_v62 = vpop.xlane.xlu0 %2265  ;;  %5882 = vmatpush3.bf16.msra.mxu1 %v2332_v15  ;;  %5855 = vmatprep.subr.bf16.mxu0 %v6579_v0  ;;  %v2384_v22 = vpop.permute.xlu1 %2383  ;;  %v2317_v42 = vmul.f32 %v6389_v51, %v7310_v39 }
 0xf82   : > { %6402 = vrcp.f32 %v2266_v62  ;;  %v2331_v59 = vpack.c.bf16 %v2320_v34, %v2319_v40  ;;  %v2452_v28 = vadd.f32 %v2451_v2, %v2384_v22 }
 0xf83   : > { %v6391_v5 = vpop.eup %6390 }
 0xf84   : > { %5883 = vmatprep.subr.bf16.mxu1 %v2331_v59  ;;  %5856 = vmatpush3.bf16.msra.mxu0 %v2331_v59  ;;  %v2318_v31 = vmul.f32 %v6391_v5, %v7318_v29  ;;  %v6393_v3 = vpop.eup %6392 }
 0xf85   : > { %5884 = vmatpush3.bf16.msra.mxu1 %v2331_v59  ;;  %5857 = vmatprep.subr.bf16.mxu0 %v6579_v0  ;;  %v2394_v9 = vpop.permute.xlu1 %2393  ;;  %v2315_v24 = vmul.f32 %v6393_v3, %v7320_v26  ;;  %v6159_v3 = vld [vmem:[%s8404_s5 + $0x28] sm:$0xff]  }
 0xf86   : > { %v2330_v30 = vpack.c.bf16 %v2318_v31, %v2317_v42  ;;  %v2460_v35 = vadd.f32 %v7375_v55, %v2394_v9 }
 0xf87   : > { %v6395_v4 = vpop.eup %6394 }
 0xf88   : > { %5858 = vmatpush3.bf16.msra.mxu0 %v2330_v30  ;;  %5885 = vmatprep.subr.bf16.mxu1 %v2330_v30  ;;  %v2316_v46 = vmul.f32 %v6395_v4, %v7326_v53  ;;  %v6397_v49 = vpop.eup %6396 }
 0xf89   : > { %v2389_v41 = vpop.permute.xlu0 %2388  ;;  %5886 = vmatpush3.bf16.msra.mxu1 %v2330_v30  ;;  %5859 = vmatprep.subr.bf16.mxu0 %v6579_v0  ;;  %v2313_v16 = vmul.f32 %v6397_v49, %v7324_v60  ;;  %v2399_v26 = vpop.permute.xlu1 %2398 }
 0xf8a   : > { %v2455_v39 = vadd.f32 %v2454_v20, %v2389_v41  ;;  %v2329_v29 = vpack.c.bf16 %v2316_v46, %v2315_v24  ;;  %v2463_v1 = vadd.f32 %v5876_v38, %v2399_v26 }
 0xf8b   : > { %v6399_v19 = vpop.eup %6398 }
 0xf8c   : > { %v2466_v43 = vpack.c.bf16 %v2455_v39, %v2452_v28  ;;  %v6401_v44 = vpop.eup %6400  ;;  %5860 = vmatpush3.bf16.msra.mxu0 %v2329_v29  ;;  %5887 = vmatprep.subr.bf16.mxu1 %v2329_v29  ;;  %v2314_v63 = vmul.f32 %v6399_v19, %v7332_v27  ;;  %v2467_v27 = vpack.c.bf16 %v2463_v1, %v2460_v35 }
 0xf8d   : > { %5888 = vmatpush3.bf16.msra.mxu1 %v2329_v29  ;;  %5861 = vmatprep.subr.bf16.mxu0 %v6579_v0  ;;  %v2311_v7 = vmul.f32 %v6401_v44, %v7330_v11  ;;  %v6158_v11 = vld [vmem:[%s8404_s5 + $0x20] sm:$0xff]   ;;  %v2538_v30 = vpop.permute.xlu1 %2537 }
 0xf8e   : > { %v2328_v6 = vpack.c.bf16 %v2314_v63, %v2313_v16  ;;  %5893 = vmatprep.mubr.bf16.mxu1 %v2466_v43 }
 0xf8f   : > { %v6403_v53 = vpop.eup %6402 }
 0xf90   : > { %v2312_v33 = vmul.f32 %v6403_v53, %v7336_v57  ;;  %5862 = vmatpush3.bf16.msra.mxu0 %v2328_v6  ;;  %5889 = vmatprep.subr.bf16.mxu1 %v2328_v6 }
 0xf91   : > { %5890 = vmatpush3.bf16.msra.mxu1 %v2328_v6  ;;  %5863 = vmatprep.subr.bf16.mxu0 %v6579_v0  ;;  %v2542_v20 = vpop.permute.xlu1 %2541 }
 0xf92   : > { %v2327_v60 = vpack.c.bf16 %v2312_v33, %v2311_v7 }
 0xf94   : > { %5891 = vmatprep.subr.bf16.mxu1 %v2327_v60  ;;  %5864 = vmatpush3.bf16.msra.mxu0 %v2327_v60 }
 0xf95   : > { %5892 = vmatpush3.bf16.msra.mxu1 %v2327_v60  ;;  %v2546_v4 = vpop.permute.xlu1 %2545 }
 0xf97   : > { %5866 = vmatmul.mubr.bf16.vlgmr.msra.gmra.mxu0 %v6582_v50 }
 0xf98   : > { %5894 = vmatmul.mubr.bf16.vlgmr.msra.gmra.mxu1 %v2467_v27  ;;  %5901 = vmatprep.mubr.msk.bf16.mxu0 %vm495_vm1, %v6158_v11 }
 0xf99   : > { %v2550_v19 = vpop.permute.xlu1 %2549 }
0x1057   : > { %v2369_v57 = vpop.f32.mrf.mxu0 }
0x1058   : > { %v2370_v55 = vadd.f32 1e-09, %v2369_v57  ;;  %v5895_v8 = vpop.f32.mrf.mxu1 }
0x1059   : > { %v5867_v48 = vpop.f32.mrf.mxu0 }
0x105a   : > { %6404 = vrcp.f32 %v2370_v55  ;;  %v2502_v47 = vpop.f32.mrf.mxu1 }
0x105b   : > { %v2372_v10 = vpop.f32.mrf.mxu0 }
0x105c   : > { %v5896_v13 = vpop.f32.mrf.mxu1 }
0x105d   : > { %v5868_v32 = vpop.f32.mrf.mxu0 }
0x105e   : > { %v2505_v2 = vpop.f32.mrf.mxu1 }
0x1067   : > { %v6405_v54 = vpop.eup %6404 }
0x1068   : > { %v2520_v15 = vrot.slane %v6405_v54, %v6914_v36 }
0x106a   : > { %v2523_v40 = vmul.f32 %v5895_v8, %v2520_v15  ;;  %v2521_v34 = vmul.f32 %v2520_v15, %v2502_v47  ;;  %v2524_v62 = vmul.f32 %v5896_v13, %v2520_v15  ;;  %v2522_v51 = vmul.f32 %v2520_v15, %v2505_v2 }
0x106c   : > { %v2532_v59 = vsub.f32 %v7209_v17, %v2523_v40  ;;  %v2530_v22 = vsub.f32 %v7212_v56, %v2521_v34  ;;  %v2533_v38 = vsub.f32 %v7215_v12, %v2524_v62  ;;  %v2531_v5 = vsub.f32 %v7218_v61, %v2522_v51 }
0x106e   : > { %v2535_v42 = vpack.c.bf16 %v2533_v38, %v2532_v59  ;;  %v2534_v31 = vpack.c.bf16 %v2531_v5, %v2530_v22 }
0x1070   : > { %5897 = vmatprep.subr.bf16.mxu0 %v2535_v42 }
0x1071   : > { %5898 = vmatpush3.bf16.msra.mxu0 %v2535_v42 }
0x1072   : > { %5899 = vmatprep.subr.bf16.mxu0 %v2534_v31 }
0x1075   : > { %5900 = vmatpush3.bf16.msra.mxu0 %v2534_v31 }
0x1076   : > { %5905 = vmatprep.subr.bf16.mxu0 %v6579_v0 }
0x1078   : > { %5902 = vmatmul.mubr.msk.bf16.vlgmr.msra.gmra.mxu0 %vm495_vm1, %v6159_v3 }
0x1079   : > { %5909 = vmatprep.mubr.msk.bf16.mxu0 %vm6580_vm0, %v6579_v0 }
0x1138   : > { %v5903_v28 = vpop.f32.mrf.mxu0 }
0x1139   : > { %v7413_v9 = vadd.f32 %v5903_v28, %v2546_v4 }
0x113a   : > { %v2602_v24 = vpop.f32.mrf.mxu0 }
0x113b   : > { %v7415_v46 = vadd.f32 %v2602_v24, %v2538_v30  ;;  %2621 = vadd.xlane.f32.xlu0 %v7413_v9  ;;  %v2627_v16 = vmul.f32 %v7413_v9, %v7413_v9 }
0x113c   : > { %v5904_v41 = vpop.f32.mrf.mxu0 }
0x113d   : > { %2617 = vadd.xlane.f32.xlu1 %v7415_v46  ;;  %v2625_v29 = vmul.f32 %v7415_v46, %v7415_v46  ;;  %v7424_v43 = vadd.f32 %v5904_v41, %v2550_v19 }
0x113e   : > { %v2605_v49 = vpop.f32.mrf.mxu0 }
0x113f   : > { %v7419_v39 = vadd.f32 %v2605_v49, %v2542_v20  ;;  %v2628_v63 = vmul.f32 %v7424_v43, %v7424_v43 }
0x1141   : > { %2619 = vadd.xlane.f32.xlu0 %v7419_v39  ;;  %2629 = vadd.xlane.f32.xlu1 %v2625_v29  ;;  %v2626_v44 = vmul.f32 %v7419_v39, %v7419_v39 }
0x1145   : > { %2631 = vadd.xlane.f32.xlu0 %v2626_v44  ;;  %2623 = vadd.xlane.f32.xlu1 %v7424_v43 }
0x1149   : > { %2633 = vadd.xlane.f32.xlu0 %v2627_v16  ;;  %2635 = vadd.xlane.f32.xlu1 %v2628_v63 }
0x115a   : > { %2682 = vperm.xlu1 %6129, %v7354_v21  }
0x115e   : > { %6130 = vset.pattern.permute.xlu1 %v6585_v14 }
0x115f   : > { %2698 = vperm.xlu1 %6130, %v7348_v37   ;;  %2678 = vperm.xlu0 %6128, %v7348_v37  }
0x1163   : > { %2702 = vperm.xlu1 %6130, %v7354_v21   ;;  %6133 = vset.pattern.permute.xlu0 %v6581_v45 }
0x1167   : > { %6131 = vset.pattern.permute.xlu1 %v6584_v58 }
0x1168   : > { %2670 = vperm.xlu1 %6131, %v7342_v18  }
0x116c   : > { %2674 = vperm.xlu1 %6131, %v7359_v25  }
0x1170   : > { %6132 = vset.pattern.permute.xlu1 %v6585_v14 }
0x1171   : > { %2690 = vperm.xlu1 %6132, %v7342_v18  }
0x1175   : > { %2694 = vperm.xlu1 %6132, %v7359_v25  }
0x11c4   : > { %v2622_v26 = vpop.xlane.xlu0 %2621 }
0x11c6   : > { %v2618_v53 = vpop.xlane.xlu1 %2617 }
0x11ca   : > { %v2620_v6 = vpop.xlane.xlu0 %2619  ;;  %v2630_v37 = vpop.xlane.xlu1 %2629 }
0x11cb   : > { %v2637_v7 = vadd.f32 %v2620_v6, %v2618_v53 }
0x11cd   : > { %v2638_v21 = vadd.f32 %v2637_v7, %v2622_v26 }
0x11ce   : > { %v2632_v33 = vpop.xlane.xlu0 %2631  ;;  %v2624_v35 = vpop.xlane.xlu1 %2623 }
0x11cf   : > { %v2639_v1 = vadd.f32 %v2638_v21, %v2624_v35  ;;  %v2647_v60 = vadd.f32 %v2632_v33, %v2630_v37 }
0x11d1   : > { %v2640_v27 = vrot.slane %v2639_v1, 4 }
0x11d2   : > { %v2634_v11 = vpop.xlane.xlu0 %2633  ;;  %v2636_v57 = vpop.xlane.xlu1 %2635 }
0x11d3   : > { %v2641_v55 = vadd.f32 %v2640_v27, %v2639_v1  ;;  %v2648_v48 = vadd.f32 %v2647_v60, %v2634_v11 }
0x11d5   : > { %v2642_v10 = vrot.slane %v2641_v55, 2  ;;  %v2649_v8 = vadd.f32 %v2648_v48, %v2636_v57 }
0x11d6   : > { %v2683_v18 = vpop.permute.xlu1 %2682 }
0x11d7   : > { %v2643_v32 = vadd.f32 %v2642_v10, %v2641_v55  ;;  %v2650_v25 = vrot.slane %v2649_v8, 4 }
0x11d9   : > { %v2644_v47 = vrot.slane %v2643_v32, 1  ;;  %v2651_v13 = vadd.f32 %v2650_v25, %v2649_v8 }
0x11da   : > { %v2699_v54 = vpop.permute.xlu1 %2698  ;;  %v2679_v49 = vpop.permute.xlu0 %2678 }
0x11db   : > { %v2645_v15 = vadd.f32 %v2644_v47, %v2643_v32  ;;  %v2652_v2 = vrot.slane %v2651_v13, 2 }
0x11dd   : > { %v2653_v40 = vadd.f32 %v2652_v2, %v2651_v13  ;;  %v2646_v34 = vmul.f32 0.00024414063, %v2645_v15 }
0x11de   : > { %v2703_v51 = vpop.permute.xlu1 %2702 }
0x11df   : > { %v2654_v62 = vrot.slane %v2653_v40, 1  ;;  %v2657_v22 = vmul.f32 %v2646_v34, %v2646_v34  ;;  %v2662_v20 = vsub.f32 %v7424_v43, %v2646_v34  ;;  %v2659_v4 = vsub.f32 %v7415_v46, %v2646_v34 }
0x11e0   : > { %v2660_v28 = vsub.f32 %v7419_v39, %v2646_v34  ;;  %v2661_v24 = vsub.f32 %v7413_v9, %v2646_v34 }
0x11e1   : > { %v2655_v59 = vadd.f32 %v2654_v62, %v2653_v40 }
0x11e3   : > { %v2656_v38 = vmul.f32 0.00024414063, %v2655_v59  ;;  %v2671_v42 = vpop.permute.xlu1 %2670 }
0x11e5   : > { %v2658_v5 = vsub.f32 %v2656_v38, %v2657_v22 }
0x11e7   : > { %v2663_v31 = vadd.f32 1e-05, %v2658_v5  ;;  %v2675_v3 = vpop.permute.xlu1 %2674 }
0x11e9   : > { %6406 = vrsqrt.f32 %v2663_v31 }
0x11ec   : > { %v2691_v30 = vpop.permute.xlu1 %2690 }
0x11f0   : > { %v2695_v63 = vpop.permute.xlu1 %2694 }
0x11f6   : > { %v6407_v41 = vpop.eup %6406 }
0x11f7   : > { %v2668_v29 = vmul.f32 %v6407_v41, %v2662_v20  ;;  %v2665_v19 = vmul.f32 %v6407_v41, %v2659_v4  ;;  %v2666_v44 = vmul.f32 %v6407_v41, %v2660_v28  ;;  %v2667_v16 = vmul.f32 %v6407_v41, %v2661_v24 }
0x11f9   : > { %v2688_v26 = vmul.f32 %v2683_v18, %v2668_v29  ;;  %v2685_v53 = vmul.f32 %v2671_v42, %v2665_v19  ;;  %v2686_v6 = vmul.f32 %v2675_v3, %v2666_v44  ;;  %v2687_v37 = vmul.f32 %v2679_v49, %v2667_v16  ;;  %v6160_v49 = vld [vmem:[%s8403_s4 + $0x30] sm:$0xff]   ;;  %v6161_v29 = vld [vmem:[%s8403_s4 + $0x38] sm:$0xff]  }
0x11fb   : > { %v2708_v7 = vadd.f32 %v2703_v51, %v2688_v26  ;;  %v2705_v21 = vadd.f32 %v2691_v30, %v2685_v53  ;;  %v2707_v43 = vadd.f32 %v2699_v54, %v2687_v37  ;;  %v2706_v33 = vadd.f32 %v2695_v63, %v2686_v6 }
0x11fd   : > { %v2712_v46 = vmax.f32 %v2708_v7, 0.0  ;;  %v2709_v35 = vmax.f32 %v2705_v21, 0.0  ;;  %v2711_v39 = vmax.f32 %v2707_v43, 0.0  ;;  %v2710_v1 = vmax.f32 %v2706_v33, 0.0 }
0x11ff   : > { %v7450_v9 = vadd.f32 %v2712_v46, %v7215_v12  ;;  %v7453_v60 = vadd.f32 %v2709_v35, %v7212_v56  ;;  %v7456_v27 = vadd.f32 %v2711_v39, %v7209_v17  ;;  %v7459_v11 = vadd.f32 %v2710_v1, %v7218_v61  ;;  %v5276_v17 = vld [vmem:[%s8402_s3 + $0xc] sm:$0xf] }
0x1201   : > { %v2718_v57 = vpack.c.bf16 %v7450_v9, %v7456_v27  ;;  %v2717_v55 = vpack.c.bf16 %v7459_v11, %v7453_v60 }
0x1203   : > { %5456 = vst [vmem:[#allocation2 + $0x38] sm:$0xff] %v2718_v57   ;;  %5906 = vmatpush3.bf16.msra.mxu0 %v2718_v57  ;;  %5455 = vst [vmem:[#allocation2 + $0x30] sm:$0xff] %v2717_v55  }
0x1204   : > { %5907 = vmatprep.subr.bf16.mxu0 %v6579_v0 }
0x1207   : > { %5908 = vmatpush3.bf16.msra.mxu0 %v2717_v55 }
0x1208   : > { %5931 = vmatprep.subr.bf16.mxu0 %v6579_v0 }
0x120a   : > { %5910 = vmatmul.mubr.msk.bf16.vlgmr.msra.gmra.mxu0 %vm495_vm1, %v5276_v17 }
0x120b   : > { %5947 = vmatprep.mubr.msk.bf16.mxu0 %vm6580_vm0, %v6579_v0 }
0x12ca   : > { %v2781_v56 = vpop.f32.mrf.mxu0 }
0x12cb   : > { %v2787_v12 = vpack.c.bf16 %v2781_v56, %v2781_v56  ;;  %v2788_v61 = vmul.f32 %v7230_v23, %v2781_v56 }
0x12cc   : > { %v5911_v48 = vpop.f32.mrf.mxu0 }
0x12cd   : > { %v2789_v10 = vpack.c.bf16 %v2788_v61, %v2788_v61  ;;  %6058 = vmatprep.subr.msk.bf16.mxu1 %vm589_vm2, %v2787_v12  ;;  %v2831_v8 = vsel %vm589_vm2, %v2787_v12, 0 }
0x12ce   : > { %v2784_v18 = vpop.f32.mrf.mxu0  ;;  %5914 = vmatpush3.bf16.msra.mxu1 %v2831_v8 }
0x12cf   : > { %2790 = vxpose.xlu1.c.b16.start.end [1/1] (short) %v2789_v10, 128  ;;  %5951 = vmatprep.subr.bf16.mxu1 %v2718_v57 }
0x12d0   : > { %v5912_v32 = vpop.f32.mrf.mxu0 }
0x12d3   : > { %6134 = vset.pattern.permute.xlu1 %v6581_v45 }
0x1331   : > { %v2798_v25 = vpop.trf.xlu1 }
0x1332   : > { %5915 = vmatprep.mubr.msk.bf16.mxu1 %vm564_vm3, %v2798_v25 }
0x1335   : > { %v2799_v47 = vpop.trf.xlu1 }
0x1336   : > { %5916 = vmatmul.mubr.msk.bf16.vlgmr.msra.gmra.mxu1 %vm564_vm3, %v2799_v47 }
0x1337   : > { %5952 = vmatpush3.bf16.msra.mxu1 %v2718_v57 }
0x1338   : > { %5953 = vmatprep.subr.bf16.mxu1 %v2717_v55 }
0x1339   : > { %v2800_v23 = vpop.trf.xlu1 }
0x133a   : > { %5919 = vmatprep.mubr.msk.bf16.mxu1 %vm564_vm3, %v2800_v23 }
0x133b   : > { %5954 = vmatpush3.bf16.msra.mxu1 %v2717_v55 }
0x133d   : > { %v2801_v13 = vpop.trf.xlu1 }
0x133e   : > { %5920 = vmatmul.mubr.msk.bf16.gmra.mxu1 %vm564_vm3, %v2801_v13 }
0x1341   : > { %v2802_v54 = vpop.trf.xlu1 }
0x1342   : > { %5923 = vmatprep.mubr.msk.bf16.mxu1 %vm564_vm3, %v2802_v54 }
0x1345   : > { %v2803_v15 = vpop.trf.xlu1 }
0x1346   : > { %5924 = vmatmul.mubr.msk.bf16.gmra.mxu1 %vm564_vm3, %v2803_v15 }
0x1349   : > { %v2804_v2 = vpop.trf.xlu1 }
0x134a   : > { %5927 = vmatprep.mubr.msk.bf16.mxu1 %vm564_vm3, %v2804_v2 }
0x134d   : > { %v2805_v40 = vpop.trf.xlu1 }
0x134e   : > { %5928 = vmatmul.mubr.msk.bf16.gmra.mxu1 %vm564_vm3, %v2805_v40 }
0x134f   : > { %5955 = vmatprep.mubr.msk.bf16.mxu1 %vm495_vm1, %v6160_v49 }
0x1356   : > { %5956 = vmatmul.mubr.msk.bf16.vlgmr.msra.gmra.mxu1 %vm495_vm1, %v6161_v29 }
0x13f6   : > { %v7485_v34 = vpop.f32.mrf.mxu1 }
0x13f8   : > { %v7487_v62 = vpop.f32.mrf.mxu1 }
0x13fa   : > { %v7489_v51 = vpop.f32.mrf.mxu1 }
0x13fc   : > { %v7491_v59 = vpop.f32.mrf.mxu1 }
0x13fe   : > { %v7493_v22 = vpop.f32.mrf.mxu1 }
0x1400   : > { %v7495_v38 = vpop.f32.mrf.mxu1 }
0x1402   : > { %v7497_v5 = vpop.f32.mrf.mxu1 }
0x1404   : > { %v7499_v42 = vpop.f32.mrf.mxu1 }
0x1406   : > { %v5925_v31 = vpop.f32.mrf.mxu1 }
0x1408   : > { %v2899_v3 = vpop.f32.mrf.mxu1 }
0x140a   : > { %v5926_v30 = vpop.f32.mrf.mxu1 }
0x140c   : > { %v7501_v20 = vpop.f32.mrf.mxu1 }
0x140e   : > { %v5929_v4 = vpop.f32.mrf.mxu1 }
0x140f   : > { %2958 = vmax.xlane.f32.xlu0 %v5929_v4 }
0x1410   : > { %v2915_v28 = vpop.f32.mrf.mxu1 }
0x1411   : > { %2954 = vmax.xlane.f32.xlu1 %v2915_v28 }
0x1412   : > { %v5930_v24 = vpop.f32.mrf.mxu1 }
0x1413   : > { %2950 = vmax.xlane.f32.xlu0 %v5925_v31 }
0x1414   : > { %v2918_v41 = vpop.f32.mrf.mxu1 }
0x1415   : > { %2936 = vmax.xlane.f32.xlu1 %v7489_v51 }
0x1417   : > { %2952 = vmax.xlane.f32.xlu0 %v5926_v30 }
0x1419   : > { %2932 = vmax.xlane.f32.xlu1 %v7491_v59 }
0x141b   : > { %2946 = vmax.xlane.f32.xlu0 %v2899_v3 }
0x141f   : > { %2948 = vmax.xlane.f32.xlu0 %v7501_v20 }
0x1423   : > { %2960 = vmax.xlane.f32.xlu0 %v5930_v24 }
0x1427   : > { %2956 = vmax.xlane.f32.xlu0 %v2918_v41 }
0x142b   : > { %2942 = vmax.xlane.f32.xlu0 %v7493_v22 }
0x142f   : > { %2944 = vmax.xlane.f32.xlu0 %v7497_v5 }
0x1433   : > { %2938 = vmax.xlane.f32.xlu0 %v7495_v38 }
0x1437   : > { %2940 = vmax.xlane.f32.xlu0 %v7499_v42 }
0x143b   : > { %2934 = vmax.xlane.f32.xlu0 %v7485_v34 }
0x143f   : > { %2930 = vmax.xlane.f32.xlu0 %v7487_v62 }
0x1498   : > { %v2959_v19 = vpop.xlane.xlu0 %2958 }
0x1499   : > { %v2976_v44 = vsub.f32 %v5929_v4, %v2959_v19 }
0x149a   : > { %v2955_v16 = vpop.xlane.xlu1 %2954 }
0x149b   : > { %v3006_v63 = vmul.f32 1.442695, %v2976_v44  ;;  %v2974_v26 = vsub.f32 %v2915_v28, %v2955_v16 }
0x149c   : > { %v2951_v53 = vpop.xlane.xlu0 %2950 }
0x149d   : > { %6408 = vpow2.f32 %v3006_v63  ;;  %v3002_v6 = vmul.f32 1.442695, %v2974_v26  ;;  %v2972_v37 = vsub.f32 %v5925_v31, %v2951_v53 }
0x149e   : > { %v2937_v2 = vpop.xlane.xlu1 %2936 }
0x149f   : > { %6410 = vpow2.f32 %v3002_v6  ;;  %v2998_v21 = vmul.f32 1.442695, %v2972_v37 }
0x14a0   : > { %v2953_v7 = vpop.xlane.xlu0 %2952 }
0x14a1   : > { %6412 = vpow2.f32 %v2998_v21  ;;  %v2973_v56 = vsub.f32 %v5926_v30, %v2953_v7 }
0x14a2   : > { %v2933_v28 = vpop.xlane.xlu1 %2932 }
0x14a3   : > { %v3000_v8 = vmul.f32 1.442695, %v2973_v56 }
0x14a4   : > { %v2947_v43 = vpop.xlane.xlu0 %2946 }
0x14a5   : > { %v2970_v33 = vsub.f32 %v2899_v3, %v2947_v43 }
0x14a7   : > { %v2994_v46 = vmul.f32 1.442695, %v2970_v33  ;;  %v7580_v33 = vld [vmem:[%s8405_s6 + $0x68] sm:$0xff] }
0x14a8   : > { %v2949_v35 = vpop.xlane.xlu0 %2948 }
0x14a9   : > { %6414 = vpow2.f32 %v2994_v46  ;;  %v2971_v32 = vsub.f32 %v7501_v20, %v2949_v35  ;;  %v2965_v20 = vsub.f32 %v7489_v51, %v2937_v2  ;;  %v7586_v46 = vld [vmem:[%s8405_s6 + $0x70] sm:$0xff]  ;;  %v7591_v35 = vld [vmem:[%s8405_s6 + $0x60] sm:$0xff] }
0x14aa   : > { %v7520_v39 = vpop.eup %6408 }
0x14ab   : > { %3038 = vadd.xlane.f32.xlu0 %v7520_v39  ;;  %v2996_v54 = vmul.f32 1.442695, %v2971_v32  ;;  %v2984_v49 = vmul.f32 1.442695, %v2965_v20 }
0x14ac   : > { %v2961_v1 = vpop.xlane.xlu0 %2960  ;;  %v7523_v55 = vpop.eup %6410 }
0x14ad   : > { %v2977_v57 = vsub.f32 %v5930_v24, %v2961_v1  ;;  %v7597_v1 = vld [vmem:[%s8405_s6 + $0x78] sm:$0xff] }
0x14ae   : > { %v7526_v48 = vpop.eup %6412 }
0x14af   : > { %v3008_v17 = vmul.f32 1.442695, %v2977_v57  ;;  %3034 = vadd.xlane.f32.xlu0 %v7523_v55 }
0x14b0   : > { %v2957_v12 = vpop.xlane.xlu0 %2956 }
0x14b1   : > { %6416 = vpow2.f32 %v3008_v17  ;;  %v2975_v61 = vsub.f32 %v2918_v41, %v2957_v12 }
0x14b3   : > { %v3004_v10 = vmul.f32 1.442695, %v2975_v61  ;;  %3030 = vadd.xlane.f32.xlu0 %v7526_v48 }
0x14b4   : > { %v2943_v18 = vpop.xlane.xlu0 %2942 }
0x14b5   : > { %6418 = vpow2.f32 %v3004_v10  ;;  %v2968_v25 = vsub.f32 %v7493_v22, %v2943_v18 }
0x14b6   : > { %v7531_v47 = vpop.eup %6414  ;;  %6420 = vpow2.f32 %v3000_v8 }
0x14b7   : > { %v2990_v23 = vmul.f32 1.442695, %v2968_v25  ;;  %3026 = vadd.xlane.f32.xlu0 %v7531_v47 }
0x14b8   : > { %v2945_v13 = vpop.xlane.xlu0 %2944 }
0x14b9   : > { %6422 = vpow2.f32 %v2990_v23  ;;  %v2969_v15 = vsub.f32 %v7497_v5, %v2945_v13 }
0x14ba   : > { %6424 = vpow2.f32 %v2996_v54 }
0x14bb   : > { %v2992_v40 = vmul.f32 1.442695, %v2969_v15 }
0x14bc   : > { %v2939_v31 = vpop.xlane.xlu0 %2938 }
0x14bd   : > { %v2966_v3 = vsub.f32 %v7495_v38, %v2939_v31  ;;  %6426 = vpow2.f32 %v2992_v40  ;;  %v2963_v38 = vsub.f32 %v7491_v59, %v2933_v28 }
0x14be   : > { %v7536_v30 = vpop.eup %6416 }
0x14bf   : > { %v2986_v22 = vmul.f32 1.442695, %v2966_v3  ;;  %3040 = vadd.xlane.f32.xlu1 %v7536_v30 }
0x14c0   : > { %v2941_v4 = vpop.xlane.xlu0 %2940 }
0x14c1   : > { %6428 = vpow2.f32 %v2986_v22  ;;  %v2967_v24 = vsub.f32 %v7499_v42, %v2941_v4  ;;  %v2980_v42 = vmul.f32 1.442695, %v2963_v38 }
0x14c2   : > { %v7541_v5 = vpop.eup %6418 }
0x14c3   : > { %v2988_v41 = vmul.f32 1.442695, %v2967_v24  ;;  %3036 = vadd.xlane.f32.xlu1 %v7541_v5  ;;  %v7545_v19 = vpop.eup %6420 }
0x14c4   : > { %v2935_v29 = vpop.xlane.xlu0 %2934 }
0x14c5   : > { %6430 = vpow2.f32 %v2988_v41  ;;  %v2964_v51 = vsub.f32 %v7485_v34, %v2935_v29 }
0x14c6   : > { %v7548_v44 = vpop.eup %6422  ;;  %6432 = vpow2.f32 %v2984_v49 }
0x14c7   : > { %v2982_v16 = vmul.f32 1.442695, %v2964_v51  ;;  %3032 = vadd.xlane.f32.xlu1 %v7545_v19  ;;  %3022 = vadd.xlane.f32.xlu0 %v7548_v44  ;;  %v7553_v59 = vpop.eup %6424 }
0x14c8   : > { %v2931_v63 = vpop.xlane.xlu0 %2930 }
0x14c9   : > { %6434 = vpow2.f32 %v2982_v16  ;;  %v2962_v26 = vsub.f32 %v7487_v62, %v2931_v63 }
0x14ca   : > { %6436 = vpow2.f32 %v2980_v42  ;;  %v7556_v34 = vpop.eup %6426 }
0x14cb   : > { %v2978_v53 = vmul.f32 1.442695, %v2962_v26  ;;  %3028 = vadd.xlane.f32.xlu1 %v7553_v59 }
0x14cd   : > { %6438 = vpow2.f32 %v2978_v53 }
0x14ce   : > { %v7558_v6 = vpop.eup %6428 }
0x14cf   : > { %3024 = vadd.xlane.f32.xlu1 %v7556_v34  ;;  %3018 = vadd.xlane.f32.xlu0 %v7558_v6 }
0x14d2   : > { %v7562_v37 = vpop.eup %6430 }
0x14d3   : > { %3020 = vadd.xlane.f32.xlu1 %v7562_v37  ;;  %v7565_v62 = vpop.eup %6432 }
0x14d6   : > { %v7567_v7 = vpop.eup %6434 }
0x14d7   : > { %3016 = vadd.xlane.f32.xlu1 %v7565_v62  ;;  %3014 = vadd.xlane.f32.xlu0 %v7567_v7  ;;  %v7571_v21 = vpop.eup %6436 }
0x14da   : > { %v7573_v43 = vpop.eup %6438 }
0x14db   : > { %3012 = vadd.xlane.f32.xlu1 %v7571_v21  ;;  %3010 = vadd.xlane.f32.xlu0 %v7573_v43 }
0x14ec   : > { %3135 = vperm.xlu1 %6134, %v7580_v33  }
0x14f0   : > { %3140 = vperm.xlu1 %6134, %v7586_v46  }
0x14f1   : > { %3130 = vperm.xlu0 %6133, %v7591_v35  }
0x14f4   : > { %3145 = vperm.xlu1 %6134, %v7597_v1  }
0x14f5   : > { %6137 = vset.pattern.permute.xlu0 %v6584_v58 }
0x14f8   : > { %6135 = vset.pattern.permute.xlu1 %v6583_v52 }
0x14f9   : > { %3284 = vperm.xlu1 %6135, %v7591_v35  }
0x14fd   : > { %3288 = vperm.xlu1 %6135, %v7580_v33  }
0x1501   : > { %3292 = vperm.xlu1 %6135, %v7586_v46  }
0x1505   : > { %3296 = vperm.xlu1 %6135, %v7597_v1  }
0x1509   : > { %6136 = vset.pattern.permute.xlu1 %v6584_v58 }
0x1534   : > { %v3039_v57 = vpop.xlane.xlu0 %3038 }
0x1535   : > { %6440 = vrcp.f32 %v3039_v57 }
0x1538   : > { %v3035_v17 = vpop.xlane.xlu0 %3034 }
0x153c   : > { %v3031_v12 = vpop.xlane.xlu0 %3030 }
0x1540   : > { %v3027_v10 = vpop.xlane.xlu0 %3026 }
0x1542   : > { %v6441_v18 = vpop.eup %6440 }
0x1543   : > { %v3072_v13 = vmul.f32 %v6441_v18, %v7520_v39 }
0x1548   : > { %v3041_v56 = vpop.xlane.xlu1 %3040 }
0x1549   : > { %6442 = vrcp.f32 %v3041_v56 }
0x154a   : > { %6444 = vrcp.f32 %v3035_v17 }
0x154c   : > { %v3037_v61 = vpop.xlane.xlu1 %3036 }
0x154d   : > { %6446 = vrcp.f32 %v3037_v61 }
0x154e   : > { %6448 = vrcp.f32 %v3031_v12 }
0x1550   : > { %v3033_v8 = vpop.xlane.xlu1 %3032  ;;  %v3023_v32 = vpop.xlane.xlu0 %3022 }
0x1551   : > { %6450 = vrcp.f32 %v3033_v8 }
0x1552   : > { %6452 = vrcp.f32 %v3027_v10 }
0x1554   : > { %v3029_v25 = vpop.xlane.xlu1 %3028 }
0x1555   : > { %6454 = vrcp.f32 %v3029_v25 }
0x1556   : > { %v6443_v23 = vpop.eup %6442  ;;  %6456 = vrcp.f32 %v3023_v32 }
0x1557   : > { %v3073_v54 = vmul.f32 %v6443_v23, %v7536_v30  ;;  %v6445_v15 = vpop.eup %6444 }
0x1558   : > { %v3025_v2 = vpop.xlane.xlu1 %3024  ;;  %v3019_v40 = vpop.xlane.xlu0 %3018  ;;  %v3070_v22 = vmul.f32 %v6445_v15, %v7523_v55 }
0x1559   : > { %6458 = vrcp.f32 %v3025_v2  ;;  %v7610_v31 = vpack.c.bf16 %v3073_v54, %v3072_v13 }
0x155a   : > { %v6447_v3 = vpop.eup %6446  ;;  %6460 = vrcp.f32 %v3019_v40 }
0x155b   : > { %5932 = vmatpush3.bf16.msra.mxu0 %v7610_v31  ;;  %v3071_v20 = vmul.f32 %v6447_v3, %v7541_v5  ;;  %v6449_v4 = vpop.eup %6448 }
0x155c   : > { %v3021_v28 = vpop.xlane.xlu1 %3020  ;;  %5933 = vmatprep.subr.bf16.mxu0 %v6579_v0  ;;  %v3068_v24 = vmul.f32 %v6449_v4, %v7526_v48  ;;  %v6162_v4 = vld [vmem:[%s8404_s5 + $0x30] sm:$0xff]  }
0x155d   : > { %6462 = vrcp.f32 %v3021_v28  ;;  %v7616_v39 = vpack.c.bf16 %v3071_v20, %v3070_v22  ;;  %5983 = vmatprep.mubr.msk.bf16.mxu1 %vm495_vm1, %v6162_v4 }
0x155e   : > { %v6451_v30 = vpop.eup %6450 }
0x155f   : > { %5934 = vmatpush3.bf16.msra.mxu0 %v7616_v39  ;;  %v3069_v41 = vmul.f32 %v6451_v30, %v7545_v19  ;;  %v6453_v49 = vpop.eup %6452  ;;  %v5957_v19 = vpop.f32.mrf.mxu1 }
0x1560   : > { %v3017_v38 = vpop.xlane.xlu1 %3016  ;;  %v3015_v29 = vpop.xlane.xlu0 %3014  ;;  %5935 = vmatprep.subr.bf16.mxu0 %v6579_v0  ;;  %v3066_v51 = vmul.f32 %v6453_v49, %v7531_v47 }
0x1561   : > { %6464 = vrcp.f32 %v3017_v38  ;;  %v3079_v55 = vpack.c.bf16 %v3069_v41, %v3068_v24 }
0x1562   : > { %v6455_v5 = vpop.eup %6454  ;;  %6466 = vrcp.f32 %v3015_v29 }
0x1563   : > { %5936 = vmatpush3.bf16.msra.mxu0 %v3079_v55  ;;  %v3067_v16 = vmul.f32 %v6455_v5, %v7553_v59  ;;  %v6457_v42 = vpop.eup %6456  ;;  %v3198_v59 = vpop.f32.mrf.mxu1 }
0x1564   : > { %v3013_v63 = vpop.xlane.xlu1 %3012  ;;  %v3011_v26 = vpop.xlane.xlu0 %3010  ;;  %5937 = vmatprep.subr.bf16.mxu0 %v6579_v0  ;;  %v3064_v57 = vmul.f32 %v6457_v42, %v7548_v44 }
0x1565   : > { %6468 = vrcp.f32 %v3013_v63  ;;  %v3078_v48 = vpack.c.bf16 %v3067_v16, %v3066_v51  ;;  %v5958_v18 = vpop.f32.mrf.mxu1 }
0x1566   : > { %v6459_v53 = vpop.eup %6458  ;;  %6470 = vrcp.f32 %v3011_v26 }
0x1567   : > { %5938 = vmatpush3.bf16.msra.mxu0 %v3078_v48  ;;  %v3065_v17 = vmul.f32 %v6459_v53, %v7556_v34  ;;  %v6461_v56 = vpop.eup %6460  ;;  %v3201_v13 = vpop.f32.mrf.mxu1 }
0x1568   : > { %5939 = vmatprep.subr.bf16.mxu0 %v6579_v0  ;;  %v3062_v61 = vmul.f32 %v6461_v56, %v7558_v6  ;;  %v3136_v2 = vpop.permute.xlu1 %3135 }
0x1569   : > { %v3077_v47 = vpack.c.bf16 %v3065_v17, %v3064_v57  ;;  %v3202_v22 = vadd.f32 %v3201_v13, %v3136_v2 }
0x156a   : > { %v6463_v12 = vpop.eup %6462 }
0x156b   : > { %5940 = vmatpush3.bf16.msra.mxu0 %v3077_v47  ;;  %v3063_v10 = vmul.f32 %v6463_v12, %v7562_v37  ;;  %v6166_v12 = vld [vmem:[#allocation2 + $0x28] sm:$0xff]  }
0x156c   : > { %5941 = vmatprep.subr.bf16.mxu0 %v6579_v0  ;;  %v3131_v23 = vpop.permute.xlu0 %3130 }
0x156d   : > { %v3076_v8 = vpack.c.bf16 %v3063_v10, %v3062_v61  ;;  %v3199_v3 = vadd.f32 %v3198_v59, %v3131_v23  ;;  %v6165_v59 = vld [vmem:[#allocation2 + $0x30] sm:$0xff]   ;;  %v6167_v61 = vld [vmem:[#allocation2 + $0x20] sm:$0xff]   ;;  %v6168_v10 = vld [vmem:[#allocation2 + $0x18] sm:$0xff]  }
0x156e   : > { %v6465_v32 = vpop.eup %6464 }
0x156f   : > { %v6467_v25 = vpop.eup %6466  ;;  %5942 = vmatpush3.bf16.msra.mxu0 %v3076_v8  ;;  %v3061_v44 = vmul.f32 %v6465_v32, %v7565_v62  ;;  %v3213_v20 = vpack.c.bf16 %v3202_v22, %v3199_v3 }
0x1570   : > { %5943 = vmatprep.subr.bf16.mxu0 %v6579_v0  ;;  %v3060_v34 = vmul.f32 %v6467_v25, %v7567_v7  ;;  %v3141_v7 = vpop.permute.xlu1 %3140 }
0x1572   : > { %v6469_v54 = vpop.eup %6468  ;;  %v3075_v15 = vpack.c.bf16 %v3061_v44, %v3060_v34 }
0x1573   : > { %v6471_v6 = vpop.eup %6470  ;;  %v3059_v37 = vmul.f32 %v6469_v54, %v7571_v21 }
0x1574   : > { %5944 = vmatpush3.bf16.msra.mxu0 %v3075_v15  ;;  %v3058_v40 = vmul.f32 %v6471_v6, %v7573_v43  ;;  %v3146_v21 = vpop.permute.xlu1 %3145 }
0x1575   : > { %5945 = vmatprep.subr.bf16.mxu0 %v6579_v0  ;;  %v3210_v43 = vadd.f32 %v5958_v18, %v3146_v21 }
0x1576   : > { %v3074_v62 = vpack.c.bf16 %v3059_v37, %v3058_v40 }
0x1578   : > { %5946 = vmatpush3.bf16.msra.mxu0 %v3074_v62  ;;  %v3285_v18 = vpop.permute.xlu1 %3284 }
0x1579   : > { %5959 = vmatprep.subr.bf16.mxu0 %v7610_v31 }
0x157b   : > { %5948 = vmatmul.mubr.bf16.vlgmr.msra.gmra.mxu0 %v6582_v50  ;;  %v3207_v50 = vadd.f32 %v5957_v19, %v3141_v7  ;;  %v6171_v7 = vld [vmem:[#allocation2] sm:$0xff]  }
0x157c   : > { %5960 = vmatpush3.bf16.msra.mxu0 %v7610_v31  ;;  %5975 = vmatprep.mubr.bf16.mxu0 %v3213_v20  ;;  %v3289_v32 = vpop.permute.xlu1 %3288  ;;  %v6170_v20 = vld [vmem:[#allocation2 + $0x8] sm:$0xff]  }
0x157d   : > { %5961 = vmatprep.subr.bf16.mxu0 %v7616_v39  ;;  %v3214_v31 = vpack.c.bf16 %v3210_v43, %v3207_v50 }
0x1580   : > { %5962 = vmatpush3.bf16.msra.mxu0 %v7616_v39  ;;  %v3293_v25 = vpop.permute.xlu1 %3292 }
0x1581   : > { %5963 = vmatprep.subr.bf16.mxu0 %v3079_v55 }
0x1584   : > { %5964 = vmatpush3.bf16.msra.mxu0 %v3079_v55  ;;  %v3297_v40 = vpop.permute.xlu1 %3296 }
0x1585   : > { %5965 = vmatprep.subr.bf16.mxu0 %v3078_v48 }
0x1588   : > { %5966 = vmatpush3.bf16.msra.mxu0 %v3078_v48 }
0x1589   : > { %5967 = vmatprep.subr.bf16.mxu0 %v3077_v47 }
0x158c   : > { %5968 = vmatpush3.bf16.msra.mxu0 %v3077_v47  ;;  %v6164_v47 = vld [vmem:[#allocation2 + $0x38] sm:$0xff]  }
0x158d   : > { %5969 = vmatprep.subr.bf16.mxu0 %v3076_v8 }
0x1590   : > { %5970 = vmatpush3.bf16.msra.mxu0 %v3076_v8  ;;  %v6169_v8 = vld [vmem:[#allocation2 + $0x10] sm:$0xff]  }
0x1591   : > { %5971 = vmatprep.subr.bf16.mxu0 %v3075_v15 }
0x1594   : > { %5972 = vmatpush3.bf16.msra.mxu0 %v3075_v15 }
0x1595   : > { %5973 = vmatprep.subr.bf16.mxu0 %v3074_v62 }
0x1598   : > { %5974 = vmatpush3.bf16.msra.mxu0 %v3074_v62 }
0x1599   : > { %3967 = vmatprep.subr.mxu0 %v6579_v0 }
0x159b   : > { %5976 = vmatmul.mubr.bf16.vlgmr.msra.gmra.mxu0 %v3214_v31 }
0x163b   : > { %v3116_v28 = vpop.f32.mrf.mxu0 }
0x163c   : > { %v3117_v41 = vadd.f32 1e-09, %v3116_v28 }
0x163d   : > { %v5949_v39 = vpop.f32.mrf.mxu0 }
0x163e   : > { %6472 = vrcp.f32 %v3117_v41 }
0x163f   : > { %v3119_v30 = vpop.f32.mrf.mxu0 }
0x1641   : > { %v5950_v24 = vpop.f32.mrf.mxu0 }
0x164b   : > { %v6473_v49 = vpop.eup %6472 }
0x164c   : > { %v3267_v29 = vrot.slane %v6473_v49, %v6914_v36  ;;  %v6163_v36 = vld [vmem:[%s8404_s5 + $0x38] sm:$0xff]  }
0x165b   : > { %v5977_v38 = vpop.f32.mrf.mxu0 }
0x165c   : > { %v3270_v5 = vmul.f32 %v5977_v38, %v3267_v29 }
0x165d   : > { %v3249_v55 = vpop.f32.mrf.mxu0 }
0x165e   : > { %v3268_v16 = vmul.f32 %v3267_v29, %v3249_v55  ;;  %v3279_v26 = vsub.f32 %v7456_v27, %v3270_v5 }
0x165f   : > { %v5978_v51 = vpop.f32.mrf.mxu0 }
0x1660   : > { %v3271_v42 = vmul.f32 %v5978_v51, %v3267_v29  ;;  %v3277_v53 = vsub.f32 %v7453_v60, %v3268_v16 }
0x1661   : > { %v3252_v63 = vpop.f32.mrf.mxu0 }
0x1662   : > { %v3280_v48 = vsub.f32 %v7450_v9, %v3271_v42  ;;  %v3269_v19 = vmul.f32 %v3267_v29, %v3252_v63 }
0x1664   : > { %v3278_v57 = vsub.f32 %v7459_v11, %v3269_v19  ;;  %v3282_v17 = vpack.c.bf16 %v3280_v48, %v3279_v26 }
0x1666   : > { %5979 = vmatprep.subr.bf16.mxu1 %v3282_v17  ;;  %v3281_v56 = vpack.c.bf16 %v3278_v57, %v3277_v53 }
0x1667   : > { %5980 = vmatpush3.bf16.msra.mxu1 %v3282_v17 }
0x1668   : > { %5981 = vmatprep.subr.bf16.mxu1 %v3281_v56 }
0x166b   : > { %5982 = vmatpush3.bf16.msra.mxu1 %v3281_v56 }
0x166c   : > { %3704 = vmatprep.subr.bf16.mxu1 %v6581_v45 }
0x166e   : > { %5984 = vmatmul.mubr.msk.bf16.vlgmr.msra.gmra.mxu1 %vm495_vm1, %v6163_v36 }
0x166f   : > { %3705 = vmatpush1.bf16.msra.mxu1 %v6164_v47 }
0x1670   : > { %3706 = vmatprep.subr.bf16.mxu1 %v6581_v45 }
0x1673   : > { %3707 = vmatpush1.bf16.msra.mxu1 %v6165_v59 }
0x1674   : > { %3708 = vmatprep.subr.bf16.mxu1 %v6581_v45 }
0x1677   : > { %3709 = vmatpush1.bf16.msra.mxu1 %v6166_v12 }
0x1678   : > { %3710 = vmatprep.subr.bf16.mxu1 %v6581_v45 }
0x167b   : > { %3711 = vmatpush1.bf16.msra.mxu1 %v6167_v61 }
0x167c   : > { %3712 = vmatprep.subr.bf16.mxu1 %v6581_v45 }
0x167f   : > { %3713 = vmatpush1.bf16.msra.mxu1 %v6168_v10 }
0x1680   : > { %3714 = vmatprep.subr.bf16.mxu1 %v6581_v45 }
0x1683   : > { %3715 = vmatpush1.bf16.msra.mxu1 %v6169_v8 }
0x1684   : > { %3716 = vmatprep.subr.bf16.mxu1 %v6581_v45 }
0x1687   : > { %3717 = vmatpush1.bf16.msra.mxu1 %v6170_v20 }
0x1688   : > { %3718 = vmatprep.subr.bf16.mxu1 %v6581_v45 }
0x168b   : > { %3719 = vmatpush1.bf16.msra.mxu1 %v6171_v7 }
0x168c   : > { %3732 = vmatprep.subr.bf16.mxu1 %v6581_v45 }
0x172e   : > { %v5985_v44 = vpop.f32.mrf.mxu1 }
0x172f   : > { %v7663_v34 = vadd.f32 %v5985_v44, %v3293_v25 }
0x1730   : > { %v3349_v23 = vpop.f32.mrf.mxu1 }
0x1731   : > { %3368 = vadd.xlane.f32.xlu0 %v7663_v34  ;;  %v3374_v13 = vmul.f32 %v7663_v34, %v7663_v34  ;;  %v7668_v15 = vadd.f32 %v3349_v23, %v3285_v18 }
0x1732   : > { %v5986_v54 = vpop.f32.mrf.mxu1 }
0x1733   : > { %3380 = vadd.xlane.f32.xlu1 %v3374_v13  ;;  %v3372_v2 = vmul.f32 %v7668_v15, %v7668_v15  ;;  %v7676_v3 = vadd.f32 %v5986_v54, %v3297_v40 }
0x1734   : > { %v3352_v6 = vpop.f32.mrf.mxu1 }
0x1735   : > { %v7670_v37 = vadd.f32 %v3352_v6, %v3289_v32  ;;  %3364 = vadd.xlane.f32.xlu0 %v7668_v15  ;;  %v3375_v22 = vmul.f32 %v7676_v3, %v7676_v3 }
0x1737   : > { %3366 = vadd.xlane.f32.xlu1 %v7670_v37  ;;  %v3373_v62 = vmul.f32 %v7670_v37, %v7670_v37 }
0x1739   : > { %3376 = vadd.xlane.f32.xlu0 %v3372_v2 }
0x173d   : > { %3370 = vadd.xlane.f32.xlu0 %v7676_v3 }
0x1741   : > { %3382 = vadd.xlane.f32.xlu0 %v3375_v22 }
0x1748   : > { %3425 = vperm.xlu1 %6136, %v7586_v46  }
0x174c   : > { %6138 = vset.pattern.permute.xlu1 %v6585_v14 }
0x1757   : > { %3429 = vperm.xlu0 %6137, %v7597_v1  }
0x175b   : > { %6143 = vset.pattern.permute.xlu0 %v6583_v52 }
0x176c   : > { %3378 = vadd.xlane.f32.xlu1 %v3373_v62 }
0x177d   : > { %3445 = vperm.xlu1 %6138, %v7586_v46  }
0x1781   : > { %3449 = vperm.xlu1 %6138, %v7597_v1  }
0x1785   : > { %6139 = vset.pattern.permute.xlu1 %v6584_v58  ;;  %v6174_v58 = vld [vmem:[%s8408_s9 + $0x4] ss:$8 sps:$4 sm:$0xff]  }
0x1786   : > { %3417 = vperm.xlu1 %6139, %v7591_v35   ;;  %5336 = vmatprep.mubr.msk.bf16.mxu1 %vm495_vm1, %v6174_v58 }
0x178a   : > { %3421 = vperm.xlu1 %6139, %v7580_v33  }
0x178e   : > { %6140 = vset.pattern.permute.xlu1 %v6585_v14 }
0x178f   : > { %3437 = vperm.xlu1 %6140, %v7591_v35  }
0x1793   : > { %3441 = vperm.xlu1 %6140, %v7580_v33  }
0x1797   : > { %6141 = vset.pattern.permute.xlu1 %v6581_v45 }
0x17ba   : > { %v3369_v14 = vpop.xlane.xlu0 %3368 }
0x17bc   : > { %v3381_v46 = vpop.xlane.xlu1 %3380 }
0x17be   : > { %v3365_v35 = vpop.xlane.xlu0 %3364 }
0x17c0   : > { %v3367_v33 = vpop.xlane.xlu1 %3366 }
0x17c1   : > { %v3384_v21 = vadd.f32 %v3367_v33, %v3365_v35 }
0x17c2   : > { %v3377_v1 = vpop.xlane.xlu0 %3376 }
0x17c3   : > { %v3385_v43 = vadd.f32 %v3384_v21, %v3369_v14 }
0x17c4   : > { %v3426_v39 = vpop.permute.xlu1 %3425 }
0x17c6   : > { %v3371_v50 = vpop.xlane.xlu0 %3370 }
0x17c7   : > { %v3386_v31 = vadd.f32 %v3385_v43, %v3371_v50 }
0x17c9   : > { %v3387_v4 = vrot.slane %v3386_v31, 4 }
0x17ca   : > { %v3383_v29 = vpop.xlane.xlu0 %3382 }
0x17cb   : > { %v3388_v28 = vadd.f32 %v3387_v4, %v3386_v31 }
0x17cd   : > { %v3389_v30 = vrot.slane %v3388_v28, 2 }
0x17cf   : > { %v3390_v49 = vadd.f32 %v3389_v30, %v3388_v28  ;;  %v6183_v30 = vld [vmem:[%s8408_s9 + $0x34] ss:$8 sps:$4 sm:$0xff]  }
0x17d1   : > { %v3391_v5 = vrot.slane %v3390_v49, 1 }
0x17d2   : > { %v3430_v23 = vpop.permute.xlu0 %3429 }
0x17d3   : > { %v3392_v63 = vadd.f32 %v3391_v5, %v3390_v49  ;;  %v6188_v49 = vld [vmem:[%s8408_s9 + $0x40] ss:$8 sps:$4 sm:$0xff]  }
0x17d4   : > { %v6194_v5 = vld [vmem:[%s8408_s9 + $0x60] ss:$8 sps:$4 sm:$0xff]  }
0x17d5   : > { %v3393_v19 = vmul.f32 0.00024414063, %v3392_v63  ;;  %v6200_v63 = vld [vmem:[%s8408_s9 + $0x80] ss:$8 sps:$4 sm:$0xff]  }
0x17d7   : > { %v3404_v36 = vmul.f32 %v3393_v19, %v3393_v19  ;;  %v3408_v8 = vsub.f32 %v7663_v34, %v3393_v19  ;;  %v3406_v18 = vsub.f32 %v7668_v15, %v3393_v19  ;;  %v3407_v32 = vsub.f32 %v7670_v37, %v3393_v19 }
0x17d8   : > { %v3409_v25 = vsub.f32 %v7676_v3, %v3393_v19 }
0x17f5   : > { %v3379_v24 = vpop.xlane.xlu1 %3378 }
0x17f6   : > { %v3394_v41 = vadd.f32 %v3379_v24, %v3377_v1  ;;  %v6185_v24 = vld [vmem:[%s8408_s9 + $0x30] ss:$8 sps:$4 sm:$0xff]  }
0x17f8   : > { %v3395_v38 = vadd.f32 %v3394_v41, %v3381_v46  ;;  %v6186_v41 = vld [vmem:[%s8408_s9 + $0x44] ss:$8 sps:$4 sm:$0xff]  }
0x17f9   : > { %v3446_v42 = vpop.permute.xlu1 %3445 }
0x17fa   : > { %v3396_v55 = vadd.f32 %v3395_v38, %v3383_v29  ;;  %v6189_v38 = vld [vmem:[%s8408_s9 + $0x54] ss:$8 sps:$4 sm:$0xff]   ;;  %v6191_v29 = vld [vmem:[%s8408_s9 + $0x50] ss:$8 sps:$4 sm:$0xff]  }
0x17fc   : > { %v3397_v51 = vrot.slane %v3396_v55, 4 }
0x17fd   : > { %v3450_v57 = vpop.permute.xlu1 %3449 }
0x17fe   : > { %v3398_v16 = vadd.f32 %v3397_v51, %v3396_v55  ;;  %v6192_v55 = vld [vmem:[%s8408_s9 + $0x64] ss:$8 sps:$4 sm:$0xff]   ;;  %v6195_v51 = vld [vmem:[%s8408_s9 + $0x74] ss:$8 sps:$4 sm:$0xff]  }
0x1800   : > { %v3399_v26 = vrot.slane %v3398_v16, 2 }
0x1801   : > { %v3418_v59 = vpop.permute.xlu1 %3417 }
0x1802   : > { %v3400_v48 = vadd.f32 %v3399_v26, %v3398_v16  ;;  %v6197_v16 = vld [vmem:[%s8408_s9 + $0x70] ss:$8 sps:$4 sm:$0xff]   ;;  %v6201_v26 = vld [vmem:[%s8408_s9 + $0x94] ss:$8 sps:$4 sm:$0xff]  }
0x1804   : > { %v3401_v53 = vrot.slane %v3400_v48, 1 }
0x1805   : > { %v3422_v61 = vpop.permute.xlu1 %3421 }
0x1806   : > { %v3402_v17 = vadd.f32 %v3401_v53, %v3400_v48  ;;  %v6203_v48 = vld [vmem:[%s8408_s9 + $0x90] ss:$8 sps:$4 sm:$0xff]  }
0x1808   : > { %v3403_v56 = vmul.f32 0.00024414063, %v3402_v17 }
0x180a   : > { %v3405_v47 = vsub.f32 %v3403_v56, %v3404_v36  ;;  %v3438_v10 = vpop.permute.xlu1 %3437 }
0x180c   : > { %v3410_v12 = vadd.f32 1e-05, %v3405_v47 }
0x180e   : > { %6474 = vrsqrt.f32 %v3410_v12  ;;  %v3442_v40 = vpop.permute.xlu1 %3441 }
0x181b   : > { %v6475_v44 = vpop.eup %6474 }
0x181c   : > { %v3414_v13 = vmul.f32 %v6475_v44, %v3408_v8  ;;  %v3412_v54 = vmul.f32 %v6475_v44, %v3406_v18  ;;  %v3413_v6 = vmul.f32 %v6475_v44, %v3407_v32  ;;  %v3415_v2 = vmul.f32 %v6475_v44, %v3409_v25 }
0x181e   : > { %v3434_v22 = vmul.f32 %v3426_v39, %v3414_v13  ;;  %v3432_v62 = vmul.f32 %v3418_v59, %v3412_v54  ;;  %v3433_v20 = vmul.f32 %v3422_v61, %v3413_v6  ;;  %v3435_v7 = vmul.f32 %v3430_v23, %v3415_v2  ;;  %v6176_v39 = vld [vmem:[%s8408_s9] ss:$8 sps:$4 sm:$0xff]  }
0x1820   : > { %v3454_v58 = vadd.f32 %v3446_v42, %v3434_v22  ;;  %v3452_v14 = vadd.f32 %v3438_v10, %v3432_v62  ;;  %v3455_v34 = vadd.f32 %v3450_v57, %v3435_v7  ;;  %v3453_v46 = vadd.f32 %v3442_v40, %v3433_v20  ;;  %v6198_v42 = vld [vmem:[%s8408_s9 + $0x84] ss:$8 sps:$4 sm:$0xff]  }
0x1822   : > { %v3458_v15 = vmax.f32 %v3454_v58, 0.0  ;;  %v3456_v35 = vmax.f32 %v3452_v14, 0.0  ;;  %v3459_v37 = vmax.f32 %v3455_v34, 0.0  ;;  %v3457_v33 = vmax.f32 %v3453_v46, 0.0 }
0x1824   : > { %v3462_v3 = vadd.f32 %v3458_v15, %v7456_v27  ;;  %v3460_v1 = vadd.f32 %v3456_v35, %v7453_v60  ;;  %v3463_v21 = vadd.f32 %v3459_v37, %v7450_v9  ;;  %v3461_v50 = vadd.f32 %v3457_v33, %v7459_v11  ;;  %v6177_v9 = vld [vmem:[%s8408_s9 + $0x14] ss:$8 sps:$4 sm:$0xff]   ;;  %v6179_v60 = vld [vmem:[%s8408_s9 + $0x10] ss:$8 sps:$4 sm:$0xff]   ;;  %v6180_v27 = vld [vmem:[%s8408_s9 + $0x24] ss:$8 sps:$4 sm:$0xff]  }
0x1825   : > { %v6182_v11 = vld [vmem:[%s8408_s9 + $0x20] ss:$8 sps:$4 sm:$0xff]  }
0x1826   : > { %v5449_v43 = vpack.c.bf16 %v3463_v21, %v3462_v3  ;;  %v5444_v31 = vpack.c.bf16 %v3461_v50, %v3460_v1 }
0x1828   : > { %5458 = vst [vmem:[#allocation2 + $0x48] sm:$0xff] %v5449_v43   ;;  %5457 = vst [vmem:[#allocation2 + $0x40] sm:$0xff] %v5444_v31  }
0x182f   : > { %v6172_v4 = vld [vmem:[#allocation2 + $0x48] sm:$0xff]   ;;  %v6173_v28 = vld [vmem:[#allocation2 + $0x40] sm:$0xff]  }
0x1830   : > { %3733 = vmatpush2.bf16.msra.mxu1 %v6172_v4 }
0x1831   : > { %3734 = vmatprep.subr.bf16.mxu1 %v6581_v45 }
0x1834   : > { %3735 = vmatpush2.bf16.msra.mxu1 %v6173_v28 }
0x1837   : > { %3737 = vmatmul.mubr.bf16.vlgmr.msra.gmra.mxu1 %v6176_v39 }
0x1838   : > { %5337 = vmatprep.mubr.msk.bf16.mxu1 %vm495_vm1, %v6177_v9 }
0x183f   : > { %3745 = vmatmul.mubr.bf16.gmra.mxu1 %v6179_v60 }
0x1840   : > { %5338 = vmatprep.mubr.msk.bf16.mxu1 %vm495_vm1, %v6180_v27 }
0x1847   : > { %3753 = vmatmul.mubr.bf16.gmra.mxu1 %v6182_v11 }
0x1848   : > { %5339 = vmatprep.mubr.msk.bf16.mxu1 %vm495_vm1, %v6183_v30  ;;  %v7854_v30 = vld [vmem:[%s8410_s11 + $0x8] sm:$0xff] }
0x1849   : > { %5346 = vmatprep.mubr.msk.f32.mxu0 %vm495_vm1, %v7854_v30 }
0x184f   : > { %3761 = vmatmul.mubr.bf16.gmra.mxu1 %v6185_v24 }
0x1850   : > { %5340 = vmatprep.mubr.msk.bf16.mxu1 %vm495_vm1, %v6186_v41 }
0x1857   : > { %3769 = vmatmul.mubr.bf16.gmra.mxu1 %v6188_v49 }
0x1858   : > { %5341 = vmatprep.mubr.msk.bf16.mxu1 %vm495_vm1, %v6189_v38 }
0x185f   : > { %3777 = vmatmul.mubr.bf16.gmra.mxu1 %v6191_v29 }
0x1860   : > { %5342 = vmatprep.mubr.msk.bf16.mxu1 %vm495_vm1, %v6192_v55 }
0x1867   : > { %3785 = vmatmul.mubr.bf16.gmra.mxu1 %v6194_v5 }
0x1868   : > { %5343 = vmatprep.mubr.msk.bf16.mxu1 %vm495_vm1, %v6195_v51 }
0x186f   : > { %3793 = vmatmul.mubr.bf16.gmra.mxu1 %v6197_v16 }
0x1870   : > { %5344 = vmatprep.mubr.msk.bf16.mxu1 %vm495_vm1, %v6198_v42 }
0x1877   : > { %3801 = vmatmul.mubr.bf16.gmra.mxu1 %v6200_v63 }
0x1878   : > { %5345 = vmatprep.mubr.msk.bf16.mxu1 %vm495_vm1, %v6201_v26 }
0x187f   : > { %3809 = vmatmul.mubr.bf16.gmra.mxu1 %v6203_v48 }
0x18f7   : > { %v7777_v19 = vpop.f32.mrf.mxu1 }
0x18f8   : > { %v3901_v5 = vmul.f32 %v7777_v19, %v7777_v19 }
0x18f9   : > { %v3740_v53 = vpop.f32.mrf.mxu1 }
0x18fb   : > { %v7779_v57 = vpop.f32.mrf.mxu1 }
0x18fc   : > { %v3902_v16 = vmul.f32 %v7779_v57, %v7779_v57 }
0x18fd   : > { %v3743_v17 = vpop.f32.mrf.mxu1 }
0x18ff   : > { %v7781_v56 = vpop.f32.mrf.mxu1 }
0x1900   : > { %v3903_v29 = vmul.f32 %v7781_v56, %v7781_v56 }
0x1901   : > { %v3748_v36 = vpop.f32.mrf.mxu1 }
0x1903   : > { %v7783_v47 = vpop.f32.mrf.mxu1 }
0x1904   : > { %v3904_v51 = vmul.f32 %v7783_v47, %v7783_v47 }
0x1905   : > { %v3751_v59 = vpop.f32.mrf.mxu1 }
0x1907   : > { %v7785_v12 = vpop.f32.mrf.mxu1 }
0x1908   : > { %v3905_v49 = vmul.f32 %v7785_v12, %v7785_v12 }
0x1909   : > { %v3756_v61 = vpop.f32.mrf.mxu1 }
0x190b   : > { %v7787_v10 = vpop.f32.mrf.mxu1 }
0x190c   : > { %v3906_v55 = vmul.f32 %v7787_v10, %v7787_v10 }
0x190d   : > { %v3759_v8 = vpop.f32.mrf.mxu1 }
0x190f   : > { %v7789_v18 = vpop.f32.mrf.mxu1 }
0x1910   : > { %v3907_v24 = vmul.f32 %v7789_v18, %v7789_v18 }
0x1911   : > { %v3764_v32 = vpop.f32.mrf.mxu1 }
0x1913   : > { %v7791_v25 = vpop.f32.mrf.mxu1 }
0x1914   : > { %v3908_v38 = vmul.f32 %v7791_v25, %v7791_v25 }
0x1915   : > { %v3767_v44 = vpop.f32.mrf.mxu1 }
0x1917   : > { %v7793_v23 = vpop.f32.mrf.mxu1 }
0x1918   : > { %v3909_v27 = vmul.f32 %v7793_v23, %v7793_v23 }
0x1919   : > { %v3772_v13 = vpop.f32.mrf.mxu1 }
0x191b   : > { %v7795_v54 = vpop.f32.mrf.mxu1 }
0x191c   : > { %v3910_v41 = vmul.f32 %v7795_v54, %v7795_v54 }
0x191d   : > { %v3775_v6 = vpop.f32.mrf.mxu1 }
0x191f   : > { %v7797_v2 = vpop.f32.mrf.mxu1 }
0x1920   : > { %v3911_v9 = vmul.f32 %v7797_v2, %v7797_v2 }
0x1921   : > { %v3780_v40 = vpop.f32.mrf.mxu1 }
0x1923   : > { %v7799_v22 = vpop.f32.mrf.mxu1 }
0x1924   : > { %v3912_v11 = vmul.f32 %v7799_v22, %v7799_v22 }
0x1925   : > { %v3783_v62 = vpop.f32.mrf.mxu1 }
0x1927   : > { %v7801_v20 = vpop.f32.mrf.mxu1 }
0x1928   : > { %v3913_v28 = vmul.f32 %v7801_v20, %v7801_v20 }
0x1929   : > { %v3788_v7 = vpop.f32.mrf.mxu1 }
0x192b   : > { %v7803_v58 = vpop.f32.mrf.mxu1 }
0x192c   : > { %v3914_v60 = vmul.f32 %v7803_v58, %v7803_v58 }
0x192d   : > { %v3791_v14 = vpop.f32.mrf.mxu1 }
0x192f   : > { %v7805_v34 = vpop.f32.mrf.mxu1 }
0x1930   : > { %8423 = vst [vmem:[#allocation6_spill] sm:$0xff] %v7805_v34  ;;  %3889 = vadd.xlane.f32.xlu0 %v7805_v34  ;;  %v3915_v4 = vmul.f32 %v7805_v34, %v7805_v34 }
0x1931   : > { %v3796_v46 = vpop.f32.mrf.mxu1 }
0x1933   : > { %v7808_v15 = vpop.f32.mrf.mxu1 }
0x1934   : > { %8424 = vst [vmem:[#allocation7_spill] sm:$0xff] %v7808_v15  ;;  %3885 = vadd.xlane.f32.xlu0 %v7801_v20  ;;  %3891 = vadd.xlane.f32.xlu1 %v7808_v15  ;;  %v3916_v39 = vmul.f32 %v7808_v15, %v7808_v15 }
0x1935   : > { %v3799_v35 = vpop.f32.mrf.mxu1 }
0x1937   : > { %v7812_v37 = vpop.f32.mrf.mxu1 }
0x1938   : > { %8425 = vst [vmem:[#allocation8_spill] sm:$0xff] %v7812_v37  ;;  %3881 = vadd.xlane.f32.xlu0 %v7797_v2  ;;  %3887 = vadd.xlane.f32.xlu1 %v7803_v58  ;;  %v3917_v63 = vmul.f32 %v7812_v37, %v7812_v37 }
0x1939   : > { %v3804_v33 = vpop.f32.mrf.mxu1 }
0x193b   : > { %v7816_v3 = vpop.f32.mrf.mxu1 }
0x193c   : > { %8426 = vst [vmem:[#allocation9_spill] sm:$0xff] %v7816_v3  ;;  %3877 = vadd.xlane.f32.xlu0 %v7793_v23  ;;  %3883 = vadd.xlane.f32.xlu1 %v7799_v22  ;;  %v3918_v48 = vmul.f32 %v7816_v3, %v7816_v3 }
0x193d   : > { %v3807_v1 = vpop.f32.mrf.mxu1 }
0x193f   : > { %v7820_v21 = vpop.f32.mrf.mxu1 }
0x1940   : > { %8427 = vst [vmem:[#allocation10_spill] sm:$0xff] %v7820_v21  ;;  %3873 = vadd.xlane.f32.xlu0 %v7789_v18  ;;  %3879 = vadd.xlane.f32.xlu1 %v7795_v54  ;;  %v3919_v42 = vmul.f32 %v7820_v21, %v7820_v21 }
0x1941   : > { %v3812_v50 = vpop.f32.mrf.mxu1 }
0x1943   : > { %v7824_v43 = vpop.f32.mrf.mxu1 }
0x1944   : > { %8428 = vst [vmem:[#allocation11_spill] sm:$0xff] %v7824_v43  ;;  %3869 = vadd.xlane.f32.xlu0 %v7785_v12  ;;  %3875 = vadd.xlane.f32.xlu1 %v7791_v25  ;;  %v3920_v26 = vmul.f32 %v7824_v43, %v7824_v43 }
0x1945   : > { %v3815_v31 = vpop.f32.mrf.mxu1 }
0x1948   : > { %3865 = vadd.xlane.f32.xlu0 %v7781_v56  ;;  %3871 = vadd.xlane.f32.xlu1 %v7787_v10 }
0x194c   : > { %3861 = vadd.xlane.f32.xlu0 %v7777_v19  ;;  %3867 = vadd.xlane.f32.xlu1 %v7783_v47 }
0x1950   : > { %3863 = vadd.xlane.f32.xlu1 %v7779_v57  ;;  %3897 = vadd.xlane.f32.xlu0 %v7820_v21 }
0x1954   : > { %3893 = vadd.xlane.f32.xlu0 %v7812_v37  ;;  %3899 = vadd.xlane.f32.xlu1 %v7824_v43 }
0x1958   : > { %3949 = vadd.xlane.f32.xlu0 %v3915_v4  ;;  %3895 = vadd.xlane.f32.xlu1 %v7816_v3 }
0x195c   : > { %3945 = vadd.xlane.f32.xlu0 %v3913_v28  ;;  %3951 = vadd.xlane.f32.xlu1 %v3916_v39  ;;  %v7905_v28 = vld [vmem:[%s8410_s11] sm:$0xff]  ;;  %v7911_v39 = vld [vmem:[%s8410_s11 + $0x18] sm:$0xff] }
0x1960   : > { %3941 = vadd.xlane.f32.xlu0 %v3911_v9  ;;  %3947 = vadd.xlane.f32.xlu1 %v3914_v60 }
0x1964   : > { %3937 = vadd.xlane.f32.xlu0 %v3909_v27  ;;  %3943 = vadd.xlane.f32.xlu1 %v3912_v11  ;;  %v3839_v27 = vld [vmem:[%s8410_s11 + $0x10] sm:$0xff] }
0x1968   : > { %3933 = vadd.xlane.f32.xlu0 %v3907_v24  ;;  %3939 = vadd.xlane.f32.xlu1 %v3910_v41 }
0x196c   : > { %3929 = vadd.xlane.f32.xlu0 %v3905_v49  ;;  %3935 = vadd.xlane.f32.xlu1 %v3908_v38 }
0x1970   : > { %3925 = vadd.xlane.f32.xlu0 %v3903_v29  ;;  %3931 = vadd.xlane.f32.xlu1 %v3906_v55 }
0x1974   : > { %3921 = vadd.xlane.f32.xlu0 %v3901_v5  ;;  %3927 = vadd.xlane.f32.xlu1 %v3904_v51 }
0x1978   : > { %3957 = vadd.xlane.f32.xlu0 %v3919_v42  ;;  %3923 = vadd.xlane.f32.xlu1 %v3902_v16 }
0x197c   : > { %3953 = vadd.xlane.f32.xlu0 %v3917_v63  ;;  %3959 = vadd.xlane.f32.xlu1 %v3920_v26 }
0x1980   : > { %3955 = vadd.xlane.f32.xlu1 %v3918_v48 }
0x19b9   : > { %v3890_v53 = vpop.xlane.xlu0 %3889 }
0x19bd   : > { %v3886_v17 = vpop.xlane.xlu0 %3885  ;;  %v3892_v36 = vpop.xlane.xlu1 %3891 }
0x19be   : > { %3968 = vmatpush1.msra.mxu0 %v3892_v36  ;;  %v3841_v36 = vld [vmem:[%s8411_s12] sm:$0xff] }
0x19bf   : > { %3969 = vmatprep.subr.mxu0 %v6579_v0  ;;  %6025 = vmatprep.mubr.msk.f32.mxu1 %vm4126_vm4, %v3841_v36 }
0x19c0   : > { %3970 = vmatpush1.msra.mxu0 %v3890_v53 }
0x19c1   : > { %v3882_v59 = vpop.xlane.xlu0 %3881  ;;  %3971 = vmatprep.subr.mxu0 %v6579_v0  ;;  %v3888_v61 = vpop.xlane.xlu1 %3887 }
0x19c2   : > { %3972 = vmatpush1.msra.mxu0 %v3888_v61  ;;  %v3819_v61 = vld [vmem:[%s8409_s10 + $0x10] sm:$0xff] }
0x19c3   : > { %3973 = vmatprep.subr.mxu0 %v6579_v0 }
0x19c4   : > { %3974 = vmatpush1.msra.mxu0 %v3886_v17 }
0x19c5   : > { %v3878_v8 = vpop.xlane.xlu0 %3877  ;;  %3975 = vmatprep.subr.mxu0 %v6579_v0  ;;  %v3884_v32 = vpop.xlane.xlu1 %3883 }
0x19c6   : > { %3976 = vmatpush1.msra.mxu0 %v3884_v32  ;;  %v3823_v32 = vld [vmem:[%s8409_s10 + $0x30] sm:$0xff] }
0x19c7   : > { %3977 = vmatprep.subr.mxu0 %v6579_v0 }
0x19c8   : > { %3978 = vmatpush1.msra.mxu0 %v3882_v59  ;;  %v3818_v59 = vld [vmem:[%s8409_s10 + $0x8] sm:$0xff] }
0x19c9   : > { %v3874_v44 = vpop.xlane.xlu0 %3873  ;;  %3979 = vmatprep.subr.mxu0 %v6579_v0  ;;  %v3880_v13 = vpop.xlane.xlu1 %3879  ;;  %4902 = vperm.xlu0 %6143, %v3818_v59  }
0x19ca   : > { %3980 = vmatpush1.msra.mxu0 %v3880_v13  ;;  %v3827_v13 = vld [vmem:[%s8409_s10 + $0x50] sm:$0xff] }
0x19cb   : > { %3981 = vmatprep.subr.mxu0 %v6579_v0 }
0x19cc   : > { %3982 = vmatpush1.msra.mxu0 %v3878_v8  ;;  %v3821_v8 = vld [vmem:[%s8409_s10 + $0x20] sm:$0xff] }
0x19cd   : > { %v3870_v6 = vpop.xlane.xlu0 %3869  ;;  %3983 = vmatprep.subr.mxu0 %v6579_v0  ;;  %v3876_v40 = vpop.xlane.xlu1 %3875  ;;  %4914 = vperm.xlu0 %6143, %v3821_v8  }
0x19ce   : > { %3984 = vmatpush1.msra.mxu0 %v3876_v40  ;;  %v3831_v40 = vld [vmem:[%s8409_s10 + $0x70] sm:$0xff] }
0x19cf   : > { %3985 = vmatprep.subr.mxu0 %v6579_v0 }
0x19d0   : > { %3986 = vmatpush1.msra.mxu0 %v3874_v44  ;;  %v3825_v44 = vld [vmem:[%s8409_s10 + $0x40] sm:$0xff] }
0x19d1   : > { %v3866_v62 = vpop.xlane.xlu0 %3865  ;;  %3987 = vmatprep.subr.mxu0 %v6579_v0  ;;  %v3872_v7 = vpop.xlane.xlu1 %3871  ;;  %4922 = vperm.xlu0 %6143, %v3823_v32  }
0x19d2   : > { %3988 = vmatpush1.msra.mxu0 %v3872_v7  ;;  %v7983_v7 = vld [vmem:[%s8409_s10 + $0x90] sm:$0xff] }
0x19d3   : > { %3989 = vmatprep.subr.mxu0 %v6579_v0 }
0x19d4   : > { %3990 = vmatpush1.msra.mxu0 %v3870_v6  ;;  %v3829_v6 = vld [vmem:[%s8409_s10 + $0x60] sm:$0xff] }
0x19d5   : > { %v3862_v14 = vpop.xlane.xlu0 %3861  ;;  %3991 = vmatprep.subr.mxu0 %v6579_v0  ;;  %v3868_v46 = vpop.xlane.xlu1 %3867  ;;  %4930 = vperm.xlu0 %6143, %v3825_v44  }
0x19d6   : > { %3992 = vmatpush1.msra.mxu0 %v3868_v46 }
0x19d7   : > { %3993 = vmatprep.subr.mxu0 %v6579_v0 }
0x19d8   : > { %3994 = vmatpush1.msra.mxu0 %v3866_v62  ;;  %v3833_v62 = vld [vmem:[%s8409_s10 + $0x80] sm:$0xff] }
0x19d9   : > { %3995 = vmatprep.subr.mxu0 %v6579_v0  ;;  %v3864_v35 = vpop.xlane.xlu1 %3863  ;;  %v3898_v33 = vpop.xlane.xlu0 %3897  ;;  %4938 = vperm.xlu0 %6143, %v3827_v13  }
0x19da   : > { %3996 = vmatpush1.msra.mxu0 %v3864_v35 }
0x19db   : > { %3997 = vmatprep.subr.mxu0 %v6579_v0 }
0x19dc   : > { %3998 = vmatpush1.msra.mxu0 %v3862_v14  ;;  %v3820_v14 = vld [vmem:[%s8409_s10 + $0x18] sm:$0xff] }
0x19dd   : > { %4023 = vmatprep.subr.mxu0 %v6579_v0  ;;  %v3894_v1 = vpop.xlane.xlu0 %3893  ;;  %v3900_v50 = vpop.xlane.xlu1 %3899  ;;  %4946 = vperm.xlu0 %6143, %v3829_v6  }
0x19de   : > { %4024 = vmatpush2.msra.mxu0 %v3900_v50 }
0x19df   : > { %4025 = vmatprep.subr.mxu0 %v6579_v0 }
0x19e0   : > { %4026 = vmatpush2.msra.mxu0 %v3898_v33  ;;  %v3822_v33 = vld [vmem:[%s8409_s10 + $0x28] sm:$0xff] }
0x19e1   : > { %v3950_v31 = vpop.xlane.xlu0 %3949  ;;  %4027 = vmatprep.subr.mxu0 %v6579_v0  ;;  %v3896_v4 = vpop.xlane.xlu1 %3895  ;;  %4954 = vperm.xlu0 %6143, %v3831_v40  }
0x19e2   : > { %4028 = vmatpush2.msra.mxu0 %v3896_v4 }
0x19e3   : > { %4029 = vmatprep.subr.mxu0 %v6579_v0 }
0x19e4   : > { %4030 = vmatpush2.msra.mxu0 %v3894_v1 }
0x19e5   : > { %v3946_v9 = vpop.xlane.xlu0 %3945  ;;  %4032 = vmatmul.mubr.f32.vlgmr.msra.gmra.mxu0 %v7905_v28  ;;  %4042 = vmatprep.subr.mxu0 %v6579_v0  ;;  %v3952_v60 = vpop.xlane.xlu1 %3951 }
0x19e6   : > { %4043 = vmatpush1.msra.mxu0 %v3952_v60  ;;  %5347 = vmatprep.mubr.msk.f32.mxu0 %vm495_vm1, %v7911_v39  ;;  %v3826_v60 = vld [vmem:[%s8409_s10 + $0x48] sm:$0xff] }
0x19e7   : > { %4044 = vmatprep.subr.mxu0 %v6579_v0  ;;  %4962 = vperm.xlu0 %6143, %v3833_v62  }
0x19e8   : > { %4045 = vmatpush1.msra.mxu0 %v3950_v31 }
0x19e9   : > { %v3942_v11 = vpop.xlane.xlu0 %3941  ;;  %4037 = vmatmul.mubr.f32.gmra.mxu0 %v3839_v27  ;;  %4046 = vmatprep.subr.mxu0 %v6579_v0  ;;  %v3948_v24 = vpop.xlane.xlu1 %3947 }
0x19ea   : > { %4047 = vmatpush1.msra.mxu0 %v3948_v24  ;;  %5348 = vmatprep.mubr.msk.f32.mxu0 %vm495_vm1, %v7854_v30  ;;  %v3828_v24 = vld [vmem:[%s8409_s10 + $0x58] sm:$0xff] }
0x19eb   : > { %4048 = vmatprep.subr.mxu0 %v6579_v0  ;;  %6144 = vset.pattern.permute.xlu0 %v6581_v45 }
0x19ec   : > { %4049 = vmatpush1.msra.mxu0 %v3946_v9  ;;  %4784 = vperm.xlu0 %6144, %v3818_v59   ;;  %v8011_v9 = vld [vmem:[%s8411_s12 + $0x10] sm:$0xff]  ;;  %v3858_v59 = vld [vmem:[%s8411_s12 + $0x88] sm:$0xff] }
0x19ed   : > { %v3938_v41 = vpop.xlane.xlu0 %3937  ;;  %4050 = vmatprep.subr.mxu0 %v6579_v0  ;;  %v3944_v49 = vpop.xlane.xlu1 %3943 }
0x19ee   : > { %4051 = vmatpush1.msra.mxu0 %v3944_v49  ;;  %v8046_v49 = vld [vmem:[%s8411_s12 + $0x30] sm:$0xff] }
0x19ef   : > { %4052 = vmatprep.subr.mxu0 %v6579_v0 }
0x19f0   : > { %4053 = vmatpush1.msra.mxu0 %v3942_v11  ;;  %4794 = vperm.xlu0 %6144, %v3820_v14   ;;  %v8029_v11 = vld [vmem:[%s8411_s12 + $0x20] sm:$0xff] }
0x19f1   : > { %v3934_v38 = vpop.xlane.xlu0 %3933  ;;  %4054 = vmatprep.subr.mxu0 %v6579_v0  ;;  %v3940_v29 = vpop.xlane.xlu1 %3939 }
0x19f2   : > { %4055 = vmatpush1.msra.mxu0 %v3940_v29  ;;  %v3848_v29 = vld [vmem:[%s8411_s12 + $0x38] sm:$0xff] }
0x19f3   : > { %4056 = vmatprep.subr.mxu0 %v6579_v0 }
0x19f4   : > { %4057 = vmatpush1.msra.mxu0 %v3938_v41  ;;  %4804 = vperm.xlu0 %6144, %v3822_v33   ;;  %v8041_v41 = vld [vmem:[%s8411_s12 + $0x28] sm:$0xff] }
0x19f5   : > { %v3930_v30 = vpop.xlane.xlu0 %3929  ;;  %4058 = vmatprep.subr.mxu0 %v6579_v0  ;;  %v3936_v55 = vpop.xlane.xlu1 %3935 }
0x19f6   : > { %4059 = vmatpush1.msra.mxu0 %v3936_v55  ;;  %v3832_v55 = vld [vmem:[%s8409_s10 + $0x78] sm:$0xff] }
0x19f7   : > { %4060 = vmatprep.subr.mxu0 %v6579_v0 }
0x19f8   : > { %4061 = vmatpush1.msra.mxu0 %v3934_v38  ;;  %v3830_v38 = vld [vmem:[%s8409_s10 + $0x68] sm:$0xff] }
0x19f9   : > { %v3926_v5 = vpop.xlane.xlu0 %3925  ;;  %4062 = vmatprep.subr.mxu0 %v6579_v0  ;;  %v3932_v51 = vpop.xlane.xlu1 %3931 }
0x19fa   : > { %4063 = vmatpush1.msra.mxu0 %v3932_v51  ;;  %v3851_v51 = vld [vmem:[%s8411_s12 + $0x50] sm:$0xff] }
0x19fb   : > { %4064 = vmatprep.subr.mxu0 %v6579_v0 }
0x19fc   : > { %4065 = vmatpush1.msra.mxu0 %v3930_v30  ;;  %v3849_v30 = vld [vmem:[%s8411_s12 + $0x40] sm:$0xff] }
0x19fd   : > { %4066 = vmatprep.subr.mxu0 %v6579_v0  ;;  %v3928_v16 = vpop.xlane.xlu1 %3927  ;;  %v3922_v42 = vpop.xlane.xlu0 %3921 }
0x19fe   : > { %4067 = vmatpush1.msra.mxu0 %v3928_v16  ;;  %v3834_v16 = vld [vmem:[%s8409_s10 + $0x88] sm:$0xff] }
0x19ff   : > { %4068 = vmatprep.subr.mxu0 %v6579_v0 }
0x1a00   : > { %4069 = vmatpush1.msra.mxu0 %v3926_v5  ;;  %v3850_v5 = vld [vmem:[%s8411_s12 + $0x48] sm:$0xff] }
0x1a01   : > { %4070 = vmatprep.subr.mxu0 %v6579_v0  ;;  %v3924_v63 = vpop.xlane.xlu1 %3923  ;;  %v3958_v26 = vpop.xlane.xlu0 %3957 }
0x1a02   : > { %4071 = vmatpush1.msra.mxu0 %v3924_v63  ;;  %v3853_v63 = vld [vmem:[%s8411_s12 + $0x60] sm:$0xff] }
0x1a03   : > { %4072 = vmatprep.subr.mxu0 %v6579_v0 }
0x1a04   : > { %4073 = vmatpush1.msra.mxu0 %v3922_v42  ;;  %v3852_v42 = vld [vmem:[%s8411_s12 + $0x58] sm:$0xff] }
0x1a05   : > { %4098 = vmatprep.subr.mxu0 %v6579_v0  ;;  %v3960_v48 = vpop.xlane.xlu1 %3959  ;;  %v3954_v17 = vpop.xlane.xlu0 %3953 }
0x1a06   : > { %4099 = vmatpush2.msra.mxu0 %v3960_v48  ;;  %v3854_v48 = vld [vmem:[%s8411_s12 + $0x68] sm:$0xff] }
0x1a07   : > { %4100 = vmatprep.subr.mxu0 %v6579_v0 }
0x1a08   : > { %4101 = vmatpush2.msra.mxu0 %v3958_v26  ;;  %v8086_v26 = vld [vmem:[%s8409_s10 + $0x98] sm:$0xff] }
0x1a09   : > { %4102 = vmatprep.subr.mxu0 %v6579_v0  ;;  %v3956_v53 = vpop.xlane.xlu1 %3955 }
0x1a0a   : > { %4103 = vmatpush2.msra.mxu0 %v3956_v53  ;;  %v3855_v53 = vld [vmem:[%s8411_s12 + $0x70] sm:$0xff] }
0x1a0b   : > { %4104 = vmatprep.subr.mxu0 %v6579_v0  ;;  %v3817_v0 = vld [vmem:[%s8409_s10] sm:$0xff] }
0x1a0c   : > { %4105 = vmatpush2.msra.mxu0 %v3954_v17  ;;  %4779 = vperm.xlu1 %6141, %v3817_v0   ;;  %v3856_v17 = vld [vmem:[%s8411_s12 + $0x78] sm:$0xff] }
0x1a0d   : > { %4107 = vmatmul.mubr.f32.vlgmr.msra.gmra.mxu0 %v7905_v28  ;;  %v3824_v28 = vld [vmem:[%s8409_s10 + $0x38] sm:$0xff] }
0x1a0e   : > { %5349 = vmatprep.mubr.msk.f32.mxu0 %vm495_vm1, %v7911_v39  ;;  %v8005_v39 = vld [vmem:[%s8411_s12 + $0x8] sm:$0xff]  ;;  %4814 = vperm.xlu0 %6144, %v3824_v28  }
0x1a10   : > { %4789 = vperm.xlu1 %6141, %v3819_v61  }
0x1a11   : > { %4112 = vmatmul.mubr.f32.gmra.mxu0 %v3839_v27  ;;  %v8024_v27 = vld [vmem:[%s8411_s12 + $0x18] sm:$0xff] }
0x1a12   : > { %5991 = vmatprep.mubr.msk.f32.mxu0 %vm4126_vm4, %v3841_v36  ;;  %4824 = vperm.xlu0 %6144, %v3826_v60   ;;  %v3857_v36 = vld [vmem:[%s8411_s12 + $0x80] sm:$0xff] }
0x1a14   : > { %4799 = vperm.xlu1 %6141, %v3821_v8  }
0x1a16   : > { %4834 = vperm.xlu0 %6144, %v3828_v24  }
0x1a18   : > { %4809 = vperm.xlu1 %6141, %v3823_v32  }
0x1a1a   : > { %4844 = vperm.xlu0 %6144, %v3830_v38  }
0x1a1c   : > { %4819 = vperm.xlu1 %6141, %v3825_v44   ;;  %v3860_v44 = vld [vmem:[%s8411_s12 + $0x98] sm:$0xff] }
0x1a1e   : > { %4854 = vperm.xlu0 %6144, %v3832_v55  }
0x1a20   : > { %4829 = vperm.xlu1 %6141, %v3827_v13  }
0x1a22   : > { %4864 = vperm.xlu0 %6144, %v3834_v16  }
0x1a24   : > { %4839 = vperm.xlu1 %6141, %v3829_v6  }
0x1a26   : > { %4874 = vperm.xlu0 %6144, %v8086_v26  }
0x1a28   : > { %4849 = vperm.xlu1 %6141, %v3831_v40  }
0x1a2c   : > { %4859 = vperm.xlu1 %6141, %v3833_v62  }
0x1a30   : > { %4869 = vperm.xlu1 %6141, %v7983_v7  }
0x1a34   : > { %6142 = vset.pattern.permute.xlu1 %v6583_v52 }
0x1a35   : > { %4898 = vperm.xlu1 %6142, %v3817_v0  }
0x1a39   : > { %4906 = vperm.xlu1 %6142, %v3819_v61   ;;  %v3859_v61 = vld [vmem:[%s8411_s12 + $0x90] sm:$0xff] }
0x1a3d   : > { %4910 = vperm.xlu1 %6142, %v3820_v14  }
0x1a41   : > { %4918 = vperm.xlu1 %6142, %v3822_v33  }
0x1a45   : > { %4926 = vperm.xlu1 %6142, %v3824_v28  }
0x1a49   : > { %4934 = vperm.xlu1 %6142, %v3826_v60  }
0x1a4d   : > { %4942 = vperm.xlu1 %6142, %v3828_v24  }
0x1a51   : > { %4950 = vperm.xlu1 %6142, %v3830_v38  }
0x1a55   : > { %4958 = vperm.xlu1 %6142, %v3832_v55  }
0x1a59   : > { %4966 = vperm.xlu1 %6142, %v3834_v16  }
0x1a5d   : > { %6145 = vset.pattern.permute.xlu1 %v6581_v45 }
0x1aa5   : > { %v4033_v46 = vpop.f32.mrf.mxu0 }
0x1aa6   : > { %v7995_v4 = vmul.f32 0.00078125, %v4033_v46 }
0x1aa7   : > { %v4035_v35 = vpop.f32.mrf.mxu0 }
0x1aa8   : > { %v4122_v14 = vmul.f32 %v7995_v4, %v7995_v4 }
0x1aa9   : > { %v4038_v1 = vpop.f32.mrf.mxu0 }
0x1aaa   : > { %v7993_v50 = vmul.f32 0.00078125, %v4038_v1 }
0x1aab   : > { %v4040_v31 = vpop.f32.mrf.mxu0 }
0x1aac   : > { %5987 = vmatprep.subr.mxu0 %v7993_v50  ;;  %v4123_v40 = vmul.f32 %v7993_v50, %v7993_v50  ;;  %v8149_v31 = vpop.permute.xlu1 %4779 }
0x1aad   : > { %5988 = vmatpush3.msra.mxu0 %v7993_v50 }
0x1aae   : > { %5989 = vmatprep.subr.mxu0 %v7995_v4 }
0x1aaf   : > { %5990 = vmatpush3.msra.mxu0 %v7995_v4 }
0x1ab0   : > { %5992 = vmatmul.mubr.msk.f32.vlgmr.msra.gmra.mxu0 %vm4126_vm4, %v8005_v39 }
0x1ab1   : > { %5994 = vmatprep.mubr.msk.f32.mxu0 %vm4126_vm4, %v8011_v9 }
0x1ab4   : > { %5995 = vmatmul.mubr.msk.f32.gmra.mxu0 %vm4126_vm4, %v8024_v27 }
0x1ab5   : > { %5997 = vmatprep.mubr.msk.f32.mxu0 %vm4126_vm4, %v8029_v11 }
0x1ab8   : > { %5998 = vmatmul.mubr.msk.f32.gmra.mxu0 %vm4126_vm4, %v8041_v41 }
0x1ab9   : > { %6000 = vmatprep.mubr.msk.f32.mxu0 %vm4126_vm4, %v8046_v49 }
0x1abc   : > { %6001 = vmatmul.mubr.msk.f32.gmra.mxu0 %vm4126_vm4, %v3848_v29 }
0x1abd   : > { %6003 = vmatprep.mubr.msk.f32.mxu0 %vm4126_vm4, %v3849_v30 }
0x1ac0   : > { %6004 = vmatmul.mubr.msk.f32.gmra.mxu0 %vm4126_vm4, %v3850_v5 }
0x1ac1   : > { %6006 = vmatprep.mubr.msk.f32.mxu0 %vm4126_vm4, %v3851_v51 }
0x1ac4   : > { %6007 = vmatmul.mubr.msk.f32.gmra.mxu0 %vm4126_vm4, %v3852_v42 }
0x1ac5   : > { %6009 = vmatprep.mubr.msk.f32.mxu0 %vm4126_vm4, %v3853_v63 }
0x1ac8   : > { %6010 = vmatmul.mubr.msk.f32.gmra.mxu0 %vm4126_vm4, %v3854_v48 }
0x1ac9   : > { %6012 = vmatprep.mubr.msk.f32.mxu0 %vm4126_vm4, %v3855_v53 }
0x1acc   : > { %6013 = vmatmul.mubr.msk.f32.gmra.mxu0 %vm4126_vm4, %v3856_v17 }
0x1acd   : > { %v4108_v0 = vpop.f32.mrf.mxu0  ;;  %6015 = vmatprep.mubr.msk.f32.mxu0 %vm4126_vm4, %v3857_v36 }
0x1ace   : > { %v4120_v13 = vmul.f32 0.00078125, %v4108_v0 }
0x1acf   : > { %v4110_v8 = vpop.f32.mrf.mxu0 }
0x1ad0   : > { %6016 = vmatmul.mubr.msk.f32.gmra.mxu0 %vm4126_vm4, %v3858_v59  ;;  %v4124_v45 = vsub.f32 %v4120_v13, %v4122_v14 }
0x1ad1   : > { %v4113_v32 = vpop.f32.mrf.mxu0  ;;  %6018 = vmatprep.mubr.msk.f32.mxu0 %vm4126_vm4, %v3859_v61 }
0x1ad2   : > { %v4121_v6 = vmul.f32 0.00078125, %v4113_v32 }
0x1ad3   : > { %v4115_v62 = vpop.f32.mrf.mxu0 }
0x1ad4   : > { %v4125_v46 = vsub.f32 %v4121_v6, %v4123_v40  ;;  %6019 = vmatmul.mubr.msk.f32.gmra.mxu0 %vm4126_vm4, %v3860_v44 }
0x1ad6   : > { %6021 = vmatprep.subr.mxu1 %v4125_v46 }
0x1ad7   : > { %6022 = vmatpush3.msra.mxu1 %v4125_v46 }
0x1ad8   : > { %6023 = vmatprep.subr.mxu1 %v4124_v45 }
0x1ad9   : > { %6024 = vmatpush3.msra.mxu1 %v4124_v45 }
0x1ada   : > { %6026 = vmatmul.mubr.msk.f32.vlgmr.msra.gmra.mxu1 %vm4126_vm4, %v8005_v39 }
0x1adb   : > { %6028 = vmatprep.mubr.msk.f32.mxu1 %vm4126_vm4, %v8011_v9  ;;  %v8151_v9 = vpop.permute.xlu1 %4789 }
0x1ade   : > { %6029 = vmatmul.mubr.msk.f32.gmra.mxu1 %vm4126_vm4, %v8024_v27 }
0x1adf   : > { %6031 = vmatprep.mubr.msk.f32.mxu1 %vm4126_vm4, %v8029_v11  ;;  %v8153_v24 = vpop.permute.xlu1 %4799 }
0x1ae2   : > { %6032 = vmatmul.mubr.msk.f32.gmra.mxu1 %vm4126_vm4, %v8041_v41 }
0x1ae3   : > { %6034 = vmatprep.mubr.msk.f32.mxu1 %vm4126_vm4, %v8046_v49 }
0x1ae6   : > { %6035 = vmatmul.mubr.msk.f32.gmra.mxu1 %vm4126_vm4, %v3848_v29  ;;  %v8155_v29 = vpop.permute.xlu1 %4809 }
0x1ae7   : > { %6037 = vmatprep.mubr.msk.f32.mxu1 %vm4126_vm4, %v3849_v30 }
0x1aea   : > { %6038 = vmatmul.mubr.msk.f32.gmra.mxu1 %vm4126_vm4, %v3850_v5 }
0x1aeb   : > { %6040 = vmatprep.mubr.msk.f32.mxu1 %vm4126_vm4, %v3851_v51  ;;  %v8157_v51 = vpop.permute.xlu1 %4819 }
0x1aee   : > { %6041 = vmatmul.mubr.msk.f32.gmra.mxu1 %vm4126_vm4, %v3852_v42 }
0x1aef   : > { %6043 = vmatprep.mubr.msk.f32.mxu1 %vm4126_vm4, %v3853_v63 }
0x1af2   : > { %6044 = vmatmul.mubr.msk.f32.gmra.mxu1 %vm4126_vm4, %v3854_v48  ;;  %v8159_v48 = vpop.permute.xlu1 %4829 }
0x1af3   : > { %6046 = vmatprep.mubr.msk.f32.mxu1 %vm4126_vm4, %v3855_v53  ;;  %v8161_v53 = vpop.permute.xlu0 %4902 }
0x1af6   : > { %6047 = vmatmul.mubr.msk.f32.gmra.mxu1 %vm4126_vm4, %v3856_v17  ;;  %v8163_v0 = vpop.permute.xlu1 %4839 }
0x1af7   : > { %6049 = vmatprep.mubr.msk.f32.mxu1 %vm4126_vm4, %v3857_v36  ;;  %8429 = vst [vmem:[#allocation12_spill] sm:$0xff] %v8163_v0 }
0x1afa   : > { %6050 = vmatmul.mubr.msk.f32.gmra.mxu1 %vm4126_vm4, %v3858_v59  ;;  %v8167_v62 = vpop.permute.xlu1 %4849 }
0x1afb   : > { %6052 = vmatprep.mubr.msk.f32.mxu1 %vm4126_vm4, %v3859_v61  ;;  %v8165_v61 = vpop.permute.xlu0 %4914  ;;  %8430 = vst [vmem:[#allocation13_spill] sm:$0xff] %v8167_v62 }
0x1afe   : > { %6053 = vmatmul.mubr.msk.f32.gmra.mxu1 %vm4126_vm4, %v3860_v44 }
0x1aff   : > { %v8169_v46 = vpop.permute.xlu0 %4922 }
0x1b70   : > { %v5993_v35 = vpop.f32.mrf.mxu0 }
0x1b71   : > { %4359 = vperm.xlu0 %6144, %v5993_v35  }
0x1b72   : > { %v4253_v33 = vpop.f32.mrf.mxu0 }
0x1b73   : > { %4354 = vperm.xlu1 %6145, %v4253_v33  }
0x1b74   : > { %v5996_v1 = vpop.f32.mrf.mxu0 }
0x1b76   : > { %v4263_v50 = vpop.f32.mrf.mxu0 }
0x1b77   : > { %4369 = vperm.xlu1 %6145, %v5996_v1  }
0x1b78   : > { %v5999_v4 = vpop.f32.mrf.mxu0 }
0x1b7a   : > { %v4273_v28 = vpop.f32.mrf.mxu0 }
0x1b7b   : > { %4364 = vperm.xlu1 %6145, %v4263_v50  }
0x1b7c   : > { %v6002_v39 = vpop.f32.mrf.mxu0 }
0x1b7e   : > { %v4283_v60 = vpop.f32.mrf.mxu0 }
0x1b7f   : > { %4379 = vperm.xlu1 %6145, %v5999_v4   ;;  %v8171_v4 = vpop.permute.xlu1 %4859 }
0x1b80   : > { %v6005_v27 = vpop.f32.mrf.mxu0  ;;  %8431 = vst [vmem:[#allocation14_spill] sm:$0xff] %v8171_v4 }
0x1b81   : > { %4399 = vperm.xlu0 %6144, %v6005_v27  }
0x1b82   : > { %v4293_v11 = vpop.f32.mrf.mxu0 }
0x1b83   : > { %4374 = vperm.xlu1 %6145, %v4273_v28  }
0x1b84   : > { %v6008_v41 = vpop.f32.mrf.mxu0 }
0x1b85   : > { %4409 = vperm.xlu0 %6144, %v6008_v41  }
0x1b86   : > { %v4303_v49 = vpop.f32.mrf.mxu0 }
0x1b87   : > { %4389 = vperm.xlu1 %6145, %v6002_v39   ;;  %v8173_v39 = vpop.permute.xlu0 %4930 }
0x1b88   : > { %v6011_v38 = vpop.f32.mrf.mxu0 }
0x1b89   : > { %4419 = vperm.xlu0 %6144, %v6011_v38  }
0x1b8a   : > { %v4313_v30 = vpop.f32.mrf.mxu0 }
0x1b8b   : > { %4384 = vperm.xlu1 %6145, %v4283_v60  }
0x1b8c   : > { %v6014_v55 = vpop.f32.mrf.mxu0 }
0x1b8d   : > { %4429 = vperm.xlu0 %6144, %v6014_v55   ;;  %v8175_v55 = vpop.permute.xlu1 %4869 }
0x1b8e   : > { %v4323_v5 = vpop.f32.mrf.mxu0  ;;  %8432 = vst [vmem:[#allocation15_spill] sm:$0xff] %v8175_v55 }
0x1b8f   : > { %4394 = vperm.xlu1 %6145, %v4293_v11  }
0x1b90   : > { %v6017_v16 = vpop.f32.mrf.mxu0 }
0x1b91   : > { %4439 = vperm.xlu0 %6144, %v6017_v16  }
0x1b92   : > { %v4333_v42 = vpop.f32.mrf.mxu0 }
0x1b93   : > { %4404 = vperm.xlu1 %6145, %v4303_v49  }
0x1b94   : > { %v6020_v63 = vpop.f32.mrf.mxu0 }
0x1b95   : > { %4449 = vperm.xlu0 %6144, %v6020_v63  }
0x1b96   : > { %v4343_v6 = vpop.f32.mrf.mxu0 }
0x1b97   : > { %4414 = vperm.xlu1 %6145, %v4313_v30  }
0x1b9a   : > { %v6027_v17 = vpop.f32.mrf.mxu1 }
0x1b9b   : > { %v4544_v36 = vadd.f32 1e-05, %v6027_v17  ;;  %4424 = vperm.xlu1 %6145, %v4323_v5  }
0x1b9c   : > { %v4538_v59 = vpop.f32.mrf.mxu1 }
0x1b9d   : > { %6476 = vrsqrt.f32 %v4544_v36  ;;  %v4539_v8 = vadd.f32 1e-05, %v4538_v59 }
0x1b9e   : > { %v6030_v32 = vpop.f32.mrf.mxu1 }
0x1b9f   : > { %6478 = vrsqrt.f32 %v4539_v8  ;;  %v4554_v44 = vadd.f32 1e-05, %v6030_v32  ;;  %4434 = vperm.xlu1 %6145, %v4333_v42   ;;  %v8177_v42 = vpop.permute.xlu0 %4938 }
0x1ba0   : > { %v4548_v13 = vpop.f32.mrf.mxu1  ;;  %8433 = vst [vmem:[#allocation16_spill] sm:$0xff] %v8177_v42 }
0x1ba1   : > { %6480 = vrsqrt.f32 %v4554_v44  ;;  %v4549_v40 = vadd.f32 1e-05, %v4548_v13  ;;  %v8179_v13 = vpop.permute.xlu1 %4898 }
0x1ba2   : > { %v6033_v14 = vpop.f32.mrf.mxu1 }
0x1ba3   : > { %6482 = vrsqrt.f32 %v4549_v40  ;;  %v4564_v45 = vadd.f32 1e-05, %v6033_v14  ;;  %4444 = vperm.xlu1 %6145, %v4343_v6   ;;  %v8181_v14 = vpop.permute.xlu0 %4946 }
0x1ba4   : > { %v4558_v35 = vpop.f32.mrf.mxu1  ;;  %8434 = vst [vmem:[#allocation17_spill] sm:$0xff] %v8181_v14 }
0x1ba5   : > { %6484 = vrsqrt.f32 %v4564_v45  ;;  %v4559_v33 = vadd.f32 1e-05, %v4558_v35 }
0x1ba6   : > { %v6036_v1 = vpop.f32.mrf.mxu1 }
0x1ba7   : > { %6486 = vrsqrt.f32 %v4559_v33  ;;  %v4574_v50 = vadd.f32 1e-05, %v6036_v1 }
0x1ba8   : > { %v4568_v28 = vpop.f32.mrf.mxu1 }
0x1ba9   : > { %6488 = vrsqrt.f32 %v4574_v50  ;;  %v4569_v60 = vadd.f32 1e-05, %v4568_v28 }
0x1baa   : > { %v6477_v27 = vpop.eup %6476  ;;  %v6039_v11 = vpop.f32.mrf.mxu1 }
0x1bab   : > { %6490 = vrsqrt.f32 %v4569_v60  ;;  %v4584_v41 = vadd.f32 1e-05, %v6039_v11  ;;  %4664 = vperm.xlu0 %6144, %v6477_v27   ;;  %v8183_v27 = vpop.permute.xlu1 %4906 }
0x1bac   : > { %v6479_v49 = vpop.eup %6478  ;;  %v4578_v38 = vpop.f32.mrf.mxu1 }
0x1bad   : > { %6492 = vrsqrt.f32 %v4584_v41  ;;  %v4579_v30 = vadd.f32 1e-05, %v4578_v38  ;;  %4659 = vperm.xlu1 %6145, %v6479_v49   ;;  %v8185_v49 = vpop.permute.xlu0 %4954 }
0x1bae   : > { %v6481_v5 = vpop.eup %6480  ;;  %v6042_v16 = vpop.f32.mrf.mxu1  ;;  %8435 = vst [vmem:[#allocation18_spill] sm:$0xff] %v8185_v49 }
0x1baf   : > { %6494 = vrsqrt.f32 %v4579_v30  ;;  %v4594_v63 = vadd.f32 1e-05, %v6042_v16  ;;  %4674 = vperm.xlu0 %6144, %v6481_v5  }
0x1bb0   : > { %v6483_v17 = vpop.eup %6482  ;;  %v4588_v36 = vpop.f32.mrf.mxu1 }
0x1bb1   : > { %6496 = vrsqrt.f32 %v4594_v63  ;;  %v4589_v59 = vadd.f32 1e-05, %v4588_v36  ;;  %4669 = vperm.xlu1 %6145, %v6483_v17  }
0x1bb2   : > { %v6485_v8 = vpop.eup %6484  ;;  %v6045_v32 = vpop.f32.mrf.mxu1 }
0x1bb3   : > { %6498 = vrsqrt.f32 %v4589_v59  ;;  %v4604_v44 = vadd.f32 1e-05, %v6045_v32  ;;  %4684 = vperm.xlu0 %6144, %v6485_v8   ;;  %v8187_v59 = vpop.permute.xlu1 %4910  ;;  %v8189_v32 = vpop.permute.xlu0 %4962 }
0x1bb4   : > { %v6487_v6 = vpop.eup %6486  ;;  %v4598_v40 = vpop.f32.mrf.mxu1  ;;  %8436 = vst [vmem:[#allocation19_spill] sm:$0xff] %v8189_v32 }
0x1bb5   : > { %6500 = vrsqrt.f32 %v4604_v44  ;;  %v4599_v45 = vadd.f32 1e-05, %v4598_v40  ;;  %4679 = vperm.xlu1 %6145, %v6487_v6  }
0x1bb6   : > { %v6489_v35 = vpop.eup %6488  ;;  %v6048_v33 = vpop.f32.mrf.mxu1 }
0x1bb7   : > { %6502 = vrsqrt.f32 %v4599_v45  ;;  %v4614_v1 = vadd.f32 1e-05, %v6048_v33  ;;  %4694 = vperm.xlu0 %6144, %v6489_v35   ;;  %v4785_v33 = vpop.permute.xlu0 %4784 }
0x1bb8   : > { %v6491_v50 = vpop.eup %6490  ;;  %v4608_v28 = vpop.f32.mrf.mxu1 }
0x1bb9   : > { %6504 = vrsqrt.f32 %v4614_v1  ;;  %v4609_v60 = vadd.f32 1e-05, %v4608_v28  ;;  %4689 = vperm.xlu1 %6145, %v6491_v50   ;;  %v8191_v1 = vpop.permute.xlu1 %4918 }
0x1bba   : > { %v6493_v11 = vpop.eup %6492  ;;  %v6051_v41 = vpop.f32.mrf.mxu1 }
0x1bbb   : > { %6506 = vrsqrt.f32 %v4609_v60  ;;  %v4624_v38 = vadd.f32 1e-05, %v6051_v41  ;;  %4704 = vperm.xlu0 %6144, %v6493_v11   ;;  %v8193_v11 = vpop.permute.xlu0 %4794 }
0x1bbc   : > { %v6495_v30 = vpop.eup %6494  ;;  %v4618_v5 = vpop.f32.mrf.mxu1 }
0x1bbd   : > { %6508 = vrsqrt.f32 %v4624_v38  ;;  %v4619_v16 = vadd.f32 1e-05, %v4618_v5  ;;  %4699 = vperm.xlu1 %6145, %v6495_v30   ;;  %v8195_v41 = vpop.permute.xlu1 %4926 }
0x1bbe   : > { %v6497_v63 = vpop.eup %6496  ;;  %v6054_v17 = vpop.f32.mrf.mxu1 }
0x1bbf   : > { %6510 = vrsqrt.f32 %v4619_v16  ;;  %v4634_v36 = vadd.f32 1e-05, %v6054_v17  ;;  %4714 = vperm.xlu0 %6144, %v6497_v63   ;;  %v8197_v5 = vpop.permute.xlu0 %4804 }
0x1bc0   : > { %v6499_v8 = vpop.eup %6498  ;;  %v4628_v44 = vpop.f32.mrf.mxu1 }
0x1bc1   : > { %6512 = vrsqrt.f32 %v4634_v36  ;;  %v4629_v6 = vadd.f32 1e-05, %v4628_v44  ;;  %4709 = vperm.xlu1 %6145, %v6499_v8   ;;  %v8199_v16 = vpop.permute.xlu1 %4934 }
0x1bc2   : > { %v6501_v40 = vpop.eup %6500 }
0x1bc3   : > { %6514 = vrsqrt.f32 %v4629_v6  ;;  %4724 = vperm.xlu0 %6144, %v6501_v40   ;;  %v8205_v63 = vpop.permute.xlu0 %4814 }
0x1bc4   : > { %v6503_v45 = vpop.eup %6502 }
0x1bc5   : > { %4719 = vperm.xlu1 %6145, %v6503_v45   ;;  %v8207_v17 = vpop.permute.xlu1 %4942 }
0x1bc6   : > { %v6505_v35 = vpop.eup %6504 }
0x1bc7   : > { %4734 = vperm.xlu0 %6144, %v6505_v35   ;;  %v8209_v36 = vpop.permute.xlu0 %4824 }
0x1bc8   : > { %v6507_v50 = vpop.eup %6506 }
0x1bc9   : > { %4729 = vperm.xlu1 %6145, %v6507_v50   ;;  %v8211_v8 = vpop.permute.xlu1 %4950 }
0x1bca   : > { %v6509_v28 = vpop.eup %6508  ;;  %8437 = vst [vmem:[#allocation20_spill] sm:$0xff] %v8211_v8 }
0x1bcb   : > { %4744 = vperm.xlu0 %6144, %v6509_v28   ;;  %v8213_v44 = vpop.permute.xlu0 %4834 }
0x1bcc   : > { %v6511_v60 = vpop.eup %6510 }
0x1bcd   : > { %4739 = vperm.xlu1 %6145, %v6511_v60   ;;  %v8215_v6 = vpop.permute.xlu1 %4958 }
0x1bce   : > { %v6513_v38 = vpop.eup %6512  ;;  %8438 = vst [vmem:[#allocation21_spill] sm:$0xff] %v8215_v6 }
0x1bcf   : > { %4754 = vperm.xlu0 %6144, %v6513_v38   ;;  %v8217_v40 = vpop.permute.xlu0 %4844 }
0x1bd0   : > { %v6515_v30 = vpop.eup %6514  ;;  %8439 = vst [vmem:[#allocation22_spill] sm:$0xff] %v8217_v40 }
0x1bd1   : > { %4749 = vperm.xlu1 %6145, %v6515_v30   ;;  %v8219_v45 = vpop.permute.xlu1 %4966 }
0x1bd2   : > { %8440 = vst [vmem:[#allocation23_spill] sm:$0xff] %v8219_v45 }
0x1bd3   : > { %6146 = vset.pattern.permute.xlu0 %v6583_v52 }
0x1bd4   : > { %4970 = vperm.xlu0 %6146, %v7983_v7  }
0x1bd5   : > { %6147 = vset.pattern.permute.xlu1 %v6583_v52  ;;  %v8221_v52 = vpop.permute.xlu0 %4854 }
0x1bd6   : > { %4974 = vperm.xlu1 %6147, %v8086_v26   ;;  %8441 = vst [vmem:[#allocation24_spill] sm:$0xff] %v8221_v52 }
0x1bd9   : > { %v8223_v35 = vpop.permute.xlu0 %4864 }
0x1bda   : > { %8442 = vst [vmem:[#allocation25_spill] sm:$0xff] %v8223_v35 }
0x1bdd   : > { %v8225_v60 = vpop.permute.xlu0 %4874 }
0x1bde   : > { %8443 = vst [vmem:[#allocation26_spill] sm:$0xff] %v8225_v60 }
0x1bec   : > { %v4360_v30 = vpop.permute.xlu0 %4359 }
0x1bed   : > { %v4453_v0 = vsub.f32 %v7779_v57, %v4360_v30 }
0x1bee   : > { %v4355_v7 = vpop.permute.xlu1 %4354 }
0x1bef   : > { %v4452_v8 = vsub.f32 %v7777_v19, %v4355_v7 }
0x1bf2   : > { %v4370_v26 = vpop.permute.xlu1 %4369 }
0x1bf6   : > { %v4365_v50 = vpop.permute.xlu1 %4364 }
0x1bf7   : > { %v4454_v57 = vsub.f32 %v7781_v56, %v4365_v50 }
0x1bfa   : > { %v4380_v28 = vpop.permute.xlu1 %4379 }
0x1bfc   : > { %v8227_v32 = vpop.permute.xlu0 %4399 }
0x1bfe   : > { %v4375_v38 = vpop.permute.xlu1 %4374 }
0x1c00   : > { %v8231_v4 = vpop.permute.xlu0 %4409 }
0x1c02   : > { %v4390_v55 = vpop.permute.xlu1 %4389 }
0x1c03   : > { %v4459_v56 = vsub.f32 %v7791_v25, %v4390_v55 }
0x1c04   : > { %v8237_v35 = vpop.permute.xlu0 %4419 }
0x1c06   : > { %v8229_v21 = vpop.permute.xlu1 %4384 }
0x1c07   : > { %v4458_v55 = vsub.f32 %v7789_v18, %v8229_v21  ;;  %v4461_v18 = vsub.f32 %v7795_v54, %v8227_v32 }
0x1c08   : > { %v8241_v60 = vpop.permute.xlu0 %4429 }
0x1c09   : > { %8444 = vst [vmem:[#allocation27_spill] sm:$0xff] %v8241_v60  ;;  %v4455_v60 = vsub.f32 %v7783_v47, %v4370_v26  ;;  %v4457_v47 = vsub.f32 %v7787_v10, %v4380_v28 }
0x1c0a   : > { %v8233_v45 = vpop.permute.xlu1 %4394 }
0x1c0c   : > { %v8245_v62 = vpop.permute.xlu0 %4439 }
0x1c0d   : > { %8446 = vst [vmem:[#allocation29_spill] sm:$0xff] %v8245_v62 }
0x1c0e   : > { %v8235_v43 = vpop.permute.xlu1 %4404 }
0x1c10   : > { %v8249_v52 = vpop.permute.xlu0 %4449 }
0x1c11   : > { %8448 = vst [vmem:[#allocation31_spill] sm:$0xff] %v8249_v52 }
0x1c12   : > { %v8239_v49 = vpop.permute.xlu1 %4414 }
0x1c16   : > { %v8243_v6 = vpop.permute.xlu1 %4424 }
0x1c17   : > { %8445 = vst [vmem:[#allocation28_spill] sm:$0xff] %v8243_v6 }
0x1c1a   : > { %v8247_v37 = vpop.permute.xlu1 %4434 }
0x1c1b   : > { %8447 = vst [vmem:[#allocation30_spill] sm:$0xff] %v8247_v37 }
0x1c1e   : > { %v8251_v14 = vpop.permute.xlu1 %4444 }
0x1c1f   : > { %8449 = vst [vmem:[#allocation32_spill] sm:$0xff] %v8251_v14 }
0x1c26   : > { %v4665_v3 = vpop.permute.xlu0 %4664 }
0x1c27   : > { %v4758_v34 = vmul.f32 %v4665_v3, %v4453_v0 }
0x1c28   : > { %v4660_v15 = vpop.permute.xlu1 %4659 }
0x1c29   : > { %v4878_v6 = vmul.f32 %v4785_v33, %v4758_v34  ;;  %v4757_v62 = vmul.f32 %v4660_v15, %v4452_v8  ;;  %v4456_v34 = vsub.f32 %v7785_v12, %v4375_v38 }
0x1c2a   : > { %v4675_v40 = vpop.permute.xlu0 %4674 }
0x1c2b   : > { %v4978_v37 = vadd.f32 %v8161_v53, %v4878_v6  ;;  %v4877_v52 = vmul.f32 %v8149_v31, %v4757_v62  ;;  %v4760_v14 = vmul.f32 %v4675_v40, %v4455_v60 }
0x1c2c   : > { %v4670_v30 = vpop.permute.xlu1 %4669 }
0x1c2d   : > { %vm4998_vm5 = vcmp.ge.f32.partialorder %v4978_v37, 0.0  ;;  %v5018_v42 = vmul.f32 0.2, %v4978_v37  ;;  %v4977_v19 = vadd.f32 %v8179_v13, %v4877_v52  ;;  %v4880_v3 = vmul.f32 %v8193_v11, %v4760_v14 }
0x1c2e   : > { %v4759_v15 = vmul.f32 %v4670_v30, %v4454_v57  ;;  %v4685_v0 = vpop.permute.xlu0 %4684 }
0x1c2f   : > { %v5038_v33 = vsel %vm4998_vm5, %v4978_v37, %v5018_v42  ;;  %vm4997_vm6 = vcmp.ge.f32.partialorder %v4977_v19, 0.0  ;;  %v5017_v53 = vmul.f32 0.2, %v4977_v19  ;;  %v4980_v31 = vadd.f32 %v8187_v59, %v4880_v3 }
0x1c30   : > { %5058 = vst [vmem:[%s8268_s28 + $0x8] sm:$0xff] %v5038_v33  ;;  %v4879_v62 = vmul.f32 %v8151_v9, %v4759_v15  ;;  %v4762_v10 = vmul.f32 %v4685_v0, %v4457_v47  ;;  %v4680_v13 = vpop.permute.xlu1 %4679 }
0x1c31   : > { %v5037_v12 = vsel %vm4997_vm6, %v4977_v19, %v5017_v53  ;;  %vm5000_vm7 = vcmp.ge.f32.partialorder %v4980_v31, 0.0  ;;  %v5020_v14 = vmul.f32 0.2, %v4980_v31  ;;  %v4761_v37 = vmul.f32 %v4680_v13, %v4456_v34 }
0x1c32   : > { %5057 = vst [vmem:[%s8268_s28] sm:$0xff] %v5037_v12  ;;  %v4979_v42 = vadd.f32 %v8183_v27, %v4879_v62  ;;  %v4882_v59 = vmul.f32 %v8197_v5, %v4762_v10  ;;  %v4695_v25 = vpop.permute.xlu0 %4694  ;;  %v8450_v62 = vld [vmem:[#allocation16_spill] sm:$0xff]  ;;  %v8451_v10 = vld [vmem:[#allocation22_spill] sm:$0xff]  ;;  %v8453_v12 = vld [vmem:[#allocation7_spill] sm:$0xff] }
0x1c33   : > { %v5040_v11 = vsel %vm5000_vm7, %v4980_v31, %v5020_v14  ;;  %v4881_v8 = vmul.f32 %v8153_v24, %v4761_v37  ;;  %v4764_v9 = vmul.f32 %v4695_v25, %v4459_v56  ;;  %v8454_v14 = vld [vmem:[#allocation28_spill] sm:$0xff]  ;;  %v8455_v37 = vld [vmem:[#allocation6_spill] sm:$0xff] }
0x1c34   : > { %5060 = vst [vmem:[%s8268_s28 + $0x18] sm:$0xff] %v5040_v11  ;;  %vm4999_vm8 = vcmp.ge.f32.partialorder %v4979_v42, 0.0  ;;  %v5019_v6 = vmul.f32 0.2, %v4979_v42  ;;  %v4982_v40 = vadd.f32 %v8191_v1, %v4882_v59  ;;  %v4690_v7 = vpop.permute.xlu1 %4689  ;;  %v8456_v11 = vld [vmem:[#allocation20_spill] sm:$0xff] }
0x1c35   : > { %v4981_v52 = vadd.f32 %v8165_v61, %v4881_v8  ;;  %v4884_v27 = vmul.f32 %v8205_v63, %v4764_v9  ;;  %v4763_v5 = vmul.f32 %v4690_v7, %v4458_v55  ;;  %v4463_v61 = vsub.f32 %v7799_v22, %v8231_v4  ;;  %v8457_v9 = vld [vmem:[#allocation29_spill] sm:$0xff]  ;;  %v8459_v7 = vld [vmem:[#allocation12_spill] sm:$0xff] }
0x1c36   : > { %v5039_v21 = vsel %vm4999_vm8, %v4979_v42, %v5019_v6  ;;  %vm5002_vm9 = vcmp.ge.f32.partialorder %v4982_v40, 0.0  ;;  %v5022_v26 = vmul.f32 0.2, %v4982_v40  ;;  %v4705_v24 = vpop.permute.xlu0 %4704  ;;  %v4460_v63 = vsub.f32 %v7793_v23, %v8233_v45  ;;  %v8458_v6 = vld [vmem:[#allocation9_spill] sm:$0xff] }
0x1c37   : > { %5059 = vst [vmem:[%s8268_s28 + $0x10] sm:$0xff] %v5039_v21  ;;  %vm5001_vm10 = vcmp.ge.f32.partialorder %v4981_v52, 0.0  ;;  %v5021_v50 = vmul.f32 0.2, %v4981_v52  ;;  %v4984_v1 = vadd.f32 %v8195_v41, %v4884_v27  ;;  %v4883_v28 = vmul.f32 %v8155_v29, %v4763_v5 }
0x1c38   : > { %v5042_v60 = vsel %vm5002_vm9, %v4982_v40, %v5022_v26  ;;  %v4766_v54 = vmul.f32 %v4705_v24, %v4461_v18  ;;  %v4700_v32 = vpop.permute.xlu1 %4699  ;;  %v4462_v41 = vsub.f32 %v7797_v2, %v8235_v43  ;;  %v4466_v42 = vsub.f32 %v8455_v37, %v8454_v14  ;;  %v8460_v24 = vld [vmem:[#allocation17_spill] sm:$0xff] }
0x1c39   : > { %5062 = vst [vmem:[%s8268_s28 + $0x28] sm:$0xff] %v5042_v60  ;;  %v5041_v38 = vsel %vm5001_vm10, %v4981_v52, %v5021_v50  ;;  %vm5004_vm11 = vcmp.ge.f32.partialorder %v4984_v1, 0.0  ;;  %v5024_v57 = vmul.f32 0.2, %v4984_v1  ;;  %v4983_v30 = vadd.f32 %v8169_v46, %v4883_v28  ;;  %v8463_v60 = vld [vmem:[#allocation8_spill] sm:$0xff] }
0x1c3a   : > { %5061 = vst [vmem:[%s8268_s28 + $0x20] sm:$0xff] %v5041_v38  ;;  %v4886_v22 = vmul.f32 %v8209_v36, %v4766_v54  ;;  %v4765_v29 = vmul.f32 %v4700_v32, %v4460_v63  ;;  %v4715_v4 = vpop.permute.xlu0 %4714  ;;  %v4465_v46 = vsub.f32 %v7803_v58, %v8237_v35  ;;  %v4464_v58 = vsub.f32 %v7801_v20, %v8239_v49  ;;  %v8462_v63 = vld [vmem:[#allocation30_spill] sm:$0xff]  ;;  %v8464_v38 = vld [vmem:[#allocation13_spill] sm:$0xff] }
0x1c3b   : > { %v5044_v23 = vsel %vm5004_vm11, %v4984_v1, %v5024_v57  ;;  %vm5003_vm12 = vcmp.ge.f32.partialorder %v4983_v30, 0.0  ;;  %v5023_v45 = vmul.f32 0.2, %v4983_v30  ;;  %v4768_v19 = vmul.f32 %v4715_v4, %v4463_v61  ;;  %v8461_v1 = vld [vmem:[#allocation24_spill] sm:$0xff] }
0x1c3c   : > { %5064 = vst [vmem:[%s8268_s28 + $0x38] sm:$0xff] %v5044_v23  ;;  %v4986_v3 = vadd.f32 %v8199_v16, %v4886_v22  ;;  %v4885_v47 = vmul.f32 %v8157_v51, %v4765_v29  ;;  %v4710_v34 = vpop.permute.xlu1 %4709  ;;  %v4469_v40 = vsub.f32 %v8458_v6, %v8457_v9  ;;  %v4468_v54 = vsub.f32 %v8463_v60, %v8462_v63  ;;  %v8465_v22 = vld [vmem:[#allocation21_spill] sm:$0xff]  ;;  %v8466_v23 = vld [vmem:[#allocation18_spill] sm:$0xff] }
0x1c3d   : > { %v5043_v2 = vsel %vm5003_vm12, %v4983_v30, %v5023_v45  ;;  %v4888_v43 = vmul.f32 %v8213_v44, %v4768_v19  ;;  %v4767_v36 = vmul.f32 %v4710_v34, %v4462_v41  ;;  %v8467_v19 = vld [vmem:[#allocation25_spill] sm:$0xff]  ;;  %v8468_v34 = vld [vmem:[#allocation31_spill] sm:$0xff] }
0x1c3e   : > { %5063 = vst [vmem:[%s8268_s28 + $0x30] sm:$0xff] %v5043_v2  ;;  %vm5006_vm13 = vcmp.ge.f32.partialorder %v4986_v3, 0.0  ;;  %v5026_v15 = vmul.f32 0.2, %v4986_v3  ;;  %v4985_v0 = vadd.f32 %v8173_v39, %v4885_v47  ;;  %v4725_v33 = vpop.permute.xlu0 %4724 }
0x1c3f   : > { %v4988_v53 = vadd.f32 %v8207_v17, %v4888_v43  ;;  %v4887_v16 = vmul.f32 %v8159_v48, %v4767_v36  ;;  %v4770_v51 = vmul.f32 %v4725_v33, %v4465_v46  ;;  %v8452_v17 = vld [vmem:[#allocation27_spill] sm:$0xff] }
0x1c40   : > { %v5046_v35 = vsel %vm5006_vm13, %v4986_v3, %v5026_v15  ;;  %vm5005_vm14 = vcmp.ge.f32.partialorder %v4985_v0, 0.0  ;;  %v5025_v31 = vmul.f32 0.2, %v4985_v0  ;;  %v4720_v44 = vpop.permute.xlu1 %4719  ;;  %v4467_v48 = vsub.f32 %v8453_v12, %v8452_v17  ;;  %v8469_v46 = vld [vmem:[#allocation11_spill] sm:$0xff] }
0x1c41   : > { %5066 = vst [vmem:[%s8268_s28 + $0x48] sm:$0xff] %v5046_v35  ;;  %vm5008_vm15 = vcmp.ge.f32.partialorder %v4988_v53, 0.0  ;;  %v5028_v56 = vmul.f32 0.2, %v4988_v53  ;;  %v4987_v39 = vadd.f32 %v8450_v62, %v4887_v16  ;;  %v4890_v13 = vmul.f32 %v8451_v10, %v4770_v51  ;;  %v8470_v33 = vld [vmem:[#allocation23_spill] sm:$0xff]  ;;  %v8471_v16 = vld [vmem:[#allocation14_spill] sm:$0xff] }
0x1c42   : > { %v5045_v59 = vsel %vm5005_vm14, %v4985_v0, %v5025_v31  ;;  %v4769_v20 = vmul.f32 %v4720_v44, %v4464_v58  ;;  %v4735_v49 = vpop.permute.xlu0 %4734  ;;  %v4471_v2 = vsub.f32 %v8469_v46, %v8468_v34  ;;  %v8472_v58 = vld [vmem:[#allocation32_spill] sm:$0xff]  ;;  %v8473_v35 = vld [vmem:[#allocation10_spill] sm:$0xff] }
0x1c43   : > { %5065 = vst [vmem:[%s8268_s28 + $0x40] sm:$0xff] %v5045_v59  ;;  %v5048_v25 = vsel %vm5008_vm15, %v4988_v53, %v5028_v56  ;;  %vm5007_vm0 = vcmp.ge.f32.partialorder %v4987_v39, 0.0  ;;  %v5027_v55 = vmul.f32 0.2, %v4987_v39  ;;  %v4990_v8 = vadd.f32 %v8456_v11, %v4890_v13  ;;  %v8474_v13 = vld [vmem:[#allocation19_spill] sm:$0xff] }
0x1c44   : > { %5068 = vst [vmem:[%s8268_s28 + $0x58] sm:$0xff] %v5048_v25  ;;  %v4889_v52 = vmul.f32 %v8459_v7, %v4769_v20  ;;  %v4772_v27 = vmul.f32 %v4735_v49, %v4467_v48  ;;  %v4730_v5 = vpop.permute.xlu1 %4729  ;;  %v4470_v31 = vsub.f32 %v8473_v35, %v8472_v58  ;;  %v8476_v20 = vld [vmem:[#allocation26_spill] sm:$0xff] }
0x1c45   : > { %v5047_v18 = vsel %vm5007_vm0, %v4987_v39, %v5027_v55  ;;  %vm5010_vm1 = vcmp.ge.f32.partialorder %v4990_v8, 0.0  ;;  %v5030_v21 = vmul.f32 0.2, %v4990_v8  ;;  %v4771_v26 = vmul.f32 %v4730_v5, %v4466_v42  ;;  %v8475_v42 = vld [vmem:[#allocation15_spill] sm:$0xff] }
0x1c46   : > { %5067 = vst [vmem:[%s8268_s28 + $0x50] sm:$0xff] %v5047_v18  ;;  %v4989_v50 = vadd.f32 %v8460_v24, %v4889_v52  ;;  %v4892_v28 = vmul.f32 %v8461_v1, %v4772_v27  ;;  %v4745_v61 = vpop.permute.xlu0 %4744 }
0x1c47   : > { %v5050_v32 = vsel %vm5010_vm1, %v4990_v8, %v5030_v21  ;;  %v4891_v57 = vmul.f32 %v8464_v38, %v4771_v26  ;;  %v4774_v30 = vmul.f32 %v4745_v61, %v4469_v40 }
0x1c48   : > { %5070 = vst [vmem:[%s8268_s28 + $0x68] sm:$0xff] %v5050_v32  ;;  %vm5009_vm2 = vcmp.ge.f32.partialorder %v4989_v50, 0.0  ;;  %v5029_v41 = vmul.f32 0.2, %v4989_v50  ;;  %v4992_v29 = vadd.f32 %v8465_v22, %v4892_v28  ;;  %v4740_v4 = vpop.permute.xlu1 %4739 }
0x1c49   : > { %v4991_v45 = vadd.f32 %v8466_v23, %v4891_v57  ;;  %v4894_v3 = vmul.f32 %v8467_v19, %v4774_v30  ;;  %v4773_v47 = vmul.f32 %v4740_v4, %v4468_v54 }
0x1c4a   : > { %v5049_v43 = vsel %vm5009_vm2, %v4989_v50, %v5029_v41  ;;  %vm5012_vm3 = vcmp.ge.f32.partialorder %v4992_v29, 0.0  ;;  %v5032_v36 = vmul.f32 0.2, %v4992_v29  ;;  %v4755_v15 = vpop.permute.xlu0 %4754 }
0x1c4b   : > { %5069 = vst [vmem:[%s8268_s28 + $0x60] sm:$0xff] %v5049_v43  ;;  %vm5011_vm4 = vcmp.ge.f32.partialorder %v4991_v45, 0.0  ;;  %v5031_v0 = vmul.f32 0.2, %v4991_v45  ;;  %v4994_v53 = vadd.f32 %v8470_v33, %v4894_v3  ;;  %v4893_v51 = vmul.f32 %v8471_v16, %v4773_v47 }
0x1c4c   : > { %v5052_v44 = vsel %vm5012_vm3, %v4992_v29, %v5032_v36  ;;  %v4776_v56 = vmul.f32 %v4755_v15, %v4471_v2  ;;  %v4750_v62 = vpop.permute.xlu1 %4749 }
0x1c4d   : > { %5072 = vst [vmem:[%s8268_s28 + $0x78] sm:$0xff] %v5052_v44  ;;  %v5051_v39 = vsel %vm5011_vm4, %v4991_v45, %v5031_v0  ;;  %vm5014_vm5 = vcmp.ge.f32.partialorder %v4994_v53, 0.0  ;;  %v5034_v10 = vmul.f32 0.2, %v4994_v53  ;;  %v4993_v17 = vadd.f32 %v8474_v13, %v4893_v51 }
0x1c4e   : > { %5071 = vst [vmem:[%s8268_s28 + $0x70] sm:$0xff] %v5051_v39  ;;  %v4775_v12 = vmul.f32 %v4750_v62, %v4470_v31  ;;  %v4896_v49 = vmul.f32 %v8476_v20, %v4776_v56 }
0x1c4f   : > { %v5054_v48 = vsel %vm5014_vm5, %v4994_v53, %v5034_v10  ;;  %vm5013_vm6 = vcmp.ge.f32.partialorder %v4993_v17, 0.0  ;;  %v5033_v14 = vmul.f32 0.2, %v4993_v17  ;;  %v4971_v37 = vpop.permute.xlu0 %4970 }
0x1c50   : > { %5074 = vst [vmem:[%s8268_s28 + $0x88] sm:$0xff] %v5054_v48  ;;  %v4895_v59 = vmul.f32 %v8475_v42, %v4775_v12 }
0x1c51   : > { %v5053_v25 = vsel %vm5013_vm6, %v4993_v17, %v5033_v14  ;;  %v4975_v55 = vpop.permute.xlu1 %4974 }
0x1c52   : > { %5073 = vst [vmem:[%s8268_s28 + $0x80] sm:$0xff] %v5053_v25  ;;  %v4995_v11 = vadd.f32 %v4971_v37, %v4895_v59  ;;  %v4996_v8 = vadd.f32 %v4975_v55, %v4896_v49 }
0x1c54   : > { %vm5015_vm7 = vcmp.ge.f32.partialorder %v4995_v11, 0.0  ;;  %v5035_v9 = vmul.f32 0.2, %v4995_v11  ;;  %vm5016_vm8 = vcmp.ge.f32.partialorder %v4996_v8, 0.0  ;;  %v5036_v6 = vmul.f32 0.2, %v4996_v8 }
0x1c56   : > { %v5055_v40 = vsel %vm5015_vm7, %v4995_v11, %v5035_v9  ;;  %v5056_v7 = vsel %vm5016_vm8, %v4996_v8, %v5036_v6 }
0x1c57   : > { %5075 = vst [vmem:[%s8268_s28 + $0x90] sm:$0xff] %v5055_v40  ;;  %5076 = vst [vmem:[%s8268_s28 + $0x98] sm:$0xff] %v5056_v7 }
0x1c58   : > { %6530 = shalt.err (!%p6527_p3)
}
0x1c59   : > { %s6531_s23 = scalar_lea.hbm %s8351_s21, 2560  ;;  %s6535_s20 = scalar_lea.hbm %s8412_s13, 5120 }
0x1c5a   : > { %p6532_p4 = scmp.ne.s32.totalorder %s8351_s21, %s6531_s23  ;;  %p6536_p9 = scmp.lt.s32.totalorder %s8351_s21, %s8412_s13 }
0x1c5b   : > { %p6537_p10 = scmp.lt.s32.totalorder %s6535_s20, %s6531_s23 }
0x1c5c   : > { %p6533_p7 = pnand %p6532_p4, %p6697_p5 }
0x1c5d   : > { %p6538_p11 = por %p6537_p10, %p6536_p9 }
0x1c5e   : > { %p6534_p8 = pneg %p6533_p7 }
0x1c60   : > { %p6539_p12 = pnand %p6538_p11, %p6534_p8 }
0x1c62   : > { %6542 = shalt.err (!%p6539_p12)
}
0x1c63   : > { %s6587_s22 = smov 128   ;;  %s6588_s24 = smov 8  }
0x1c64   : > { %6061 = dma.vmem_to_hbm [thread:$0]  (%p6697_p5), %s8353_s14, 2560, %s8351_s21, %s8359_s27, %s6587_s22, %s6587_s22, %s6588_s24  }
0x1c65 PF: > { %p6067_p13 = scmp.ge.s32.totalorder %s6577_s26, 2  ;;  %s5106_s30 = sand.u32 1, %s6565_s7  }
0x1c66   : > { %s5107_s0 = scalar_lea.sflag [#allocation4], %s5106_s30 }
0x1c67   : > { %p6064_p0 = pnand %p6067_p13, %p6701_p6 }
0x1c69   : > { %p6065_p1 = pneg %p6064_p0 }
0x1c6b   : > { %6560 = dma.done.wait (%p6065_p1), %s5107_s0, 2560  }
0x1c6c   : > { %6562 = vsyncadd (%p6065_p1), %s5107_s0, 4294964736  ;;  %p23_p2 = scmp.ge.s32.totalorder %s6684_s29, 4   ;;  %s8477_s7 = smov %s6569_s8 }
0x1c6d   : > { %s8478_s8 = smov %s6573_s25  ;;  %s8479_s25 = smov %s6695_s15 }
0x1c6e   : > { %s8480_s26 = smov %s6684_s29  ;;  %25 = sbr.rel (!%p23_p2) target bundleno = 5 (0x5), region = 125 }
0x1c73   :  { %5112 = vsyncpa [#allocation4], 1 }
0x1c74   :  { %5114 = vsyncpa [#allocation4 + $0x1], 1 }

</bundles_post_ra>
